<compile_context>
chip_gen: v7x
topology: tpu7x:2x2x1
jax: 0.10.0
libtpu: 0.0.40
codegen_flags: <defaults>
</compile_context>

<pallas_src>
import functools

import numpy as np

import jax
import jax.numpy as jnp
from jax.experimental import pallas as pl
from jax.experimental.pallas import tpu as pltpu


# ---------------------------------------------------------------------------
# Fused FSM kernel
# ---------------------------------------------------------------------------
def _fsm_kernel(*args, names, H, W, CS, E, OFF):
    n_in = 1 + len(names)
    x_ref = args[0]
    r = dict(zip(names, args[1:n_in]))
    o_ref = args[n_in]
    patches_ref = args[n_in + 1]      # (27*CS, H*W)  im2col patch buffer (f32)
    shift_ref = args[n_in + 2]        # (3*CS, 2*OFF + H*W) zero-padded shift buffer

    f32 = jnp.float32
    bf16 = jnp.bfloat16
    HW = H * W
    K1 = 9 * CS                       # patch rows of one CS-channel conv

    mask_cache = {}

    def col_mask(w, sw, hw):
        # valid iff 0 <= (lane mod w) + sw < w  (kills row wrap of the flat shift)
        key = (w, sw, hw)
        if key not in mask_cache:
            col = jax.lax.broadcasted_iota(jnp.int32, (1, hw), 1) & (w - 1)
            ok = jnp.logical_and(col + sw >= 0, col + sw < w)
            mask_cache[key] = ok.astype(f32)
        return mask_cache[key]

    def mmb(A, B):
        # bf16 x bf16 MXU matmul with f32 accumulation
        return jnp.dot(A.astype(bf16), B.astype(bf16), preferred_element_type=f32)

    def sp(X, name):
        # spatial operator (avg-pool / bilinear upsample) as a matmul
        return mmb(X, r[name][...])

    # zero the shift buffer ONCE per grid step: left/right halos and the rows
    # that never receive data stay zero for the whole invocation.
    shift_ref[...] = jnp.zeros_like(shift_ref)

    def load_shift(X, row0, hw):
        rows = X.shape[0]
        shift_ref[row0:row0 + rows, OFF:OFF + hw] = X
        if hw < HW:
            # re-zero the right margin that may hold stale data from an earlier
            # (larger-resolution) pass; OFF >= max flat tap offset of any conv.
            shift_ref[row0:row0 + rows, OFF + hw:OFF + hw + OFF] = jnp.zeros(
                (rows, OFF), dtype=shift_ref.dtype)

    def tap_slice(row0, rows, k, sw, w, hw):
        Z = shift_ref[row0:row0 + rows, OFF + k:OFF + k + hw]
        if sw != 0:
            Z = Z * col_mask(w, sw, hw)
        return Z

    def conv_matmul(wname, bname, rows, hw):
        p = patches_ref[0:rows, 0:hw]
        y = mmb(r[wname][...], p) + r[bname][...]
        return jnp.maximum(y, 0.0)

    def conv_single(X, wname, bname, h, w, d):
        # dilated 3x3 conv on <= CS channels: one im2col matmul
        hw = h * w
        load_shift(X, 0, hw)
        for kh in range(3):
            for kw in range(3):
                sh, sw = (kh - 1) * d, (kw - 1) * d
                t = kh * 3 + kw
                patches_ref[t * CS:(t + 1) * CS, 0:hw] = tap_slice(
                    0, CS, sh * w + sw, sw, w, hw)
        return conv_matmul(wname, bname, K1, hw)

    def conv_mixed(X, wname, bname, h, w):
        # merged branch-1/branch-2 level conv:
        #   rows [0:CS)   of X -> 3x3, dilation 1   (C2/C3/C4)
        #   rows [CS:2CS) of X -> 3x3, dilation 2   (DiC1/DiC2/DiC3)
        # patch layout: [ 9 taps (d=1) of a | 9 taps (d=2) of b ] -> one matmul.
        hw = h * w
        load_shift(X, 0, hw)
        for kh in range(3):
            for kw in range(3):
                t = kh * 3 + kw
                s1h, s1w = (kh - 1), (kw - 1)
                patches_ref[t * CS:(t + 1) * CS, 0:hw] = tap_slice(
                    0, CS, s1h * w + s1w, s1w, w, hw)
                s2h, s2w = 2 * (kh - 1), 2 * (kw - 1)
                patches_ref[K1 + t * CS:K1 + (t + 1) * CS, 0:hw] = tap_slice(
                    CS, CS, s2h * w + s2w, s2w, w, hw)
        return conv_matmul(wname, bname, 2 * K1, hw)

    # ---- fused 1x1 stems:  [s1 | s2 | s3] in one matmul ----
    X0 = x_ref[0]                                           # (Cin, HW) bf16
    S = jnp.maximum(mmb(r["w_stem"][...], X0) + r["b_stem"][...], 0.0)
    s12 = S[0:2 * CS]                                       # branches 1 & 2 stacked
    s3 = S[2 * CS:2 * CS + E]                               # branch 3

    # ---- branch 3: stacked dilated convs at full resolution (run first so the
    # ---- zero rows [E:CS) of the shift buffer are still untouched) ----
    c1 = conv_single(s3, "w_dic4", "b_dic4", H, W, 6)
    c2 = conv_single(c1, "w_dic5", "b_dic5", H, W, 4)
    c3 = conv_single(c2, "w_dic6", "b_dic6", H, W, 2)
    t3 = s3 + c1 + c2 + c3

    # ---- merged branch-1 / branch-2 pyramid (2q channels per level) ----
    p0 = sp(s12, "pool1")
    y1 = conv_mixed(p0, "w_p1", "b_p1", H // 2, W // 2)
    p1 = sp(y1, "pool2")
    y2 = conv_mixed(p1, "w_p2", "b_p2", H // 4, W // 4)
    p2 = sp(y2, "pool3")
    y3 = conv_mixed(p2, "w_p3", "b_p3", H // 8, W // 8)
    t12 = s12 + sp(y1, "up2") + sp(y2, "up4") + sp(y3, "up8")

    # ---- fused C5 | C7 | C9: tap-interleaved patches -> ONE store per tap ----
    load_shift(t12, 0, HW)            # rows [0:2CS)
    load_shift(t3, 2 * CS, HW)        # rows [2CS:2CS+E); rows [2CS+E:3CS) stay zero
    CS3 = 3 * CS
    for kh in range(3):
        for kw in range(3):
            t = kh * 3 + kw
            sh, sw = kh - 1, kw - 1
            patches_ref[t * CS3:(t + 1) * CS3, 0:HW] = tap_slice(
                0, CS3, sh * W + sw, sw, W, HW)
    o_ref[0] = conv_matmul("w_big", "b_big", 9 * CS3, HW)


def fsm_forward_pallas(x_nchw, kin):
    """x_nchw: (N, Cin, H, W) float32.  kin: dict of host-prepared kernel arrays."""
    N, Cin, H, W = x_nchw.shape
    HW = H * W
    assert H % 8 == 0 and W % 8 == 0, "spatial dims must be divisible by 8"
    assert (W & (W - 1)) == 0, "W must be a power of two"

    names = list(kin.keys())
    arrays = [x_nchw.reshape(N, Cin, HW).astype(jnp.bfloat16)]
    arrays += [kin[k] for k in names]

    CS = kin["w_dic4"].shape[1] // 9          # per-conv channel slot (== q)
    Ctot = kin["w_big"].shape[0]
    E = kin["w_stem"].shape[0] - 2 * CS       # branch-3 channel count
    OFF = ((6 * (W + 1) + 127) // 128) * 128  # halo for the largest flat shift (d=6)

    kernel = functools.partial(_fsm_kernel, names=names, H=H, W=W,
                               CS=CS, E=E, OFF=OFF)

    in_specs = [pl.BlockSpec((1, Cin, HW), lambda n: (n, 0, 0))]
    for a in arrays[1:]:
        in_specs.append(pl.BlockSpec(a.shape, lambda n, nd=a.ndim: (0,) * nd))

    scratch_shapes = [
        pltpu.VMEM((27 * CS, HW), jnp.float32),            # im2col patch buffer
        pltpu.VMEM((3 * CS, 2 * OFF + HW), jnp.float32),   # zero-padded shift buffer
    ]

    # explicit VMEM budget: double-buffered operands + in/out blocks + scratch + headroom
    def nbytes(a):
        return int(np.prod(a.shape)) * jnp.dtype(a.dtype).itemsize
    operand_bytes = sum(nbytes(a) for a in arrays[1:])
    block_bytes = Cin * HW * 2 + Ctot * HW * 4
    scratch_bytes = (27 * CS * HW + 3 * CS * (2 * OFF + HW)) * 4
    vmem_limit = int(min(2 * (operand_bytes + block_bytes) + scratch_bytes
                         + (16 << 20), 64 << 20))

    out = pl.pallas_call(
        kernel,
        out_shape=jax.ShapeDtypeStruct((N, Ctot, HW), jnp.float32),
        grid=(N,),
        in_specs=in_specs,
        out_specs=pl.BlockSpec((1, Ctot, HW), lambda n: (n, 0, 0)),
        scratch_shapes=scratch_shapes,
        compiler_params=pltpu.CompilerParams(
            dimension_semantics=("parallel",),
            vmem_limit_bytes=vmem_limit),
    )(*arrays)
    return out.reshape(N, Ctot, H, W)


# ---------------------------------------------------------------------------
# Host-side parameter construction (raw params + folded/fused kernel operands)
# ---------------------------------------------------------------------------
def make_conv_raw(key, cin, cout, k, groups, dilation, use_bn):
    kw_, kb_, kg_, kbe_ = jax.random.split(key, 4)
    cin_g, cout_g = cin // groups, cout // groups
    blocks = 0.1 * jax.random.normal(kw_, (groups, k, k, cin_g, cout_g), jnp.float32)
    w = jnp.zeros((k, k, cin, cout), jnp.float32)          # HWIO, block-diagonal
    for g in range(groups):
        w = w.at[:, :, g * cin_g:(g + 1) * cin_g,
                 g * cout_g:(g + 1) * cout_g].set(blocks[g])
    bias = 0.05 * jax.random.normal(kb_, (cout,), jnp.float32)
    gamma = 1.0 + 0.1 * jax.random.normal(kg_, (cout,), jnp.float32) if use_bn else None
    beta = 0.05 * jax.random.normal(kbe_, (cout,), jnp.float32) if use_bn else None
    return dict(w=w, bias=bias, gamma=gamma, beta=beta, bn=use_bn,
                dil=dilation, pad=dilation * (k // 2), k=k, cin=cin, cout=cout)


def init_fsm_raw_params(key, inchannels, outchannels):
    q = outchannels // 4
    e = outchannels // 8
    specs = {
        "C1":   (inchannels, q,     1, 1, 1, False),
        "C2":   (q,          q,     3, 4, 1, True),
        "C3":   (q,          q,     3, 4, 1, True),
        "C4":   (q,          q,     3, 4, 1, True),
        "C5":   (q,          e * 3, 3, 4, 1, True),
        "C6":   (inchannels, q,     1, 1, 1, False),
        "DiC1": (q,          q,     3, 4, 2, True),
        "DiC2": (q,          q,     3, 4, 2, True),
        "DiC3": (q,          q,     3, 4, 2, True),
        "C7":   (q,          e * 3, 3, 4, 1, True),
        "C8":   (inchannels, e,     1, 1, 1, False),
        "DiC4": (e,          e,     3, 4, 6, True),
        "DiC5": (e,          e,     3, 4, 4, True),
        "DiC6": (e,          e,     3, 4, 2, True),
        "C9":   (e,          e * 2, 3, 4, 1, True),
    }
    keys = jax.random.split(key, len(specs))
    return {name: make_conv_raw(k, *spec)
            for k, (name, spec) in zip(keys, specs.items())}


def fold_conv1x1(p):
    return p["w"][0, 0].T, p["bias"].reshape(p["cout"], 1)


def fold_conv3x3(p, cs):
    """BN scale folded into the weights; returns ((Cout, 9*cs), (Cout, 1))."""
    w, bias = p["w"], p["bias"]
    cout, cin = p["cout"], p["cin"]
    if p["bn"]:
        scale = p["gamma"] / jnp.sqrt(1.0 + 1e-5)      # running_var = 1, eps = 1e-5
        shift = scale * bias + p["beta"]               # running_mean = 0
    else:
        scale = jnp.ones_like(bias)
        shift = bias
    wk = jnp.zeros((cout, 9 * cs), jnp.float32)
    for kh in range(3):
        for kw in range(3):
            t = kh * 3 + kw
            blk = (w[kh, kw] * scale[None, :]).T       # (cout, cin), scale folded
            wk = wk.at[:, t * cs:t * cs + cin].set(blk)
    return wk, shift.reshape(cout, 1)


def _pool_matrix_1d(n):
    P = np.zeros((n // 2, n), np.float32)
    for i in range(n // 2):
        P[i, 2 * i] = 0.5
        P[i, 2 * i + 1] = 0.5
    return P


def _interp_matrix_1d(nin, nout):
    U = np.zeros((nout, nin), np.float32)
    if nin == 1:
        U[:, 0] = 1.0
        return U
    pos = np.linspace(0.0, nin - 1.0, nout)
    i0 = np.minimum(np.floor(pos).astype(np.int64), nin - 1)
    frac = (pos - i0).astype(np.float32)
    i1 = np.minimum(i0 + 1, nin - 1)
    for r in range(nout):
        U[r, i0[r]] += 1.0 - frac[r]
        U[r, i1[r]] += frac[r]
    return U


def pool_matrix_T(h, w):
    return jnp.asarray(np.kron(_pool_matrix_1d(h), _pool_matrix_1d(w)).T)


def upsample_matrix_T(hin, win, hout, wout):
    return jnp.asarray(np.kron(_interp_matrix_1d(hin, hout),
                               _interp_matrix_1d(win, wout)).T)


def build_fsm_inputs(raw, H, W):
    q = raw["C2"]["cin"]          # outchannels // 4
    e = raw["DiC4"]["cin"]        # outchannels // 8
    assert q % 8 == 0 and e <= q, "outchannels must be a multiple of 32"
    CS = q
    K1 = 9 * CS
    bf = jnp.bfloat16
    kin = {}

    # fused 1x1 stems: rows [0:q)=C1, [q:2q)=C6, [2q:2q+e)=C8
    w1, b1 = fold_conv1x1(raw["C1"])
    w6, b6 = fold_conv1x1(raw["C6"])
    w8, b8 = fold_conv1x1(raw["C8"])
    kin["w_stem"] = jnp.concatenate([w1, w6, w8], axis=0).astype(bf)
    kin["b_stem"] = jnp.concatenate([b1, b6, b8], axis=0)

    # merged pyramid levels: block-diag of (dilation-1 conv, dilation-2 conv)
    def merged(n_a, n_b):
        wa, ba = fold_conv3x3(raw[n_a], CS)
        wb, bb = fold_conv3x3(raw[n_b], CS)
        wm = jnp.zeros((2 * q, 2 * K1), jnp.float32)
        wm = wm.at[0:q, 0:K1].set(wa)
        wm = wm.at[q:2 * q, K1:2 * K1].set(wb)
        return wm.astype(bf), jnp.concatenate([ba, bb], axis=0)

    kin["w_p1"], kin["b_p1"] = merged("C2", "DiC1")
    kin["w_p2"], kin["b_p2"] = merged("C3", "DiC2")
    kin["w_p3"], kin["b_p3"] = merged("C4", "DiC3")

    # branch-3 dilated convs (full resolution)
    for name in ("DiC4", "DiC5", "DiC6"):
        wk, sh = fold_conv3x3(raw[name], CS)
        kin["w_" + name.lower()] = wk.astype(bf)
        kin["b_" + name.lower()] = sh

    # fused C5|C7|C9, tap-interleaved columns: per tap t the 3*CS-wide column
    # block is [t1-channels | t2-channels | t3-channels].
    wk5, b5 = fold_conv3x3(raw["C5"], CS)
    wk7, b7 = fold_conv3x3(raw["C7"], CS)
    wk9, b9 = fold_conv3x3(raw["C9"], CS)
    c5, c7, _ = wk5.shape[0], wk7.shape[0], wk9.shape[0]
    Ctot = wk5.shape[0] + wk7.shape[0] + wk9.shape[0]
    w_big = jnp.zeros((Ctot, 27 * CS), jnp.float32)
    for t in range(9):
        base = t * 3 * CS
        w_big = w_big.at[0:c5, base:base + CS].set(wk5[:, t * CS:(t + 1) * CS])
        w_big = w_big.at[c5:c5 + c7, base + CS:base + 2 * CS].set(
            wk7[:, t * CS:(t + 1) * CS])
        w_big = w_big.at[c5 + c7:, base + 2 * CS:base + 3 * CS].set(
            wk9[:, t * CS:(t + 1) * CS])
    kin["w_big"] = w_big.astype(bf)
    kin["b_big"] = jnp.concatenate([b5, b7, b9], axis=0)

    # spatial operators (bf16 matmul operands)
    kin["pool1"] = pool_matrix_T(H, W).astype(bf)
    kin["pool2"] = pool_matrix_T(H // 2, W // 2).astype(bf)
    kin["pool3"] = pool_matrix_T(H // 4, W // 4).astype(bf)
    kin["up2"] = upsample_matrix_T(H // 2, W // 2, H, W).astype(bf)
    kin["up4"] = upsample_matrix_T(H // 4, W // 4, H, W).astype(bf)
    kin["up8"] = upsample_matrix_T(H // 8, W // 8, H, W).astype(bf)
    return kin


# ---------------------------------------------------------------------------
# Pure-JAX reference (trusted ops) for correctness checking
# ---------------------------------------------------------------------------
def fsm_reference(x_nchw, raw):
    x = jnp.transpose(x_nchw, (0, 2, 3, 1)).astype(jnp.float32)   # NHWC
    N, H, W, _ = x.shape

    def conv(name, y):
        p = raw[name]
        z = jax.lax.conv_general_dilated(
            y, p["w"], window_strides=(1, 1),
            padding=[(p["pad"], p["pad"]), (p["pad"], p["pad"])],
            rhs_dilation=(p["dil"], p["dil"]),
            dimension_numbers=("NHWC", "HWIO", "NHWC"),
            precision=jax.lax.Precision.HIGHEST)
        z = z + p["bias"]
        if p["bn"]:
            z = p["gamma"] * z / jnp.sqrt(1.0 + 1e-5) + p["beta"]
        return jnp.maximum(z, 0.0)

    def pool(y):
        n, h, w, c = y.shape
        return y.reshape(n, h // 2, 2, w // 2, 2, c).mean(axis=(2, 4))

    def upsample(y, oh, ow):
        n, h, w, c = y.shape
        hs = jnp.linspace(0.0, h - 1.0, oh)
        ws = jnp.linspace(0.0, w - 1.0, ow)
        h0 = jnp.floor(hs).astype(jnp.int32)
        w0 = jnp.floor(ws).astype(jnp.int32)
        h1 = jnp.minimum(h0 + 1, h - 1)
        w1 = jnp.minimum(w0 + 1, w - 1)
        ah = (hs - h0)[None, :, None, None]
        aw = (ws - w0)[None, None, :, None]
        yr = y[:, h0, :, :] * (1.0 - ah) + y[:, h1, :, :] * ah
        return yr[:, :, w0, :] * (1.0 - aw) + yr[:, :, w1, :] * aw

    s1 = conv("C1", x)
    a1 = conv("C2", pool(s1)); a2 = conv("C3", pool(a1)); a3 = conv("C4", pool(a2))
    s1 = conv("C5", s1 + upsample(a1, H, W) + upsample(a2, H, W) + upsample(a3, H, W))

    s2 = conv("C6", x)
    b1 = conv("DiC1", pool(s2)); b2 = conv("DiC2", pool(b1)); b3 = conv("DiC3", pool(b2))
    s2 = conv("C7", s2 + upsample(b1, H, W) + upsample(b2, H, W) + upsample(b3, H, W))

    s3 = conv("C8", x)
    c1 = conv("DiC4", s3); c2 = conv("DiC5", c1); c3 = conv("DiC6", c2)
    s3 = conv("C9", s3 + c1 + c2 + c3)

    out = jnp.concatenate([s1, s2, s3], axis=-1)
    return jnp.transpose(out, (0, 3, 1, 2))


# ---------------------------------------------------------------------------
if __name__ == "__main__":
    inchannels, outchannels = 4, 32
    N, H, W = 2, 16, 16

    root = jax.random.PRNGKey(0)
    k_param, k_x = jax.random.split(root)
    raw = init_fsm_raw_params(k_param, inchannels, outchannels)
    kin = build_fsm_inputs(raw, H, W)
    x = jax.random.normal(k_x, (N, inchannels, H, W), jnp.float32)   # NCHW like PyTorch

    fwd = jax.jit(fsm_forward_pallas)
    out = fwd(x, kin)
    out = jax.block_until_ready(out)

    assert out.shape == (N, outchannels, H, W), out.shape
    assert bool(jnp.all(jnp.isfinite(out)))

    # tolerance re-derived for bf16 matmul operands with f32 accumulation
    ref = fsm_reference(x, raw)
    np.testing.assert_allclose(np.asarray(out), np.asarray(ref), rtol=5e-2, atol=2e-2)

    print("KERNEL_OK")
</pallas_src>

<mosaic_0001>
module attributes {stable_mosaic.version = 11 : i64} {
  func.func @_fsm_kernel(%arg0: i32, %arg1: memref<1x4x256xbf16, #tpu.memory_space<vmem>>, %arg2: memref<32x1xf32, #tpu.memory_space<vmem>>, %arg3: memref<4x1xf32, #tpu.memory_space<vmem>>, %arg4: memref<4x1xf32, #tpu.memory_space<vmem>>, %arg5: memref<4x1xf32, #tpu.memory_space<vmem>>, %arg6: memref<16x1xf32, #tpu.memory_space<vmem>>, %arg7: memref<16x1xf32, #tpu.memory_space<vmem>>, %arg8: memref<16x1xf32, #tpu.memory_space<vmem>>, %arg9: memref<20x1xf32, #tpu.memory_space<vmem>>, %arg10: memref<256x64xbf16, #tpu.memory_space<vmem>>, %arg11: memref<64x16xbf16, #tpu.memory_space<vmem>>, %arg12: memref<16x4xbf16, #tpu.memory_space<vmem>>, %arg13: memref<64x256xbf16, #tpu.memory_space<vmem>>, %arg14: memref<16x256xbf16, #tpu.memory_space<vmem>>, %arg15: memref<4x256xbf16, #tpu.memory_space<vmem>>, %arg16: memref<32x216xbf16, #tpu.memory_space<vmem>>, %arg17: memref<4x72xbf16, #tpu.memory_space<vmem>>, %arg18: memref<4x72xbf16, #tpu.memory_space<vmem>>, %arg19: memref<4x72xbf16, #tpu.memory_space<vmem>>, %arg20: memref<16x144xbf16, #tpu.memory_space<vmem>>, %arg21: memref<16x144xbf16, #tpu.memory_space<vmem>>, %arg22: memref<16x144xbf16, #tpu.memory_space<vmem>>, %arg23: memref<20x4xbf16, #tpu.memory_space<vmem>>, %arg24: memref<1x32x256xf32, #tpu.memory_space<vmem>>, %arg25: memref<216x256xf32, #tpu.memory_space<vmem>>, %arg26: memref<24x512xf32, #tpu.memory_space<vmem>>) attributes {dimension_semantics = [#tpu.dimension_semantics<parallel>], iteration_bounds = array<i64: 2>, scalar_prefetch = 0 : i64, scratch_operands = 2 : i64, tpu.core_type = #tpu.core_type<tc>, window_params = [{transform_indices = @transform_0, window_bounds = array<i64: 1, 4, 256>}, {pipeline_mode = #tpu.pipeline_mode<synchronous>, transform_indices = @transform_1, window_bounds = array<i64: 32, 1>}, {pipeline_mode = #tpu.pipeline_mode<synchronous>, transform_indices = @transform_2, window_bounds = array<i64: 4, 1>}, {pipeline_mode = #tpu.pipeline_mode<synchronous>, transform_indices = @transform_3, window_bounds = array<i64: 4, 1>}, {pipeline_mode = #tpu.pipeline_mode<synchronous>, transform_indices = @transform_4, window_bounds = array<i64: 4, 1>}, {pipeline_mode = #tpu.pipeline_mode<synchronous>, transform_indices = @transform_5, window_bounds = array<i64: 16, 1>}, {pipeline_mode = #tpu.pipeline_mode<synchronous>, transform_indices = @transform_6, window_bounds = array<i64: 16, 1>}, {pipeline_mode = #tpu.pipeline_mode<synchronous>, transform_indices = @transform_7, window_bounds = array<i64: 16, 1>}, {pipeline_mode = #tpu.pipeline_mode<synchronous>, transform_indices = @transform_8, window_bounds = array<i64: 20, 1>}, {pipeline_mode = #tpu.pipeline_mode<synchronous>, transform_indices = @transform_9, window_bounds = array<i64: 256, 64>}, {pipeline_mode = #tpu.pipeline_mode<synchronous>, transform_indices = @transform_10, window_bounds = array<i64: 64, 16>}, {pipeline_mode = #tpu.pipeline_mode<synchronous>, transform_indices = @transform_11, window_bounds = array<i64: 16, 4>}, {pipeline_mode = #tpu.pipeline_mode<synchronous>, transform_indices = @transform_12, window_bounds = array<i64: 64, 256>}, {pipeline_mode = #tpu.pipeline_mode<synchronous>, transform_indices = @transform_13, window_bounds = array<i64: 16, 256>}, {pipeline_mode = #tpu.pipeline_mode<synchronous>, transform_indices = @transform_14, window_bounds = array<i64: 4, 256>}, {pipeline_mode = #tpu.pipeline_mode<synchronous>, transform_indices = @transform_15, window_bounds = array<i64: 32, 216>}, {pipeline_mode = #tpu.pipeline_mode<synchronous>, transform_indices = @transform_16, window_bounds = array<i64: 4, 72>}, {pipeline_mode = #tpu.pipeline_mode<synchronous>, transform_indices = @transform_17, window_bounds = array<i64: 4, 72>}, {pipeline_mode = #tpu.pipeline_mode<synchronous>, transform_indices = @transform_18, window_bounds = array<i64: 4, 72>}, {pipeline_mode = #tpu.pipeline_mode<synchronous>, transform_indices = @transform_19, window_bounds = array<i64: 16, 144>}, {pipeline_mode = #tpu.pipeline_mode<synchronous>, transform_indices = @transform_20, window_bounds = array<i64: 16, 144>}, {pipeline_mode = #tpu.pipeline_mode<synchronous>, transform_indices = @transform_21, window_bounds = array<i64: 16, 144>}, {pipeline_mode = #tpu.pipeline_mode<synchronous>, transform_indices = @transform_22, window_bounds = array<i64: 20, 4>}, {transform_indices = @transform_23, window_bounds = array<i64: 1, 32, 256>}]} {
    %cst = arith.constant 0.000000e+00 : f32
    %0 = vector.broadcast %cst : f32 to vector<24x512xf32>
    %c0 = arith.constant 0 : index
    %c0_0 = arith.constant 0 : index
    %1 = vector.load %arg26[%c0, %c0_0] : memref<24x512xf32, #tpu.memory_space<vmem>>, vector<24x512xf32>
    tpu.vector_store %arg26[%c0, %c0_0], %0 {strides = array<i32>} : memref<24x512xf32, #tpu.memory_space<vmem>>, vector<24x512xf32>,
    %c0_1 = arith.constant 0 : index
    %c0_2 = arith.constant 0 : index
    %c0_3 = arith.constant 0 : index
    %2 = vector.load %arg1[%c0_1, %c0_2, %c0_3] : memref<1x4x256xbf16, #tpu.memory_space<vmem>>, vector<1x4x256xbf16>
    %3 = vector.shape_cast %2 : vector<1x4x256xbf16> to vector<4x256xbf16>
    %c0_4 = arith.constant 0 : index
    %c0_5 = arith.constant 0 : index
    %4 = vector.load %arg23[%c0_4, %c0_5] : memref<20x4xbf16, #tpu.memory_space<vmem>>, vector<20x4xbf16>
    %cst_6 = arith.constant dense<0.000000e+00> : vector<20x256xf32>
    %5 = tpu.matmul %4, %3, %cst_6 {dimension_numbers = #tpu.dot_dimension_numbers<[1], [0], [0], [1], [0, 0, 1, 1], [], []>} : vector<20x4xbf16>, vector<4x256xbf16>, vector<20x256xf32> -> vector<20x256xf32>
    %c0_7 = arith.constant 0 : index
    %c0_8 = arith.constant 0 : index
    %6 = vector.load %arg9[%c0_7, %c0_8] : memref<20x1xf32, #tpu.memory_space<vmem>>, vector<20x1xf32>
    %7 = vector.broadcast %6 : vector<20x1xf32> to vector<20x256xf32>
    %8 = arith.addf %5, %7 : vector<20x256xf32>
    %cst_9 = arith.constant 0.000000e+00 : f32
    %9 = vector.broadcast %cst_9 : f32 to vector<20x256xf32>
    %10 = arith.maximumf %8, %9 : vector<20x256xf32>
    %11 = vector.extract_strided_slice %10 {offsets = [0, 0], sizes = [16, 256], strides = [1, 1]} : vector<20x256xf32> to vector<16x256xf32>
    %12 = vector.extract_strided_slice %10 {offsets = [16, 0], sizes = [4, 256], strides = [1, 1]} : vector<20x256xf32> to vector<4x256xf32>
    %c0_10 = arith.constant 0 : index
    %c128 = arith.constant 128 : index
    %13 = vector.load %arg26[%c0_10, %c128] : memref<24x512xf32, #tpu.memory_space<vmem>>, vector<4x256xf32>
    tpu.vector_store %arg26[%c0_10, %c128], %12 {strides = array<i32>} : memref<24x512xf32, #tpu.memory_space<vmem>>, vector<4x256xf32>,
    %c0_11 = arith.constant 0 : index
    %c26 = arith.constant 26 : index
    %14 = vector.load %arg26[%c0_11, %c26] : memref<24x512xf32, #tpu.memory_space<vmem>>, vector<8x256xf32>
    %15 = tpu.iota {dimensions = array<i32: 1>} : vector<1x256xi32>
    %c15_i32 = arith.constant 15 : i32
    %16 = vector.broadcast %c15_i32 : i32 to vector<1x256xi32>
    %17 = arith.andi %15, %16 : vector<1x256xi32>
    %c-6_i32 = arith.constant -6 : i32
    %18 = vector.broadcast %c-6_i32 : i32 to vector<1x256xi32>
    %19 = arith.addi %17, %18 : vector<1x256xi32>
    %c0_i32 = arith.constant 0 : i32
    %20 = vector.broadcast %c0_i32 : i32 to vector<1x256xi32>
    %21 = arith.cmpi sge, %19, %20 : vector<1x256xi32>
    %c-6_i32_12 = arith.constant -6 : i32
    %22 = vector.broadcast %c-6_i32_12 : i32 to vector<1x256xi32>
    %23 = arith.addi %17, %22 : vector<1x256xi32>
    %c16_i32 = arith.constant 16 : i32
    %24 = vector.broadcast %c16_i32 : i32 to vector<1x256xi32>
    %25 = arith.cmpi slt, %23, %24 : vector<1x256xi32>
    %26 = arith.andi %21, %25 : vector<1x256xi1>
    %27 = arith.extui %26 : vector<1x256xi1> to vector<1x256xi32>
    %28 = arith.sitofp %27 : vector<1x256xi32> to vector<1x256xf32>
    %29 = vector.broadcast %28 : vector<1x256xf32> to vector<8x256xf32>
    %30 = arith.mulf %14, %29 : vector<8x256xf32>
    %c0_13 = arith.constant 0 : index
    %c0_14 = arith.constant 0 : index
    %31 = vector.load %arg25[%c0_13, %c0_14] : memref<216x256xf32, #tpu.memory_space<vmem>>, vector<8x256xf32>
    tpu.vector_store %arg25[%c0_13, %c0_14], %30 {strides = array<i32>} : memref<216x256xf32, #tpu.memory_space<vmem>>, vector<8x256xf32>,
    %c0_15 = arith.constant 0 : index
    %c32 = arith.constant 32 : index
    %32 = vector.load %arg26[%c0_15, %c32] : memref<24x512xf32, #tpu.memory_space<vmem>>, vector<8x256xf32>
    %c8 = arith.constant 8 : index
    %c0_16 = arith.constant 0 : index
    %33 = vector.load %arg25[%c8, %c0_16] : memref<216x256xf32, #tpu.memory_space<vmem>>, vector<8x256xf32>
    tpu.vector_store %arg25[%c8, %c0_16], %32 {strides = array<i32>} : memref<216x256xf32, #tpu.memory_space<vmem>>, vector<8x256xf32>,
    %c0_17 = arith.constant 0 : index
    %c38 = arith.constant 38 : index
    %34 = vector.load %arg26[%c0_17, %c38] : memref<24x512xf32, #tpu.memory_space<vmem>>, vector<8x256xf32>
    %35 = tpu.iota {dimensions = array<i32: 1>} : vector<1x256xi32>
    %c15_i32_18 = arith.constant 15 : i32
    %36 = vector.broadcast %c15_i32_18 : i32 to vector<1x256xi32>
    %37 = arith.andi %35, %36 : vector<1x256xi32>
    %c6_i32 = arith.constant 6 : i32
    %38 = vector.broadcast %c6_i32 : i32 to vector<1x256xi32>
    %39 = arith.addi %37, %38 : vector<1x256xi32>
    %c0_i32_19 = arith.constant 0 : i32
    %40 = vector.broadcast %c0_i32_19 : i32 to vector<1x256xi32>
    %41 = arith.cmpi sge, %39, %40 : vector<1x256xi32>
    %c6_i32_20 = arith.constant 6 : i32
    %42 = vector.broadcast %c6_i32_20 : i32 to vector<1x256xi32>
    %43 = arith.addi %37, %42 : vector<1x256xi32>
    %c16_i32_21 = arith.constant 16 : i32
    %44 = vector.broadcast %c16_i32_21 : i32 to vector<1x256xi32>
    %45 = arith.cmpi slt, %43, %44 : vector<1x256xi32>
    %46 = arith.andi %41, %45 : vector<1x256xi1>
    %47 = arith.extui %46 : vector<1x256xi1> to vector<1x256xi32>
    %48 = arith.sitofp %47 : vector<1x256xi32> to vector<1x256xf32>
    %49 = vector.broadcast %48 : vector<1x256xf32> to vector<8x256xf32>
    %50 = arith.mulf %34, %49 : vector<8x256xf32>
    %c16 = arith.constant 16 : index
    %c0_22 = arith.constant 0 : index
    %51 = vector.load %arg25[%c16, %c0_22] : memref<216x256xf32, #tpu.memory_space<vmem>>, vector<8x256xf32>
    tpu.vector_store %arg25[%c16, %c0_22], %50 {strides = array<i32>} : memref<216x256xf32, #tpu.memory_space<vmem>>, vector<8x256xf32>,
    %c0_23 = arith.constant 0 : index
    %c122 = arith.constant 122 : index
    %52 = vector.load %arg26[%c0_23, %c122] : memref<24x512xf32, #tpu.memory_space<vmem>>, vector<8x256xf32>
    %53 = vector.broadcast %28 : vector<1x256xf32> to vector<8x256xf32>
    %54 = arith.mulf %52, %53 : vector<8x256xf32>
    %c24 = arith.constant 24 : index
    %c0_24 = arith.constant 0 : index
    %55 = vector.load %arg25[%c24, %c0_24] : memref<216x256xf32, #tpu.memory_space<vmem>>, vector<8x256xf32>
    tpu.vector_store %arg25[%c24, %c0_24], %54 {strides = array<i32>} : memref<216x256xf32, #tpu.memory_space<vmem>>, vector<8x256xf32>,
    %c0_25 = arith.constant 0 : index
    %c128_26 = arith.constant 128 : index
    %56 = vector.load %arg26[%c0_25, %c128_26] : memref<24x512xf32, #tpu.memory_space<vmem>>, vector<8x256xf32>
    %c32_27 = arith.constant 32 : index
    %c0_28 = arith.constant 0 : index
    %57 = vector.load %arg25[%c32_27, %c0_28] : memref<216x256xf32, #tpu.memory_space<vmem>>, vector<8x256xf32>
    tpu.vector_store %arg25[%c32_27, %c0_28], %56 {strides = array<i32>} : memref<216x256xf32, #tpu.memory_space<vmem>>, vector<8x256xf32>,
    %c0_29 = arith.constant 0 : index
    %c134 = arith.constant 134 : index
    %58 = vector.load %arg26[%c0_29, %c134] : memref<24x512xf32, #tpu.memory_space<vmem>>, vector<8x256xf32>
    %59 = vector.broadcast %48 : vector<1x256xf32> to vector<8x256xf32>
    %60 = arith.mulf %58, %59 : vector<8x256xf32>
    %c40 = arith.constant 40 : index
    %c0_30 = arith.constant 0 : index
    %61 = vector.load %arg25[%c40, %c0_30] : memref<216x256xf32, #tpu.memory_space<vmem>>, vector<8x256xf32>
    tpu.vector_store %arg25[%c40, %c0_30], %60 {strides = array<i32>} : memref<216x256xf32, #tpu.memory_space<vmem>>, vector<8x256xf32>,
    %c0_31 = arith.constant 0 : index
    %c218 = arith.constant 218 : index
    %62 = vector.load %arg26[%c0_31, %c218] : memref<24x512xf32, #tpu.memory_space<vmem>>, vector<8x256xf32>
    %63 = vector.broadcast %28 : vector<1x256xf32> to vector<8x256xf32>
    %64 = arith.mulf %62, %63 : vector<8x256xf32>
    %c48 = arith.constant 48 : index
    %c0_32 = arith.constant 0 : index
    %65 = vector.load %arg25[%c48, %c0_32] : memref<216x256xf32, #tpu.memory_space<vmem>>, vector<8x256xf32>
    tpu.vector_store %arg25[%c48, %c0_32], %64 {strides = array<i32>} : memref<216x256xf32, #tpu.memory_space<vmem>>, vector<8x256xf32>,
    %c0_33 = arith.constant 0 : index
    %c224 = arith.constant 224 : index
    %66 = vector.load %arg26[%c0_33, %c224] : memref<24x512xf32, #tpu.memory_space<vmem>>, vector<8x256xf32>
    %c56 = arith.constant 56 : index
    %c0_34 = arith.constant 0 : index
    %67 = vector.load %arg25[%c56, %c0_34] : memref<216x256xf32, #tpu.memory_space<vmem>>, vector<8x256xf32>
    tpu.vector_store %arg25[%c56, %c0_34], %66 {strides = array<i32>} : memref<216x256xf32, #tpu.memory_space<vmem>>, vector<8x256xf32>,
    %c0_35 = arith.constant 0 : index
    %c230 = arith.constant 230 : index
    %68 = vector.load %arg26[%c0_35, %c230] : memref<24x512xf32, #tpu.memory_space<vmem>>, vector<8x256xf32>
    %69 = vector.broadcast %48 : vector<1x256xf32> to vector<8x256xf32>
    %70 = arith.mulf %68, %69 : vector<8x256xf32>
    %c64 = arith.constant 64 : index
    %c0_36 = arith.constant 0 : index
    %71 = vector.load %arg25[%c64, %c0_36] : memref<216x256xf32, #tpu.memory_space<vmem>>, vector<8x256xf32>
    tpu.vector_store %arg25[%c64, %c0_36], %70 {strides = array<i32>} : memref<216x256xf32, #tpu.memory_space<vmem>>, vector<8x256xf32>,
    %c0_37 = arith.constant 0 : index
    %c0_38 = arith.constant 0 : index
    %72 = vector.load %arg25[%c0_37, %c0_38] : memref<216x256xf32, #tpu.memory_space<vmem>>, vector<72x256xf32>
    %c0_39 = arith.constant 0 : index
    %c0_40 = arith.constant 0 : index
    %73 = vector.load %arg17[%c0_39, %c0_40] : memref<4x72xbf16, #tpu.memory_space<vmem>>, vector<4x72xbf16>
    %74 = arith.truncf %72 : vector<72x256xf32> to vector<72x256xbf16>
    %cst_41 = arith.constant dense<0.000000e+00> : vector<4x256xf32>
    %75 = tpu.matmul %73, %74, %cst_41 {dimension_numbers = #tpu.dot_dimension_numbers<[1], [0], [0], [1], [0, 0, 1, 1], [], []>} : vector<4x72xbf16>, vector<72x256xbf16>, vector<4x256xf32> -> vector<4x256xf32>
    %c0_42 = arith.constant 0 : index
    %c0_43 = arith.constant 0 : index
    %76 = vector.load %arg3[%c0_42, %c0_43] : memref<4x1xf32, #tpu.memory_space<vmem>>, vector<4x1xf32>
    %77 = vector.broadcast %76 : vector<4x1xf32> to vector<4x256xf32>
    %78 = arith.addf %75, %77 : vector<4x256xf32>
    %cst_44 = arith.constant 0.000000e+00 : f32
    %79 = vector.broadcast %cst_44 : f32 to vector<4x256xf32>
    %80 = arith.maximumf %78, %79 : vector<4x256xf32>
    %c0_45 = arith.constant 0 : index
    %c128_46 = arith.constant 128 : index
    %81 = vector.load %arg26[%c0_45, %c128_46] : memref<24x512xf32, #tpu.memory_space<vmem>>, vector<4x256xf32>
    tpu.vector_store %arg26[%c0_45, %c128_46], %80 {strides = array<i32>} : memref<24x512xf32, #tpu.memory_space<vmem>>, vector<4x256xf32>,
    %c0_47 = arith.constant 0 : index
    %c60 = arith.constant 60 : index
    %82 = vector.load %arg26[%c0_47, %c60] : memref<24x512xf32, #tpu.memory_space<vmem>>, vector<8x256xf32>
    %83 = tpu.iota {dimensions = array<i32: 1>} : vector<1x256xi32>
    %c15_i32_48 = arith.constant 15 : i32
    %84 = vector.broadcast %c15_i32_48 : i32 to vector<1x256xi32>
    %85 = arith.andi %83, %84 : vector<1x256xi32>
    %c-4_i32 = arith.constant -4 : i32
    %86 = vector.broadcast %c-4_i32 : i32 to vector<1x256xi32>
    %87 = arith.addi %85, %86 : vector<1x256xi32>
    %c0_i32_49 = arith.constant 0 : i32
    %88 = vector.broadcast %c0_i32_49 : i32 to vector<1x256xi32>
    %89 = arith.cmpi sge, %87, %88 : vector<1x256xi32>
    %c-4_i32_50 = arith.constant -4 : i32
    %90 = vector.broadcast %c-4_i32_50 : i32 to vector<1x256xi32>
    %91 = arith.addi %85, %90 : vector<1x256xi32>
    %c16_i32_51 = arith.constant 16 : i32
    %92 = vector.broadcast %c16_i32_51 : i32 to vector<1x256xi32>
    %93 = arith.cmpi slt, %91, %92 : vector<1x256xi32>
    %94 = arith.andi %89, %93 : vector<1x256xi1>
    %95 = arith.extui %94 : vector<1x256xi1> to vector<1x256xi32>
    %96 = arith.sitofp %95 : vector<1x256xi32> to vector<1x256xf32>
    %97 = vector.broadcast %96 : vector<1x256xf32> to vector<8x256xf32>
    %98 = arith.mulf %82, %97 : vector<8x256xf32>
    %c0_52 = arith.constant 0 : index
    %c0_53 = arith.constant 0 : index
    %99 = vector.load %arg25[%c0_52, %c0_53] : memref<216x256xf32, #tpu.memory_space<vmem>>, vector<8x256xf32>
    tpu.vector_store %arg25[%c0_52, %c0_53], %98 {strides = array<i32>} : memref<216x256xf32, #tpu.memory_space<vmem>>, vector<8x256xf32>,
    %c0_54 = arith.constant 0 : index
    %c64_55 = arith.constant 64 : index
    %100 = vector.load %arg26[%c0_54, %c64_55] : memref<24x512xf32, #tpu.memory_space<vmem>>, vector<8x256xf32>
    %c8_56 = arith.constant 8 : index
    %c0_57 = arith.constant 0 : index
    %101 = vector.load %arg25[%c8_56, %c0_57] : memref<216x256xf32, #tpu.memory_space<vmem>>, vector<8x256xf32>
    tpu.vector_store %arg25[%c8_56, %c0_57], %100 {strides = array<i32>} : memref<216x256xf32, #tpu.memory_space<vmem>>, vector<8x256xf32>,
    %c0_58 = arith.constant 0 : index
    %c68 = arith.constant 68 : index
    %102 = vector.load %arg26[%c0_58, %c68] : memref<24x512xf32, #tpu.memory_space<vmem>>, vector<8x256xf32>
    %103 = tpu.iota {dimensions = array<i32: 1>} : vector<1x256xi32>
    %c15_i32_59 = arith.constant 15 : i32
    %104 = vector.broadcast %c15_i32_59 : i32 to vector<1x256xi32>
    %105 = arith.andi %103, %104 : vector<1x256xi32>
    %c4_i32 = arith.constant 4 : i32
    %106 = vector.broadcast %c4_i32 : i32 to vector<1x256xi32>
    %107 = arith.addi %105, %106 : vector<1x256xi32>
    %c0_i32_60 = arith.constant 0 : i32
    %108 = vector.broadcast %c0_i32_60 : i32 to vector<1x256xi32>
    %109 = arith.cmpi sge, %107, %108 : vector<1x256xi32>
    %c4_i32_61 = arith.constant 4 : i32
    %110 = vector.broadcast %c4_i32_61 : i32 to vector<1x256xi32>
    %111 = arith.addi %105, %110 : vector<1x256xi32>
    %c16_i32_62 = arith.constant 16 : i32
    %112 = vector.broadcast %c16_i32_62 : i32 to vector<1x256xi32>
    %113 = arith.cmpi slt, %111, %112 : vector<1x256xi32>
    %114 = arith.andi %109, %113 : vector<1x256xi1>
    %115 = arith.extui %114 : vector<1x256xi1> to vector<1x256xi32>
    %116 = arith.sitofp %115 : vector<1x256xi32> to vector<1x256xf32>
    %117 = vector.broadcast %116 : vector<1x256xf32> to vector<8x256xf32>
    %118 = arith.mulf %102, %117 : vector<8x256xf32>
    %c16_63 = arith.constant 16 : index
    %c0_64 = arith.constant 0 : index
    %119 = vector.load %arg25[%c16_63, %c0_64] : memref<216x256xf32, #tpu.memory_space<vmem>>, vector<8x256xf32>
    tpu.vector_store %arg25[%c16_63, %c0_64], %118 {strides = array<i32>} : memref<216x256xf32, #tpu.memory_space<vmem>>, vector<8x256xf32>,
    %c0_65 = arith.constant 0 : index
    %c124 = arith.constant 124 : index
    %120 = vector.load %arg26[%c0_65, %c124] : memref<24x512xf32, #tpu.memory_space<vmem>>, vector<8x256xf32>
    %121 = vector.broadcast %96 : vector<1x256xf32> to vector<8x256xf32>
    %122 = arith.mulf %120, %121 : vector<8x256xf32>
    %c24_66 = arith.constant 24 : index
    %c0_67 = arith.constant 0 : index
    %123 = vector.load %arg25[%c24_66, %c0_67] : memref<216x256xf32, #tpu.memory_space<vmem>>, vector<8x256xf32>
    tpu.vector_store %arg25[%c24_66, %c0_67], %122 {strides = array<i32>} : memref<216x256xf32, #tpu.memory_space<vmem>>, vector<8x256xf32>,
    %c0_68 = arith.constant 0 : index
    %c128_69 = arith.constant 128 : index
    %124 = vector.load %arg26[%c0_68, %c128_69] : memref<24x512xf32, #tpu.memory_space<vmem>>, vector<8x256xf32>
    %c32_70 = arith.constant 32 : index
    %c0_71 = arith.constant 0 : index
    %125 = vector.load %arg25[%c32_70, %c0_71] : memref<216x256xf32, #tpu.memory_space<vmem>>, vector<8x256xf32>
    tpu.vector_store %arg25[%c32_70, %c0_71], %124 {strides = array<i32>} : memref<216x256xf32, #tpu.memory_space<vmem>>, vector<8x256xf32>,
    %c0_72 = arith.constant 0 : index
    %c132 = arith.constant 132 : index
    %126 = vector.load %arg26[%c0_72, %c132] : memref<24x512xf32, #tpu.memory_space<vmem>>, vector<8x256xf32>
    %127 = vector.broadcast %116 : vector<1x256xf32> to vector<8x256xf32>
    %128 = arith.mulf %126, %127 : vector<8x256xf32>
    %c40_73 = arith.constant 40 : index
    %c0_74 = arith.constant 0 : index
    %129 = vector.load %arg25[%c40_73, %c0_74] : memref<216x256xf32, #tpu.memory_space<vmem>>, vector<8x256xf32>
    tpu.vector_store %arg25[%c40_73, %c0_74], %128 {strides = array<i32>} : memref<216x256xf32, #tpu.memory_space<vmem>>, vector<8x256xf32>,
    %c0_75 = arith.constant 0 : index
    %c188 = arith.constant 188 : index
    %130 = vector.load %arg26[%c0_75, %c188] : memref<24x512xf32, #tpu.memory_space<vmem>>, vector<8x256xf32>
    %131 = vector.broadcast %96 : vector<1x256xf32> to vector<8x256xf32>
    %132 = arith.mulf %130, %131 : vector<8x256xf32>
    %c48_76 = arith.constant 48 : index
    %c0_77 = arith.constant 0 : index
    %133 = vector.load %arg25[%c48_76, %c0_77] : memref<216x256xf32, #tpu.memory_space<vmem>>, vector<8x256xf32>
    tpu.vector_store %arg25[%c48_76, %c0_77], %132 {strides = array<i32>} : memref<216x256xf32, #tpu.memory_space<vmem>>, vector<8x256xf32>,
    %c0_78 = arith.constant 0 : index
    %c192 = arith.constant 192 : index
    %134 = vector.load %arg26[%c0_78, %c192] : memref<24x512xf32, #tpu.memory_space<vmem>>, vector<8x256xf32>
    %c56_79 = arith.constant 56 : index
    %c0_80 = arith.constant 0 : index
    %135 = vector.load %arg25[%c56_79, %c0_80] : memref<216x256xf32, #tpu.memory_space<vmem>>, vector<8x256xf32>
    tpu.vector_store %arg25[%c56_79, %c0_80], %134 {strides = array<i32>} : memref<216x256xf32, #tpu.memory_space<vmem>>, vector<8x256xf32>,
    %c0_81 = arith.constant 0 : index
    %c196 = arith.constant 196 : index
    %136 = vector.load %arg26[%c0_81, %c196] : memref<24x512xf32, #tpu.memory_space<vmem>>, vector<8x256xf32>
    %137 = vector.broadcast %116 : vector<1x256xf32> to vector<8x256xf32>
    %138 = arith.mulf %136, %137 : vector<8x256xf32>
    %c64_82 = arith.constant 64 : index
    %c0_83 = arith.constant 0 : index
    %139 = vector.load %arg25[%c64_82, %c0_83] : memref<216x256xf32, #tpu.memory_space<vmem>>, vector<8x256xf32>
    tpu.vector_store %arg25[%c64_82, %c0_83], %138 {strides = array<i32>} : memref<216x256xf32, #tpu.memory_space<vmem>>, vector<8x256xf32>,
    %c0_84 = arith.constant 0 : index
    %c0_85 = arith.constant 0 : index
    %140 = vector.load %arg25[%c0_84, %c0_85] : memref<216x256xf32, #tpu.memory_space<vmem>>, vector<72x256xf32>
    %c0_86 = arith.constant 0 : index
    %c0_87 = arith.constant 0 : index
    %141 = vector.load %arg18[%c0_86, %c0_87] : memref<4x72xbf16, #tpu.memory_space<vmem>>, vector<4x72xbf16>
    %142 = arith.truncf %140 : vector<72x256xf32> to vector<72x256xbf16>
    %cst_88 = arith.constant dense<0.000000e+00> : vector<4x256xf32>
    %143 = tpu.matmul %141, %142, %cst_88 {dimension_numbers = #tpu.dot_dimension_numbers<[1], [0], [0], [1], [0, 0, 1, 1], [], []>} : vector<4x72xbf16>, vector<72x256xbf16>, vector<4x256xf32> -> vector<4x256xf32>
    %c0_89 = arith.constant 0 : index
    %c0_90 = arith.constant 0 : index
    %144 = vector.load %arg4[%c0_89, %c0_90] : memref<4x1xf32, #tpu.memory_space<vmem>>, vector<4x1xf32>
    %145 = vector.broadcast %144 : vector<4x1xf32> to vector<4x256xf32>
    %146 = arith.addf %143, %145 : vector<4x256xf32>
    %cst_91 = arith.constant 0.000000e+00 : f32
    %147 = vector.broadcast %cst_91 : f32 to vector<4x256xf32>
    %148 = arith.maximumf %146, %147 : vector<4x256xf32>
    %c0_92 = arith.constant 0 : index
    %c128_93 = arith.constant 128 : index
    %149 = vector.load %arg26[%c0_92, %c128_93] : memref<24x512xf32, #tpu.memory_space<vmem>>, vector<4x256xf32>
    tpu.vector_store %arg26[%c0_92, %c128_93], %148 {strides = array<i32>} : memref<24x512xf32, #tpu.memory_space<vmem>>, vector<4x256xf32>,
    %c0_94 = arith.constant 0 : index
    %c94 = arith.constant 94 : index
    %150 = vector.load %arg26[%c0_94, %c94] : memref<24x512xf32, #tpu.memory_space<vmem>>, vector<8x256xf32>
    %151 = tpu.iota {dimensions = array<i32: 1>} : vector<1x256xi32>
    %c15_i32_95 = arith.constant 15 : i32
    %152 = vector.broadcast %c15_i32_95 : i32 to vector<1x256xi32>
    %153 = arith.andi %151, %152 : vector<1x256xi32>
    %c-2_i32 = arith.constant -2 : i32
    %154 = vector.broadcast %c-2_i32 : i32 to vector<1x256xi32>
    %155 = arith.addi %153, %154 : vector<1x256xi32>
    %c0_i32_96 = arith.constant 0 : i32
    %156 = vector.broadcast %c0_i32_96 : i32 to vector<1x256xi32>
    %157 = arith.cmpi sge, %155, %156 : vector<1x256xi32>
    %c-2_i32_97 = arith.constant -2 : i32
    %158 = vector.broadcast %c-2_i32_97 : i32 to vector<1x256xi32>
    %159 = arith.addi %153, %158 : vector<1x256xi32>
    %c16_i32_98 = arith.constant 16 : i32
    %160 = vector.broadcast %c16_i32_98 : i32 to vector<1x256xi32>
    %161 = arith.cmpi slt, %159, %160 : vector<1x256xi32>
    %162 = arith.andi %157, %161 : vector<1x256xi1>
    %163 = arith.extui %162 : vector<1x256xi1> to vector<1x256xi32>
    %164 = arith.sitofp %163 : vector<1x256xi32> to vector<1x256xf32>
    %165 = vector.broadcast %164 : vector<1x256xf32> to vector<8x256xf32>
    %166 = arith.mulf %150, %165 : vector<8x256xf32>
    %c0_99 = arith.constant 0 : index
    %c0_100 = arith.constant 0 : index
    %167 = vector.load %arg25[%c0_99, %c0_100] : memref<216x256xf32, #tpu.memory_space<vmem>>, vector<8x256xf32>
    tpu.vector_store %arg25[%c0_99, %c0_100], %166 {strides = array<i32>} : memref<216x256xf32, #tpu.memory_space<vmem>>, vector<8x256xf32>,
    %c0_101 = arith.constant 0 : index
    %c96 = arith.constant 96 : index
    %168 = vector.load %arg26[%c0_101, %c96] : memref<24x512xf32, #tpu.memory_space<vmem>>, vector<8x256xf32>
    %c8_102 = arith.constant 8 : index
    %c0_103 = arith.constant 0 : index
    %169 = vector.load %arg25[%c8_102, %c0_103] : memref<216x256xf32, #tpu.memory_space<vmem>>, vector<8x256xf32>
    tpu.vector_store %arg25[%c8_102, %c0_103], %168 {strides = array<i32>} : memref<216x256xf32, #tpu.memory_space<vmem>>, vector<8x256xf32>,
    %c0_104 = arith.constant 0 : index
    %c98 = arith.constant 98 : index
    %170 = vector.load %arg26[%c0_104, %c98] : memref<24x512xf32, #tpu.memory_space<vmem>>, vector<8x256xf32>
    %171 = tpu.iota {dimensions = array<i32: 1>} : vector<1x256xi32>
    %c15_i32_105 = arith.constant 15 : i32
    %172 = vector.broadcast %c15_i32_105 : i32 to vector<1x256xi32>
    %173 = arith.andi %171, %172 : vector<1x256xi32>
    %c2_i32 = arith.constant 2 : i32
    %174 = vector.broadcast %c2_i32 : i32 to vector<1x256xi32>
    %175 = arith.addi %173, %174 : vector<1x256xi32>
    %c0_i32_106 = arith.constant 0 : i32
    %176 = vector.broadcast %c0_i32_106 : i32 to vector<1x256xi32>
    %177 = arith.cmpi sge, %175, %176 : vector<1x256xi32>
    %c2_i32_107 = arith.constant 2 : i32
    %178 = vector.broadcast %c2_i32_107 : i32 to vector<1x256xi32>
    %179 = arith.addi %173, %178 : vector<1x256xi32>
    %c16_i32_108 = arith.constant 16 : i32
    %180 = vector.broadcast %c16_i32_108 : i32 to vector<1x256xi32>
    %181 = arith.cmpi slt, %179, %180 : vector<1x256xi32>
    %182 = arith.andi %177, %181 : vector<1x256xi1>
    %183 = arith.extui %182 : vector<1x256xi1> to vector<1x256xi32>
    %184 = arith.sitofp %183 : vector<1x256xi32> to vector<1x256xf32>
    %185 = vector.broadcast %184 : vector<1x256xf32> to vector<8x256xf32>
    %186 = arith.mulf %170, %185 : vector<8x256xf32>
    %c16_109 = arith.constant 16 : index
    %c0_110 = arith.constant 0 : index
    %187 = vector.load %arg25[%c16_109, %c0_110] : memref<216x256xf32, #tpu.memory_space<vmem>>, vector<8x256xf32>
    tpu.vector_store %arg25[%c16_109, %c0_110], %186 {strides = array<i32>} : memref<216x256xf32, #tpu.memory_space<vmem>>, vector<8x256xf32>,
    %c0_111 = arith.constant 0 : index
    %c126 = arith.constant 126 : index
    %188 = vector.load %arg26[%c0_111, %c126] : memref<24x512xf32, #tpu.memory_space<vmem>>, vector<8x256xf32>
    %189 = vector.broadcast %164 : vector<1x256xf32> to vector<8x256xf32>
    %190 = arith.mulf %188, %189 : vector<8x256xf32>
    %c24_112 = arith.constant 24 : index
    %c0_113 = arith.constant 0 : index
    %191 = vector.load %arg25[%c24_112, %c0_113] : memref<216x256xf32, #tpu.memory_space<vmem>>, vector<8x256xf32>
    tpu.vector_store %arg25[%c24_112, %c0_113], %190 {strides = array<i32>} : memref<216x256xf32, #tpu.memory_space<vmem>>, vector<8x256xf32>,
    %c0_114 = arith.constant 0 : index
    %c128_115 = arith.constant 128 : index
    %192 = vector.load %arg26[%c0_114, %c128_115] : memref<24x512xf32, #tpu.memory_space<vmem>>, vector<8x256xf32>
    %c32_116 = arith.constant 32 : index
    %c0_117 = arith.constant 0 : index
    %193 = vector.load %arg25[%c32_116, %c0_117] : memref<216x256xf32, #tpu.memory_space<vmem>>, vector<8x256xf32>
    tpu.vector_store %arg25[%c32_116, %c0_117], %192 {strides = array<i32>} : memref<216x256xf32, #tpu.memory_space<vmem>>, vector<8x256xf32>,
    %c0_118 = arith.constant 0 : index
    %c130 = arith.constant 130 : index
    %194 = vector.load %arg26[%c0_118, %c130] : memref<24x512xf32, #tpu.memory_space<vmem>>, vector<8x256xf32>
    %195 = vector.broadcast %184 : vector<1x256xf32> to vector<8x256xf32>
    %196 = arith.mulf %194, %195 : vector<8x256xf32>
    %c40_119 = arith.constant 40 : index
    %c0_120 = arith.constant 0 : index
    %197 = vector.load %arg25[%c40_119, %c0_120] : memref<216x256xf32, #tpu.memory_space<vmem>>, vector<8x256xf32>
    tpu.vector_store %arg25[%c40_119, %c0_120], %196 {strides = array<i32>} : memref<216x256xf32, #tpu.memory_space<vmem>>, vector<8x256xf32>,
    %c0_121 = arith.constant 0 : index
    %c158 = arith.constant 158 : index
    %198 = vector.load %arg26[%c0_121, %c158] : memref<24x512xf32, #tpu.memory_space<vmem>>, vector<8x256xf32>
    %199 = vector.broadcast %164 : vector<1x256xf32> to vector<8x256xf32>
    %200 = arith.mulf %198, %199 : vector<8x256xf32>
    %c48_122 = arith.constant 48 : index
    %c0_123 = arith.constant 0 : index
    %201 = vector.load %arg25[%c48_122, %c0_123] : memref<216x256xf32, #tpu.memory_space<vmem>>, vector<8x256xf32>
    tpu.vector_store %arg25[%c48_122, %c0_123], %200 {strides = array<i32>} : memref<216x256xf32, #tpu.memory_space<vmem>>, vector<8x256xf32>,
    %c0_124 = arith.constant 0 : index
    %c160 = arith.constant 160 : index
    %202 = vector.load %arg26[%c0_124, %c160] : memref<24x512xf32, #tpu.memory_space<vmem>>, vector<8x256xf32>
    %c56_125 = arith.constant 56 : index
    %c0_126 = arith.constant 0 : index
    %203 = vector.load %arg25[%c56_125, %c0_126] : memref<216x256xf32, #tpu.memory_space<vmem>>, vector<8x256xf32>
    tpu.vector_store %arg25[%c56_125, %c0_126], %202 {strides = array<i32>} : memref<216x256xf32, #tpu.memory_space<vmem>>, vector<8x256xf32>,
    %c0_127 = arith.constant 0 : index
    %c162 = arith.constant 162 : index
    %204 = vector.load %arg26[%c0_127, %c162] : memref<24x512xf32, #tpu.memory_space<vmem>>, vector<8x256xf32>
    %205 = vector.broadcast %184 : vector<1x256xf32> to vector<8x256xf32>
    %206 = arith.mulf %204, %205 : vector<8x256xf32>
    %c64_128 = arith.constant 64 : index
    %c0_129 = arith.constant 0 : index
    %207 = vector.load %arg25[%c64_128, %c0_129] : memref<216x256xf32, #tpu.memory_space<vmem>>, vector<8x256xf32>
    tpu.vector_store %arg25[%c64_128, %c0_129], %206 {strides = array<i32>} : memref<216x256xf32, #tpu.memory_space<vmem>>, vector<8x256xf32>,
    %c0_130 = arith.constant 0 : index
    %c0_131 = arith.constant 0 : index
    %208 = vector.load %arg25[%c0_130, %c0_131] : memref<216x256xf32, #tpu.memory_space<vmem>>, vector<72x256xf32>
    %c0_132 = arith.constant 0 : index
    %c0_133 = arith.constant 0 : index
    %209 = vector.load %arg19[%c0_132, %c0_133] : memref<4x72xbf16, #tpu.memory_space<vmem>>, vector<4x72xbf16>
    %210 = arith.truncf %208 : vector<72x256xf32> to vector<72x256xbf16>
    %cst_134 = arith.constant dense<0.000000e+00> : vector<4x256xf32>
    %211 = tpu.matmul %209, %210, %cst_134 {dimension_numbers = #tpu.dot_dimension_numbers<[1], [0], [0], [1], [0, 0, 1, 1], [], []>} : vector<4x72xbf16>, vector<72x256xbf16>, vector<4x256xf32> -> vector<4x256xf32>
    %c0_135 = arith.constant 0 : index
    %c0_136 = arith.constant 0 : index
    %212 = vector.load %arg5[%c0_135, %c0_136] : memref<4x1xf32, #tpu.memory_space<vmem>>, vector<4x1xf32>
    %213 = vector.broadcast %212 : vector<4x1xf32> to vector<4x256xf32>
    %214 = arith.addf %211, %213 : vector<4x256xf32>
    %cst_137 = arith.constant 0.000000e+00 : f32
    %215 = vector.broadcast %cst_137 : f32 to vector<4x256xf32>
    %216 = arith.maximumf %214, %215 : vector<4x256xf32>
    %217 = arith.addf %12, %80 : vector<4x256xf32>
    %218 = arith.addf %217, %148 : vector<4x256xf32>
    %219 = arith.addf %218, %216 : vector<4x256xf32>
    %c0_138 = arith.constant 0 : index
    %c0_139 = arith.constant 0 : index
    %220 = vector.load %arg10[%c0_138, %c0_139] : memref<256x64xbf16, #tpu.memory_space<vmem>>, vector<256x64xbf16>
    %221 = arith.truncf %11 : vector<16x256xf32> to vector<16x256xbf16>
    %cst_140 = arith.constant dense<0.000000e+00> : vector<16x64xf32>
    %222 = tpu.matmul %221, %220, %cst_140 {dimension_numbers = #tpu.dot_dimension_numbers<[1], [0], [0], [1], [0, 0, 1, 1], [], []>} : vector<16x256xbf16>, vector<256x64xbf16>, vector<16x64xf32> -> vector<16x64xf32>
    %c0_141 = arith.constant 0 : index
    %c128_142 = arith.constant 128 : index
    %223 = vector.load %arg26[%c0_141, %c128_142] : memref<24x512xf32, #tpu.memory_space<vmem>>, vector<16x64xf32>
    tpu.vector_store %arg26[%c0_141, %c128_142], %222 {strides = array<i32>} : memref<24x512xf32, #tpu.memory_space<vmem>>, vector<16x64xf32>,
    %cst_143 = arith.constant 0.000000e+00 : f32
    %224 = vector.broadcast %cst_143 : f32 to vector<16x128xf32>
    %c0_144 = arith.constant 0 : index
    %c192_145 = arith.constant 192 : index
    %225 = vector.load %arg26[%c0_144, %c192_145] : memref<24x512xf32, #tpu.memory_space<vmem>>, vector<16x128xf32>
    tpu.vector_store %arg26[%c0_144, %c192_145], %224 {strides = array<i32>} : memref<24x512xf32, #tpu.memory_space<vmem>>, vector<16x128xf32>,
    %c0_146 = arith.constant 0 : index
    %c119 = arith.constant 119 : index
    %226 = vector.load %arg26[%c0_146, %c119] : memref<24x512xf32, #tpu.memory_space<vmem>>, vector<8x64xf32>
    %227 = tpu.iota {dimensions = array<i32: 1>} : vector<1x64xi32>
    %c7_i32 = arith.constant 7 : i32
    %228 = vector.broadcast %c7_i32 : i32 to vector<1x64xi32>
    %229 = arith.andi %227, %228 : vector<1x64xi32>
    %c-1_i32 = arith.constant -1 : i32
    %230 = vector.broadcast %c-1_i32 : i32 to vector<1x64xi32>
    %231 = arith.addi %229, %230 : vector<1x64xi32>
    %c0_i32_147 = arith.constant 0 : i32
    %232 = vector.broadcast %c0_i32_147 : i32 to vector<1x64xi32>
    %233 = arith.cmpi sge, %231, %232 : vector<1x64xi32>
    %c-1_i32_148 = arith.constant -1 : i32
    %234 = vector.broadcast %c-1_i32_148 : i32 to vector<1x64xi32>
    %235 = arith.addi %229, %234 : vector<1x64xi32>
    %c8_i32 = arith.constant 8 : i32
    %236 = vector.broadcast %c8_i32 : i32 to vector<1x64xi32>
    %237 = arith.cmpi slt, %235, %236 : vector<1x64xi32>
    %238 = arith.andi %233, %237 : vector<1x64xi1>
    %239 = arith.extui %238 : vector<1x64xi1> to vector<1x64xi32>
    %240 = arith.sitofp %239 : vector<1x64xi32> to vector<1x64xf32>
    %241 = vector.broadcast %240 : vector<1x64xf32> to vector<8x64xf32>
    %242 = arith.mulf %226, %241 : vector<8x64xf32>
    %c0_149 = arith.constant 0 : index
    %c0_150 = arith.constant 0 : index
    %243 = vector.load %arg25[%c0_149, %c0_150] : memref<216x256xf32, #tpu.memory_space<vmem>>, vector<8x64xf32>
    tpu.vector_store %arg25[%c0_149, %c0_150], %242 {strides = array<i32>} : memref<216x256xf32, #tpu.memory_space<vmem>>, vector<8x64xf32>,
    %c8_151 = arith.constant 8 : index
    %c110 = arith.constant 110 : index
    %244 = vector.load %arg26[%c8_151, %c110] : memref<24x512xf32, #tpu.memory_space<vmem>>, vector<8x64xf32>
    %245 = tpu.iota {dimensions = array<i32: 1>} : vector<1x64xi32>
    %c7_i32_152 = arith.constant 7 : i32
    %246 = vector.broadcast %c7_i32_152 : i32 to vector<1x64xi32>
    %247 = arith.andi %245, %246 : vector<1x64xi32>
    %c-2_i32_153 = arith.constant -2 : i32
    %248 = vector.broadcast %c-2_i32_153 : i32 to vector<1x64xi32>
    %249 = arith.addi %247, %248 : vector<1x64xi32>
    %c0_i32_154 = arith.constant 0 : i32
    %250 = vector.broadcast %c0_i32_154 : i32 to vector<1x64xi32>
    %251 = arith.cmpi sge, %249, %250 : vector<1x64xi32>
    %c-2_i32_155 = arith.constant -2 : i32
    %252 = vector.broadcast %c-2_i32_155 : i32 to vector<1x64xi32>
    %253 = arith.addi %247, %252 : vector<1x64xi32>
    %c8_i32_156 = arith.constant 8 : i32
    %254 = vector.broadcast %c8_i32_156 : i32 to vector<1x64xi32>
    %255 = arith.cmpi slt, %253, %254 : vector<1x64xi32>
    %256 = arith.andi %251, %255 : vector<1x64xi1>
    %257 = arith.extui %256 : vector<1x64xi1> to vector<1x64xi32>
    %258 = arith.sitofp %257 : vector<1x64xi32> to vector<1x64xf32>
    %259 = vector.broadcast %258 : vector<1x64xf32> to vector<8x64xf32>
    %260 = arith.mulf %244, %259 : vector<8x64xf32>
    %c72 = arith.constant 72 : index
    %c0_157 = arith.constant 0 : index
    %261 = vector.load %arg25[%c72, %c0_157] : memref<216x256xf32, #tpu.memory_space<vmem>>, vector<8x64xf32>
    tpu.vector_store %arg25[%c72, %c0_157], %260 {strides = array<i32>} : memref<216x256xf32, #tpu.memory_space<vmem>>, vector<8x64xf32>,
    %c0_158 = arith.constant 0 : index
    %c120 = arith.constant 120 : index
    %262 = vector.load %arg26[%c0_158, %c120] : memref<24x512xf32, #tpu.memory_space<vmem>>, vector<8x64xf32>
    %c8_159 = arith.constant 8 : index
    %c0_160 = arith.constant 0 : index
    %263 = vector.load %arg25[%c8_159, %c0_160] : memref<216x256xf32, #tpu.memory_space<vmem>>, vector<8x64xf32>
    tpu.vector_store %arg25[%c8_159, %c0_160], %262 {strides = array<i32>} : memref<216x256xf32, #tpu.memory_space<vmem>>, vector<8x64xf32>,
    %c8_161 = arith.constant 8 : index
    %c112 = arith.constant 112 : index
    %264 = vector.load %arg26[%c8_161, %c112] : memref<24x512xf32, #tpu.memory_space<vmem>>, vector<8x64xf32>
    %c80 = arith.constant 80 : index
    %c0_162 = arith.constant 0 : index
    %265 = vector.load %arg25[%c80, %c0_162] : memref<216x256xf32, #tpu.memory_space<vmem>>, vector<8x64xf32>
    tpu.vector_store %arg25[%c80, %c0_162], %264 {strides = array<i32>} : memref<216x256xf32, #tpu.memory_space<vmem>>, vector<8x64xf32>,
    %c0_163 = arith.constant 0 : index
    %c121 = arith.constant 121 : index
    %266 = vector.load %arg26[%c0_163, %c121] : memref<24x512xf32, #tpu.memory_space<vmem>>, vector<8x64xf32>
    %267 = tpu.iota {dimensions = array<i32: 1>} : vector<1x64xi32>
    %c7_i32_164 = arith.constant 7 : i32
    %268 = vector.broadcast %c7_i32_164 : i32 to vector<1x64xi32>
    %269 = arith.andi %267, %268 : vector<1x64xi32>
    %c1_i32 = arith.constant 1 : i32
    %270 = vector.broadcast %c1_i32 : i32 to vector<1x64xi32>
    %271 = arith.addi %269, %270 : vector<1x64xi32>
    %c0_i32_165 = arith.constant 0 : i32
    %272 = vector.broadcast %c0_i32_165 : i32 to vector<1x64xi32>
    %273 = arith.cmpi sge, %271, %272 : vector<1x64xi32>
    %c1_i32_166 = arith.constant 1 : i32
    %274 = vector.broadcast %c1_i32_166 : i32 to vector<1x64xi32>
    %275 = arith.addi %269, %274 : vector<1x64xi32>
    %c8_i32_167 = arith.constant 8 : i32
    %276 = vector.broadcast %c8_i32_167 : i32 to vector<1x64xi32>
    %277 = arith.cmpi slt, %275, %276 : vector<1x64xi32>
    %278 = arith.andi %273, %277 : vector<1x64xi1>
    %279 = arith.extui %278 : vector<1x64xi1> to vector<1x64xi32>
    %280 = arith.sitofp %279 : vector<1x64xi32> to vector<1x64xf32>
    %281 = vector.broadcast %280 : vector<1x64xf32> to vector<8x64xf32>
    %282 = arith.mulf %266, %281 : vector<8x64xf32>
    %c16_168 = arith.constant 16 : index
    %c0_169 = arith.constant 0 : index
    %283 = vector.load %arg25[%c16_168, %c0_169] : memref<216x256xf32, #tpu.memory_space<vmem>>, vector<8x64xf32>
    tpu.vector_store %arg25[%c16_168, %c0_169], %282 {strides = array<i32>} : memref<216x256xf32, #tpu.memory_space<vmem>>, vector<8x64xf32>,
    %c8_170 = arith.constant 8 : index
    %c114 = arith.constant 114 : index
    %284 = vector.load %arg26[%c8_170, %c114] : memref<24x512xf32, #tpu.memory_space<vmem>>, vector<8x64xf32>
    %285 = tpu.iota {dimensions = array<i32: 1>} : vector<1x64xi32>
    %c7_i32_171 = arith.constant 7 : i32
    %286 = vector.broadcast %c7_i32_171 : i32 to vector<1x64xi32>
    %287 = arith.andi %285, %286 : vector<1x64xi32>
    %c2_i32_172 = arith.constant 2 : i32
    %288 = vector.broadcast %c2_i32_172 : i32 to vector<1x64xi32>
    %289 = arith.addi %287, %288 : vector<1x64xi32>
    %c0_i32_173 = arith.constant 0 : i32
    %290 = vector.broadcast %c0_i32_173 : i32 to vector<1x64xi32>
    %291 = arith.cmpi sge, %289, %290 : vector<1x64xi32>
    %c2_i32_174 = arith.constant 2 : i32
    %292 = vector.broadcast %c2_i32_174 : i32 to vector<1x64xi32>
    %293 = arith.addi %287, %292 : vector<1x64xi32>
    %c8_i32_175 = arith.constant 8 : i32
    %294 = vector.broadcast %c8_i32_175 : i32 to vector<1x64xi32>
    %295 = arith.cmpi slt, %293, %294 : vector<1x64xi32>
    %296 = arith.andi %291, %295 : vector<1x64xi1>
    %297 = arith.extui %296 : vector<1x64xi1> to vector<1x64xi32>
    %298 = arith.sitofp %297 : vector<1x64xi32> to vector<1x64xf32>
    %299 = vector.broadcast %298 : vector<1x64xf32> to vector<8x64xf32>
    %300 = arith.mulf %284, %299 : vector<8x64xf32>
    %c88 = arith.constant 88 : index
    %c0_176 = arith.constant 0 : index
    %301 = vector.load %arg25[%c88, %c0_176] : memref<216x256xf32, #tpu.memory_space<vmem>>, vector<8x64xf32>
    tpu.vector_store %arg25[%c88, %c0_176], %300 {strides = array<i32>} : memref<216x256xf32, #tpu.memory_space<vmem>>, vector<8x64xf32>,
    %c0_177 = arith.constant 0 : index
    %c127 = arith.constant 127 : index
    %302 = vector.load %arg26[%c0_177, %c127] : memref<24x512xf32, #tpu.memory_space<vmem>>, vector<8x64xf32>
    %303 = vector.broadcast %240 : vector<1x64xf32> to vector<8x64xf32>
    %304 = arith.mulf %302, %303 : vector<8x64xf32>
    %c24_178 = arith.constant 24 : index
    %c0_179 = arith.constant 0 : index
    %305 = vector.load %arg25[%c24_178, %c0_179] : memref<216x256xf32, #tpu.memory_space<vmem>>, vector<8x64xf32>
    tpu.vector_store %arg25[%c24_178, %c0_179], %304 {strides = array<i32>} : memref<216x256xf32, #tpu.memory_space<vmem>>, vector<8x64xf32>,
    %c8_180 = arith.constant 8 : index
    %c126_181 = arith.constant 126 : index
    %306 = vector.load %arg26[%c8_180, %c126_181] : memref<24x512xf32, #tpu.memory_space<vmem>>, vector<8x64xf32>
    %307 = vector.broadcast %258 : vector<1x64xf32> to vector<8x64xf32>
    %308 = arith.mulf %306, %307 : vector<8x64xf32>
    %c96_182 = arith.constant 96 : index
    %c0_183 = arith.constant 0 : index
    %309 = vector.load %arg25[%c96_182, %c0_183] : memref<216x256xf32, #tpu.memory_space<vmem>>, vector<8x64xf32>
    tpu.vector_store %arg25[%c96_182, %c0_183], %308 {strides = array<i32>} : memref<216x256xf32, #tpu.memory_space<vmem>>, vector<8x64xf32>,
    %c0_184 = arith.constant 0 : index
    %c128_185 = arith.constant 128 : index
    %310 = vector.load %arg26[%c0_184, %c128_185] : memref<24x512xf32, #tpu.memory_space<vmem>>, vector<8x64xf32>
    %c32_186 = arith.constant 32 : index
    %c0_187 = arith.constant 0 : index
    %311 = vector.load %arg25[%c32_186, %c0_187] : memref<216x256xf32, #tpu.memory_space<vmem>>, vector<8x64xf32>
    tpu.vector_store %arg25[%c32_186, %c0_187], %310 {strides = array<i32>} : memref<216x256xf32, #tpu.memory_space<vmem>>, vector<8x64xf32>,
    %c8_188 = arith.constant 8 : index
    %c128_189 = arith.constant 128 : index
    %312 = vector.load %arg26[%c8_188, %c128_189] : memref<24x512xf32, #tpu.memory_space<vmem>>, vector<8x64xf32>
    %c104 = arith.constant 104 : index
    %c0_190 = arith.constant 0 : index
    %313 = vector.load %arg25[%c104, %c0_190] : memref<216x256xf32, #tpu.memory_space<vmem>>, vector<8x64xf32>
    tpu.vector_store %arg25[%c104, %c0_190], %312 {strides = array<i32>} : memref<216x256xf32, #tpu.memory_space<vmem>>, vector<8x64xf32>,
    %c0_191 = arith.constant 0 : index
    %c129 = arith.constant 129 : index
    %314 = vector.load %arg26[%c0_191, %c129] : memref<24x512xf32, #tpu.memory_space<vmem>>, vector<8x64xf32>
    %315 = vector.broadcast %280 : vector<1x64xf32> to vector<8x64xf32>
    %316 = arith.mulf %314, %315 : vector<8x64xf32>
    %c40_192 = arith.constant 40 : index
    %c0_193 = arith.constant 0 : index
    %317 = vector.load %arg25[%c40_192, %c0_193] : memref<216x256xf32, #tpu.memory_space<vmem>>, vector<8x64xf32>
    tpu.vector_store %arg25[%c40_192, %c0_193], %316 {strides = array<i32>} : memref<216x256xf32, #tpu.memory_space<vmem>>, vector<8x64xf32>,
    %c8_194 = arith.constant 8 : index
    %c130_195 = arith.constant 130 : index
    %318 = vector.load %arg26[%c8_194, %c130_195] : memref<24x512xf32, #tpu.memory_space<vmem>>, vector<8x64xf32>
    %319 = vector.broadcast %298 : vector<1x64xf32> to vector<8x64xf32>
    %320 = arith.mulf %318, %319 : vector<8x64xf32>
    %c112_196 = arith.constant 112 : index
    %c0_197 = arith.constant 0 : index
    %321 = vector.load %arg25[%c112_196, %c0_197] : memref<216x256xf32, #tpu.memory_space<vmem>>, vector<8x64xf32>
    tpu.vector_store %arg25[%c112_196, %c0_197], %320 {strides = array<i32>} : memref<216x256xf32, #tpu.memory_space<vmem>>, vector<8x64xf32>,
    %c0_198 = arith.constant 0 : index
    %c135 = arith.constant 135 : index
    %322 = vector.load %arg26[%c0_198, %c135] : memref<24x512xf32, #tpu.memory_space<vmem>>, vector<8x64xf32>
    %323 = vector.broadcast %240 : vector<1x64xf32> to vector<8x64xf32>
    %324 = arith.mulf %322, %323 : vector<8x64xf32>
    %c48_199 = arith.constant 48 : index
    %c0_200 = arith.constant 0 : index
    %325 = vector.load %arg25[%c48_199, %c0_200] : memref<216x256xf32, #tpu.memory_space<vmem>>, vector<8x64xf32>
    tpu.vector_store %arg25[%c48_199, %c0_200], %324 {strides = array<i32>} : memref<216x256xf32, #tpu.memory_space<vmem>>, vector<8x64xf32>,
    %c8_201 = arith.constant 8 : index
    %c142 = arith.constant 142 : index
    %326 = vector.load %arg26[%c8_201, %c142] : memref<24x512xf32, #tpu.memory_space<vmem>>, vector<8x64xf32>
    %327 = vector.broadcast %258 : vector<1x64xf32> to vector<8x64xf32>
    %328 = arith.mulf %326, %327 : vector<8x64xf32>
    %c120_202 = arith.constant 120 : index
    %c0_203 = arith.constant 0 : index
    %329 = vector.load %arg25[%c120_202, %c0_203] : memref<216x256xf32, #tpu.memory_space<vmem>>, vector<8x64xf32>
    tpu.vector_store %arg25[%c120_202, %c0_203], %328 {strides = array<i32>} : memref<216x256xf32, #tpu.memory_space<vmem>>, vector<8x64xf32>,
    %c0_204 = arith.constant 0 : index
    %c136 = arith.constant 136 : index
    %330 = vector.load %arg26[%c0_204, %c136] : memref<24x512xf32, #tpu.memory_space<vmem>>, vector<8x64xf32>
    %c56_205 = arith.constant 56 : index
    %c0_206 = arith.constant 0 : index
    %331 = vector.load %arg25[%c56_205, %c0_206] : memref<216x256xf32, #tpu.memory_space<vmem>>, vector<8x64xf32>
    tpu.vector_store %arg25[%c56_205, %c0_206], %330 {strides = array<i32>} : memref<216x256xf32, #tpu.memory_space<vmem>>, vector<8x64xf32>,
    %c8_207 = arith.constant 8 : index
    %c144 = arith.constant 144 : index
    %332 = vector.load %arg26[%c8_207, %c144] : memref<24x512xf32, #tpu.memory_space<vmem>>, vector<8x64xf32>
    %c128_208 = arith.constant 128 : index
    %c0_209 = arith.constant 0 : index
    %333 = vector.load %arg25[%c128_208, %c0_209] : memref<216x256xf32, #tpu.memory_space<vmem>>, vector<8x64xf32>
    tpu.vector_store %arg25[%c128_208, %c0_209], %332 {strides = array<i32>} : memref<216x256xf32, #tpu.memory_space<vmem>>, vector<8x64xf32>,
    %c0_210 = arith.constant 0 : index
    %c137 = arith.constant 137 : index
    %334 = vector.load %arg26[%c0_210, %c137] : memref<24x512xf32, #tpu.memory_space<vmem>>, vector<8x64xf32>
    %335 = vector.broadcast %280 : vector<1x64xf32> to vector<8x64xf32>
    %336 = arith.mulf %334, %335 : vector<8x64xf32>
    %c64_211 = arith.constant 64 : index
    %c0_212 = arith.constant 0 : index
    %337 = vector.load %arg25[%c64_211, %c0_212] : memref<216x256xf32, #tpu.memory_space<vmem>>, vector<8x64xf32>
    tpu.vector_store %arg25[%c64_211, %c0_212], %336 {strides = array<i32>} : memref<216x256xf32, #tpu.memory_space<vmem>>, vector<8x64xf32>,
    %c8_213 = arith.constant 8 : index
    %c146 = arith.constant 146 : index
    %338 = vector.load %arg26[%c8_213, %c146] : memref<24x512xf32, #tpu.memory_space<vmem>>, vector<8x64xf32>
    %339 = vector.broadcast %298 : vector<1x64xf32> to vector<8x64xf32>
    %340 = arith.mulf %338, %339 : vector<8x64xf32>
    %c136_214 = arith.constant 136 : index
    %c0_215 = arith.constant 0 : index
    %341 = vector.load %arg25[%c136_214, %c0_215] : memref<216x256xf32, #tpu.memory_space<vmem>>, vector<8x64xf32>
    tpu.vector_store %arg25[%c136_214, %c0_215], %340 {strides = array<i32>} : memref<216x256xf32, #tpu.memory_space<vmem>>, vector<8x64xf32>,
    %c0_216 = arith.constant 0 : index
    %c0_217 = arith.constant 0 : index
    %342 = vector.load %arg25[%c0_216, %c0_217] : memref<216x256xf32, #tpu.memory_space<vmem>>, vector<144x64xf32>
    %c0_218 = arith.constant 0 : index
    %c0_219 = arith.constant 0 : index
    %343 = vector.load %arg20[%c0_218, %c0_219] : memref<16x144xbf16, #tpu.memory_space<vmem>>, vector<16x144xbf16>
    %344 = arith.truncf %342 : vector<144x64xf32> to vector<144x64xbf16>
    %cst_220 = arith.constant dense<0.000000e+00> : vector<16x64xf32>
    %345 = tpu.matmul %343, %344, %cst_220 {dimension_numbers = #tpu.dot_dimension_numbers<[1], [0], [0], [1], [0, 0, 1, 1], [], []>} : vector<16x144xbf16>, vector<144x64xbf16>, vector<16x64xf32> -> vector<16x64xf32>
    %c0_221 = arith.constant 0 : index
    %c0_222 = arith.constant 0 : index
    %346 = vector.load %arg6[%c0_221, %c0_222] : memref<16x1xf32, #tpu.memory_space<vmem>>, vector<16x1xf32>
    %347 = vector.broadcast %346 : vector<16x1xf32> to vector<16x64xf32>
    %348 = arith.addf %345, %347 : vector<16x64xf32>
    %cst_223 = arith.constant 0.000000e+00 : f32
    %349 = vector.broadcast %cst_223 : f32 to vector<16x64xf32>
    %350 = arith.maximumf %348, %349 : vector<16x64xf32>
    %c0_224 = arith.constant 0 : index
    %c0_225 = arith.constant 0 : index
    %351 = vector.load %arg11[%c0_224, %c0_225] : memref<64x16xbf16, #tpu.memory_space<vmem>>, vector<64x16xbf16>
    %352 = arith.truncf %350 : vector<16x64xf32> to vector<16x64xbf16>
    %cst_226 = arith.constant dense<0.000000e+00> : vector<16x16xf32>
    %353 = tpu.matmul %352, %351, %cst_226 {dimension_numbers = #tpu.dot_dimension_numbers<[1], [0], [0], [1], [0, 0, 1, 1], [], []>} : vector<16x64xbf16>, vector<64x16xbf16>, vector<16x16xf32> -> vector<16x16xf32>
    %c0_227 = arith.constant 0 : index
    %c128_228 = arith.constant 128 : index
    %354 = vector.load %arg26[%c0_227, %c128_228] : memref<24x512xf32, #tpu.memory_space<vmem>>, vector<16x16xf32>
    tpu.vector_store %arg26[%c0_227, %c128_228], %353 {strides = array<i32>} : memref<24x512xf32, #tpu.memory_space<vmem>>, vector<16x16xf32>,
    %cst_229 = arith.constant 0.000000e+00 : f32
    %355 = vector.broadcast %cst_229 : f32 to vector<16x128xf32>
    %c0_230 = arith.constant 0 : index
    %c144_231 = arith.constant 144 : index
    %356 = vector.load %arg26[%c0_230, %c144_231] : memref<24x512xf32, #tpu.memory_space<vmem>>, vector<16x128xf32>
    tpu.vector_store %arg26[%c0_230, %c144_231], %355 {strides = array<i32>} : memref<24x512xf32, #tpu.memory_space<vmem>>, vector<16x128xf32>,
    %c0_232 = arith.constant 0 : index
    %c123 = arith.constant 123 : index
    %357 = vector.load %arg26[%c0_232, %c123] : memref<24x512xf32, #tpu.memory_space<vmem>>, vector<8x16xf32>
    %358 = tpu.iota {dimensions = array<i32: 1>} : vector<1x16xi32>
    %c3_i32 = arith.constant 3 : i32
    %359 = vector.broadcast %c3_i32 : i32 to vector<1x16xi32>
    %360 = arith.andi %358, %359 : vector<1x16xi32>
    %c-1_i32_233 = arith.constant -1 : i32
    %361 = vector.broadcast %c-1_i32_233 : i32 to vector<1x16xi32>
    %362 = arith.addi %360, %361 : vector<1x16xi32>
    %c0_i32_234 = arith.constant 0 : i32
    %363 = vector.broadcast %c0_i32_234 : i32 to vector<1x16xi32>
    %364 = arith.cmpi sge, %362, %363 : vector<1x16xi32>
    %c-1_i32_235 = arith.constant -1 : i32
    %365 = vector.broadcast %c-1_i32_235 : i32 to vector<1x16xi32>
    %366 = arith.addi %360, %365 : vector<1x16xi32>
    %c4_i32_236 = arith.constant 4 : i32
    %367 = vector.broadcast %c4_i32_236 : i32 to vector<1x16xi32>
    %368 = arith.cmpi slt, %366, %367 : vector<1x16xi32>
    %369 = arith.andi %364, %368 : vector<1x16xi1>
    %370 = arith.extui %369 : vector<1x16xi1> to vector<1x16xi32>
    %371 = arith.sitofp %370 : vector<1x16xi32> to vector<1x16xf32>
    %372 = vector.broadcast %371 : vector<1x16xf32> to vector<8x16xf32>
    %373 = arith.mulf %357, %372 : vector<8x16xf32>
    %c0_237 = arith.constant 0 : index
    %c0_238 = arith.constant 0 : index
    %374 = vector.load %arg25[%c0_237, %c0_238] : memref<216x256xf32, #tpu.memory_space<vmem>>, vector<8x16xf32>
    tpu.vector_store %arg25[%c0_237, %c0_238], %373 {strides = array<i32>} : memref<216x256xf32, #tpu.memory_space<vmem>>, vector<8x16xf32>,
    %c8_239 = arith.constant 8 : index
    %c118 = arith.constant 118 : index
    %375 = vector.load %arg26[%c8_239, %c118] : memref<24x512xf32, #tpu.memory_space<vmem>>, vector<8x16xf32>
    %376 = tpu.iota {dimensions = array<i32: 1>} : vector<1x16xi32>
    %c3_i32_240 = arith.constant 3 : i32
    %377 = vector.broadcast %c3_i32_240 : i32 to vector<1x16xi32>
    %378 = arith.andi %376, %377 : vector<1x16xi32>
    %c-2_i32_241 = arith.constant -2 : i32
    %379 = vector.broadcast %c-2_i32_241 : i32 to vector<1x16xi32>
    %380 = arith.addi %378, %379 : vector<1x16xi32>
    %c0_i32_242 = arith.constant 0 : i32
    %381 = vector.broadcast %c0_i32_242 : i32 to vector<1x16xi32>
    %382 = arith.cmpi sge, %380, %381 : vector<1x16xi32>
    %c-2_i32_243 = arith.constant -2 : i32
    %383 = vector.broadcast %c-2_i32_243 : i32 to vector<1x16xi32>
    %384 = arith.addi %378, %383 : vector<1x16xi32>
    %c4_i32_244 = arith.constant 4 : i32
    %385 = vector.broadcast %c4_i32_244 : i32 to vector<1x16xi32>
    %386 = arith.cmpi slt, %384, %385 : vector<1x16xi32>
    %387 = arith.andi %382, %386 : vector<1x16xi1>
    %388 = arith.extui %387 : vector<1x16xi1> to vector<1x16xi32>
    %389 = arith.sitofp %388 : vector<1x16xi32> to vector<1x16xf32>
    %390 = vector.broadcast %389 : vector<1x16xf32> to vector<8x16xf32>
    %391 = arith.mulf %375, %390 : vector<8x16xf32>
    %c72_245 = arith.constant 72 : index
    %c0_246 = arith.constant 0 : index
    %392 = vector.load %arg25[%c72_245, %c0_246] : memref<216x256xf32, #tpu.memory_space<vmem>>, vector<8x16xf32>
    tpu.vector_store %arg25[%c72_245, %c0_246], %391 {strides = array<i32>} : memref<216x256xf32, #tpu.memory_space<vmem>>, vector<8x16xf32>,
    %c0_247 = arith.constant 0 : index
    %c124_248 = arith.constant 124 : index
    %393 = vector.load %arg26[%c0_247, %c124_248] : memref<24x512xf32, #tpu.memory_space<vmem>>, vector<8x16xf32>
    %c8_249 = arith.constant 8 : index
    %c0_250 = arith.constant 0 : index
    %394 = vector.load %arg25[%c8_249, %c0_250] : memref<216x256xf32, #tpu.memory_space<vmem>>, vector<8x16xf32>
    tpu.vector_store %arg25[%c8_249, %c0_250], %393 {strides = array<i32>} : memref<216x256xf32, #tpu.memory_space<vmem>>, vector<8x16xf32>,
    %c8_251 = arith.constant 8 : index
    %c120_252 = arith.constant 120 : index
    %395 = vector.load %arg26[%c8_251, %c120_252] : memref<24x512xf32, #tpu.memory_space<vmem>>, vector<8x16xf32>
    %c80_253 = arith.constant 80 : index
    %c0_254 = arith.constant 0 : index
    %396 = vector.load %arg25[%c80_253, %c0_254] : memref<216x256xf32, #tpu.memory_space<vmem>>, vector<8x16xf32>
    tpu.vector_store %arg25[%c80_253, %c0_254], %395 {strides = array<i32>} : memref<216x256xf32, #tpu.memory_space<vmem>>, vector<8x16xf32>,
    %c0_255 = arith.constant 0 : index
    %c125 = arith.constant 125 : index
    %397 = vector.load %arg26[%c0_255, %c125] : memref<24x512xf32, #tpu.memory_space<vmem>>, vector<8x16xf32>
    %398 = tpu.iota {dimensions = array<i32: 1>} : vector<1x16xi32>
    %c3_i32_256 = arith.constant 3 : i32
    %399 = vector.broadcast %c3_i32_256 : i32 to vector<1x16xi32>
    %400 = arith.andi %398, %399 : vector<1x16xi32>
    %c1_i32_257 = arith.constant 1 : i32
    %401 = vector.broadcast %c1_i32_257 : i32 to vector<1x16xi32>
    %402 = arith.addi %400, %401 : vector<1x16xi32>
    %c0_i32_258 = arith.constant 0 : i32
    %403 = vector.broadcast %c0_i32_258 : i32 to vector<1x16xi32>
    %404 = arith.cmpi sge, %402, %403 : vector<1x16xi32>
    %c1_i32_259 = arith.constant 1 : i32
    %405 = vector.broadcast %c1_i32_259 : i32 to vector<1x16xi32>
    %406 = arith.addi %400, %405 : vector<1x16xi32>
    %c4_i32_260 = arith.constant 4 : i32
    %407 = vector.broadcast %c4_i32_260 : i32 to vector<1x16xi32>
    %408 = arith.cmpi slt, %406, %407 : vector<1x16xi32>
    %409 = arith.andi %404, %408 : vector<1x16xi1>
    %410 = arith.extui %409 : vector<1x16xi1> to vector<1x16xi32>
    %411 = arith.sitofp %410 : vector<1x16xi32> to vector<1x16xf32>
    %412 = vector.broadcast %411 : vector<1x16xf32> to vector<8x16xf32>
    %413 = arith.mulf %397, %412 : vector<8x16xf32>
    %c16_261 = arith.constant 16 : index
    %c0_262 = arith.constant 0 : index
    %414 = vector.load %arg25[%c16_261, %c0_262] : memref<216x256xf32, #tpu.memory_space<vmem>>, vector<8x16xf32>
    tpu.vector_store %arg25[%c16_261, %c0_262], %413 {strides = array<i32>} : memref<216x256xf32, #tpu.memory_space<vmem>>, vector<8x16xf32>,
    %c8_263 = arith.constant 8 : index
    %c122_264 = arith.constant 122 : index
    %415 = vector.load %arg26[%c8_263, %c122_264] : memref<24x512xf32, #tpu.memory_space<vmem>>, vector<8x16xf32>
    %416 = tpu.iota {dimensions = array<i32: 1>} : vector<1x16xi32>
    %c3_i32_265 = arith.constant 3 : i32
    %417 = vector.broadcast %c3_i32_265 : i32 to vector<1x16xi32>
    %418 = arith.andi %416, %417 : vector<1x16xi32>
    %c2_i32_266 = arith.constant 2 : i32
    %419 = vector.broadcast %c2_i32_266 : i32 to vector<1x16xi32>
    %420 = arith.addi %418, %419 : vector<1x16xi32>
    %c0_i32_267 = arith.constant 0 : i32
    %421 = vector.broadcast %c0_i32_267 : i32 to vector<1x16xi32>
    %422 = arith.cmpi sge, %420, %421 : vector<1x16xi32>
    %c2_i32_268 = arith.constant 2 : i32
    %423 = vector.broadcast %c2_i32_268 : i32 to vector<1x16xi32>
    %424 = arith.addi %418, %423 : vector<1x16xi32>
    %c4_i32_269 = arith.constant 4 : i32
    %425 = vector.broadcast %c4_i32_269 : i32 to vector<1x16xi32>
    %426 = arith.cmpi slt, %424, %425 : vector<1x16xi32>
    %427 = arith.andi %422, %426 : vector<1x16xi1>
    %428 = arith.extui %427 : vector<1x16xi1> to vector<1x16xi32>
    %429 = arith.sitofp %428 : vector<1x16xi32> to vector<1x16xf32>
    %430 = vector.broadcast %429 : vector<1x16xf32> to vector<8x16xf32>
    %431 = arith.mulf %415, %430 : vector<8x16xf32>
    %c88_270 = arith.constant 88 : index
    %c0_271 = arith.constant 0 : index
    %432 = vector.load %arg25[%c88_270, %c0_271] : memref<216x256xf32, #tpu.memory_space<vmem>>, vector<8x16xf32>
    tpu.vector_store %arg25[%c88_270, %c0_271], %431 {strides = array<i32>} : memref<216x256xf32, #tpu.memory_space<vmem>>, vector<8x16xf32>,
    %c0_272 = arith.constant 0 : index
    %c127_273 = arith.constant 127 : index
    %433 = vector.load %arg26[%c0_272, %c127_273] : memref<24x512xf32, #tpu.memory_space<vmem>>, vector<8x16xf32>
    %434 = vector.broadcast %371 : vector<1x16xf32> to vector<8x16xf32>
    %435 = arith.mulf %433, %434 : vector<8x16xf32>
    %c24_274 = arith.constant 24 : index
    %c0_275 = arith.constant 0 : index
    %436 = vector.load %arg25[%c24_274, %c0_275] : memref<216x256xf32, #tpu.memory_space<vmem>>, vector<8x16xf32>
    tpu.vector_store %arg25[%c24_274, %c0_275], %435 {strides = array<i32>} : memref<216x256xf32, #tpu.memory_space<vmem>>, vector<8x16xf32>,
    %c8_276 = arith.constant 8 : index
    %c126_277 = arith.constant 126 : index
    %437 = vector.load %arg26[%c8_276, %c126_277] : memref<24x512xf32, #tpu.memory_space<vmem>>, vector<8x16xf32>
    %438 = vector.broadcast %389 : vector<1x16xf32> to vector<8x16xf32>
    %439 = arith.mulf %437, %438 : vector<8x16xf32>
    %c96_278 = arith.constant 96 : index
    %c0_279 = arith.constant 0 : index
    %440 = vector.load %arg25[%c96_278, %c0_279] : memref<216x256xf32, #tpu.memory_space<vmem>>, vector<8x16xf32>
    tpu.vector_store %arg25[%c96_278, %c0_279], %439 {strides = array<i32>} : memref<216x256xf32, #tpu.memory_space<vmem>>, vector<8x16xf32>,
    %c0_280 = arith.constant 0 : index
    %c128_281 = arith.constant 128 : index
    %441 = vector.load %arg26[%c0_280, %c128_281] : memref<24x512xf32, #tpu.memory_space<vmem>>, vector<8x16xf32>
    %c32_282 = arith.constant 32 : index
    %c0_283 = arith.constant 0 : index
    %442 = vector.load %arg25[%c32_282, %c0_283] : memref<216x256xf32, #tpu.memory_space<vmem>>, vector<8x16xf32>
    tpu.vector_store %arg25[%c32_282, %c0_283], %441 {strides = array<i32>} : memref<216x256xf32, #tpu.memory_space<vmem>>, vector<8x16xf32>,
    %c8_284 = arith.constant 8 : index
    %c128_285 = arith.constant 128 : index
    %443 = vector.load %arg26[%c8_284, %c128_285] : memref<24x512xf32, #tpu.memory_space<vmem>>, vector<8x16xf32>
    %c104_286 = arith.constant 104 : index
    %c0_287 = arith.constant 0 : index
    %444 = vector.load %arg25[%c104_286, %c0_287] : memref<216x256xf32, #tpu.memory_space<vmem>>, vector<8x16xf32>
    tpu.vector_store %arg25[%c104_286, %c0_287], %443 {strides = array<i32>} : memref<216x256xf32, #tpu.memory_space<vmem>>, vector<8x16xf32>,
    %c0_288 = arith.constant 0 : index
    %c129_289 = arith.constant 129 : index
    %445 = vector.load %arg26[%c0_288, %c129_289] : memref<24x512xf32, #tpu.memory_space<vmem>>, vector<8x16xf32>
    %446 = vector.broadcast %411 : vector<1x16xf32> to vector<8x16xf32>
    %447 = arith.mulf %445, %446 : vector<8x16xf32>
    %c40_290 = arith.constant 40 : index
    %c0_291 = arith.constant 0 : index
    %448 = vector.load %arg25[%c40_290, %c0_291] : memref<216x256xf32, #tpu.memory_space<vmem>>, vector<8x16xf32>
    tpu.vector_store %arg25[%c40_290, %c0_291], %447 {strides = array<i32>} : memref<216x256xf32, #tpu.memory_space<vmem>>, vector<8x16xf32>,
    %c8_292 = arith.constant 8 : index
    %c130_293 = arith.constant 130 : index
    %449 = vector.load %arg26[%c8_292, %c130_293] : memref<24x512xf32, #tpu.memory_space<vmem>>, vector<8x16xf32>
    %450 = vector.broadcast %429 : vector<1x16xf32> to vector<8x16xf32>
    %451 = arith.mulf %449, %450 : vector<8x16xf32>
    %c112_294 = arith.constant 112 : index
    %c0_295 = arith.constant 0 : index
    %452 = vector.load %arg25[%c112_294, %c0_295] : memref<216x256xf32, #tpu.memory_space<vmem>>, vector<8x16xf32>
    tpu.vector_store %arg25[%c112_294, %c0_295], %451 {strides = array<i32>} : memref<216x256xf32, #tpu.memory_space<vmem>>, vector<8x16xf32>,
    %c0_296 = arith.constant 0 : index
    %c131 = arith.constant 131 : index
    %453 = vector.load %arg26[%c0_296, %c131] : memref<24x512xf32, #tpu.memory_space<vmem>>, vector<8x16xf32>
    %454 = vector.broadcast %371 : vector<1x16xf32> to vector<8x16xf32>
    %455 = arith.mulf %453, %454 : vector<8x16xf32>
    %c48_297 = arith.constant 48 : index
    %c0_298 = arith.constant 0 : index
    %456 = vector.load %arg25[%c48_297, %c0_298] : memref<216x256xf32, #tpu.memory_space<vmem>>, vector<8x16xf32>
    tpu.vector_store %arg25[%c48_297, %c0_298], %455 {strides = array<i32>} : memref<216x256xf32, #tpu.memory_space<vmem>>, vector<8x16xf32>,
    %c8_299 = arith.constant 8 : index
    %c134_300 = arith.constant 134 : index
    %457 = vector.load %arg26[%c8_299, %c134_300] : memref<24x512xf32, #tpu.memory_space<vmem>>, vector<8x16xf32>
    %458 = vector.broadcast %389 : vector<1x16xf32> to vector<8x16xf32>
    %459 = arith.mulf %457, %458 : vector<8x16xf32>
    %c120_301 = arith.constant 120 : index
    %c0_302 = arith.constant 0 : index
    %460 = vector.load %arg25[%c120_301, %c0_302] : memref<216x256xf32, #tpu.memory_space<vmem>>, vector<8x16xf32>
    tpu.vector_store %arg25[%c120_301, %c0_302], %459 {strides = array<i32>} : memref<216x256xf32, #tpu.memory_space<vmem>>, vector<8x16xf32>,
    %c0_303 = arith.constant 0 : index
    %c132_304 = arith.constant 132 : index
    %461 = vector.load %arg26[%c0_303, %c132_304] : memref<24x512xf32, #tpu.memory_space<vmem>>, vector<8x16xf32>
    %c56_305 = arith.constant 56 : index
    %c0_306 = arith.constant 0 : index
    %462 = vector.load %arg25[%c56_305, %c0_306] : memref<216x256xf32, #tpu.memory_space<vmem>>, vector<8x16xf32>
    tpu.vector_store %arg25[%c56_305, %c0_306], %461 {strides = array<i32>} : memref<216x256xf32, #tpu.memory_space<vmem>>, vector<8x16xf32>,
    %c8_307 = arith.constant 8 : index
    %c136_308 = arith.constant 136 : index
    %463 = vector.load %arg26[%c8_307, %c136_308] : memref<24x512xf32, #tpu.memory_space<vmem>>, vector<8x16xf32>
    %c128_309 = arith.constant 128 : index
    %c0_310 = arith.constant 0 : index
    %464 = vector.load %arg25[%c128_309, %c0_310] : memref<216x256xf32, #tpu.memory_space<vmem>>, vector<8x16xf32>
    tpu.vector_store %arg25[%c128_309, %c0_310], %463 {strides = array<i32>} : memref<216x256xf32, #tpu.memory_space<vmem>>, vector<8x16xf32>,
    %c0_311 = arith.constant 0 : index
    %c133 = arith.constant 133 : index
    %465 = vector.load %arg26[%c0_311, %c133] : memref<24x512xf32, #tpu.memory_space<vmem>>, vector<8x16xf32>
    %466 = vector.broadcast %411 : vector<1x16xf32> to vector<8x16xf32>
    %467 = arith.mulf %465, %466 : vector<8x16xf32>
    %c64_312 = arith.constant 64 : index
    %c0_313 = arith.constant 0 : index
    %468 = vector.load %arg25[%c64_312, %c0_313] : memref<216x256xf32, #tpu.memory_space<vmem>>, vector<8x16xf32>
    tpu.vector_store %arg25[%c64_312, %c0_313], %467 {strides = array<i32>} : memref<216x256xf32, #tpu.memory_space<vmem>>, vector<8x16xf32>,
    %c8_314 = arith.constant 8 : index
    %c138 = arith.constant 138 : index
    %469 = vector.load %arg26[%c8_314, %c138] : memref<24x512xf32, #tpu.memory_space<vmem>>, vector<8x16xf32>
    %470 = vector.broadcast %429 : vector<1x16xf32> to vector<8x16xf32>
    %471 = arith.mulf %469, %470 : vector<8x16xf32>
    %c136_315 = arith.constant 136 : index
    %c0_316 = arith.constant 0 : index
    %472 = vector.load %arg25[%c136_315, %c0_316] : memref<216x256xf32, #tpu.memory_space<vmem>>, vector<8x16xf32>
    tpu.vector_store %arg25[%c136_315, %c0_316], %471 {strides = array<i32>} : memref<216x256xf32, #tpu.memory_space<vmem>>, vector<8x16xf32>,
    %c0_317 = arith.constant 0 : index
    %c0_318 = arith.constant 0 : index
    %473 = vector.load %arg25[%c0_317, %c0_318] : memref<216x256xf32, #tpu.memory_space<vmem>>, vector<144x16xf32>
    %c0_319 = arith.constant 0 : index
    %c0_320 = arith.constant 0 : index
    %474 = vector.load %arg21[%c0_319, %c0_320] : memref<16x144xbf16, #tpu.memory_space<vmem>>, vector<16x144xbf16>
    %475 = arith.truncf %473 : vector<144x16xf32> to vector<144x16xbf16>
    %cst_321 = arith.constant dense<0.000000e+00> : vector<16x16xf32>
    %476 = tpu.matmul %474, %475, %cst_321 {dimension_numbers = #tpu.dot_dimension_numbers<[1], [0], [0], [1], [0, 0, 1, 1], [], []>} : vector<16x144xbf16>, vector<144x16xbf16>, vector<16x16xf32> -> vector<16x16xf32>
    %c0_322 = arith.constant 0 : index
    %c0_323 = arith.constant 0 : index
    %477 = vector.load %arg7[%c0_322, %c0_323] : memref<16x1xf32, #tpu.memory_space<vmem>>, vector<16x1xf32>
    %478 = vector.broadcast %477 : vector<16x1xf32> to vector<16x16xf32>
    %479 = arith.addf %476, %478 : vector<16x16xf32>
    %cst_324 = arith.constant 0.000000e+00 : f32
    %480 = vector.broadcast %cst_324 : f32 to vector<16x16xf32>
    %481 = arith.maximumf %479, %480 : vector<16x16xf32>
    %c0_325 = arith.constant 0 : index
    %c0_326 = arith.constant 0 : index
    %482 = vector.load %arg12[%c0_325, %c0_326] : memref<16x4xbf16, #tpu.memory_space<vmem>>, vector<16x4xbf16>
    %483 = arith.truncf %481 : vector<16x16xf32> to vector<16x16xbf16>
    %cst_327 = arith.constant dense<0.000000e+00> : vector<16x4xf32>
    %484 = tpu.matmul %483, %482, %cst_327 {dimension_numbers = #tpu.dot_dimension_numbers<[1], [0], [0], [1], [0, 0, 1, 1], [], []>} : vector<16x16xbf16>, vector<16x4xbf16>, vector<16x4xf32> -> vector<16x4xf32>
    %c0_328 = arith.constant 0 : index
    %c128_329 = arith.constant 128 : index
    %485 = vector.load %arg26[%c0_328, %c128_329] : memref<24x512xf32, #tpu.memory_space<vmem>>, vector<16x4xf32>
    tpu.vector_store %arg26[%c0_328, %c128_329], %484 {strides = array<i32>} : memref<24x512xf32, #tpu.memory_space<vmem>>, vector<16x4xf32>,
    %cst_330 = arith.constant 0.000000e+00 : f32
    %486 = vector.broadcast %cst_330 : f32 to vector<16x128xf32>
    %c0_331 = arith.constant 0 : index
    %c132_332 = arith.constant 132 : index
    %487 = vector.load %arg26[%c0_331, %c132_332] : memref<24x512xf32, #tpu.memory_space<vmem>>, vector<16x128xf32>
    tpu.vector_store %arg26[%c0_331, %c132_332], %486 {strides = array<i32>} : memref<24x512xf32, #tpu.memory_space<vmem>>, vector<16x128xf32>,
    %c0_333 = arith.constant 0 : index
    %c125_334 = arith.constant 125 : index
    %488 = vector.load %arg26[%c0_333, %c125_334] : memref<24x512xf32, #tpu.memory_space<vmem>>, vector<8x4xf32>
    %489 = tpu.iota {dimensions = array<i32: 1>} : vector<1x4xi32>
    %c1_i32_335 = arith.constant 1 : i32
    %490 = vector.broadcast %c1_i32_335 : i32 to vector<1x4xi32>
    %491 = arith.andi %489, %490 : vector<1x4xi32>
    %c-1_i32_336 = arith.constant -1 : i32
    %492 = vector.broadcast %c-1_i32_336 : i32 to vector<1x4xi32>
    %493 = arith.addi %491, %492 : vector<1x4xi32>
    %c0_i32_337 = arith.constant 0 : i32
    %494 = vector.broadcast %c0_i32_337 : i32 to vector<1x4xi32>
    %495 = arith.cmpi sge, %493, %494 : vector<1x4xi32>
    %c-1_i32_338 = arith.constant -1 : i32
    %496 = vector.broadcast %c-1_i32_338 : i32 to vector<1x4xi32>
    %497 = arith.addi %491, %496 : vector<1x4xi32>
    %c2_i32_339 = arith.constant 2 : i32
    %498 = vector.broadcast %c2_i32_339 : i32 to vector<1x4xi32>
    %499 = arith.cmpi slt, %497, %498 : vector<1x4xi32>
    %500 = arith.andi %495, %499 : vector<1x4xi1>
    %501 = arith.extui %500 : vector<1x4xi1> to vector<1x4xi32>
    %502 = arith.sitofp %501 : vector<1x4xi32> to vector<1x4xf32>
    %503 = vector.broadcast %502 : vector<1x4xf32> to vector<8x4xf32>
    %504 = arith.mulf %488, %503 : vector<8x4xf32>
    %c0_340 = arith.constant 0 : index
    %c0_341 = arith.constant 0 : index
    %505 = vector.load %arg25[%c0_340, %c0_341] : memref<216x256xf32, #tpu.memory_space<vmem>>, vector<8x4xf32>
    tpu.vector_store %arg25[%c0_340, %c0_341], %504 {strides = array<i32>} : memref<216x256xf32, #tpu.memory_space<vmem>>, vector<8x4xf32>,
    %c8_342 = arith.constant 8 : index
    %c122_343 = arith.constant 122 : index
    %506 = vector.load %arg26[%c8_342, %c122_343] : memref<24x512xf32, #tpu.memory_space<vmem>>, vector<8x4xf32>
    %507 = tpu.iota {dimensions = array<i32: 1>} : vector<1x4xi32>
    %c1_i32_344 = arith.constant 1 : i32
    %508 = vector.broadcast %c1_i32_344 : i32 to vector<1x4xi32>
    %509 = arith.andi %507, %508 : vector<1x4xi32>
    %c-2_i32_345 = arith.constant -2 : i32
    %510 = vector.broadcast %c-2_i32_345 : i32 to vector<1x4xi32>
    %511 = arith.addi %509, %510 : vector<1x4xi32>
    %c0_i32_346 = arith.constant 0 : i32
    %512 = vector.broadcast %c0_i32_346 : i32 to vector<1x4xi32>
    %513 = arith.cmpi sge, %511, %512 : vector<1x4xi32>
    %c-2_i32_347 = arith.constant -2 : i32
    %514 = vector.broadcast %c-2_i32_347 : i32 to vector<1x4xi32>
    %515 = arith.addi %509, %514 : vector<1x4xi32>
    %c2_i32_348 = arith.constant 2 : i32
    %516 = vector.broadcast %c2_i32_348 : i32 to vector<1x4xi32>
    %517 = arith.cmpi slt, %515, %516 : vector<1x4xi32>
    %518 = arith.andi %513, %517 : vector<1x4xi1>
    %519 = arith.extui %518 : vector<1x4xi1> to vector<1x4xi32>
    %520 = arith.sitofp %519 : vector<1x4xi32> to vector<1x4xf32>
    %521 = vector.broadcast %520 : vector<1x4xf32> to vector<8x4xf32>
    %522 = arith.mulf %506, %521 : vector<8x4xf32>
    %c72_349 = arith.constant 72 : index
    %c0_350 = arith.constant 0 : index
    %523 = vector.load %arg25[%c72_349, %c0_350] : memref<216x256xf32, #tpu.memory_space<vmem>>, vector<8x4xf32>
    tpu.vector_store %arg25[%c72_349, %c0_350], %522 {strides = array<i32>} : memref<216x256xf32, #tpu.memory_space<vmem>>, vector<8x4xf32>,
    %c0_351 = arith.constant 0 : index
    %c126_352 = arith.constant 126 : index
    %524 = vector.load %arg26[%c0_351, %c126_352] : memref<24x512xf32, #tpu.memory_space<vmem>>, vector<8x4xf32>
    %c8_353 = arith.constant 8 : index
    %c0_354 = arith.constant 0 : index
    %525 = vector.load %arg25[%c8_353, %c0_354] : memref<216x256xf32, #tpu.memory_space<vmem>>, vector<8x4xf32>
    tpu.vector_store %arg25[%c8_353, %c0_354], %524 {strides = array<i32>} : memref<216x256xf32, #tpu.memory_space<vmem>>, vector<8x4xf32>,
    %c8_355 = arith.constant 8 : index
    %c124_356 = arith.constant 124 : index
    %526 = vector.load %arg26[%c8_355, %c124_356] : memref<24x512xf32, #tpu.memory_space<vmem>>, vector<8x4xf32>
    %c80_357 = arith.constant 80 : index
    %c0_358 = arith.constant 0 : index
    %527 = vector.load %arg25[%c80_357, %c0_358] : memref<216x256xf32, #tpu.memory_space<vmem>>, vector<8x4xf32>
    tpu.vector_store %arg25[%c80_357, %c0_358], %526 {strides = array<i32>} : memref<216x256xf32, #tpu.memory_space<vmem>>, vector<8x4xf32>,
    %c0_359 = arith.constant 0 : index
    %c127_360 = arith.constant 127 : index
    %528 = vector.load %arg26[%c0_359, %c127_360] : memref<24x512xf32, #tpu.memory_space<vmem>>, vector<8x4xf32>
    %529 = tpu.iota {dimensions = array<i32: 1>} : vector<1x4xi32>
    %c1_i32_361 = arith.constant 1 : i32
    %530 = vector.broadcast %c1_i32_361 : i32 to vector<1x4xi32>
    %531 = arith.andi %529, %530 : vector<1x4xi32>
    %c1_i32_362 = arith.constant 1 : i32
    %532 = vector.broadcast %c1_i32_362 : i32 to vector<1x4xi32>
    %533 = arith.addi %531, %532 : vector<1x4xi32>
    %c0_i32_363 = arith.constant 0 : i32
    %534 = vector.broadcast %c0_i32_363 : i32 to vector<1x4xi32>
    %535 = arith.cmpi sge, %533, %534 : vector<1x4xi32>
    %c1_i32_364 = arith.constant 1 : i32
    %536 = vector.broadcast %c1_i32_364 : i32 to vector<1x4xi32>
    %537 = arith.addi %531, %536 : vector<1x4xi32>
    %c2_i32_365 = arith.constant 2 : i32
    %538 = vector.broadcast %c2_i32_365 : i32 to vector<1x4xi32>
    %539 = arith.cmpi slt, %537, %538 : vector<1x4xi32>
    %540 = arith.andi %535, %539 : vector<1x4xi1>
    %541 = arith.extui %540 : vector<1x4xi1> to vector<1x4xi32>
    %542 = arith.sitofp %541 : vector<1x4xi32> to vector<1x4xf32>
    %543 = vector.broadcast %542 : vector<1x4xf32> to vector<8x4xf32>
    %544 = arith.mulf %528, %543 : vector<8x4xf32>
    %c16_366 = arith.constant 16 : index
    %c0_367 = arith.constant 0 : index
    %545 = vector.load %arg25[%c16_366, %c0_367] : memref<216x256xf32, #tpu.memory_space<vmem>>, vector<8x4xf32>
    tpu.vector_store %arg25[%c16_366, %c0_367], %544 {strides = array<i32>} : memref<216x256xf32, #tpu.memory_space<vmem>>, vector<8x4xf32>,
    %c8_368 = arith.constant 8 : index
    %c126_369 = arith.constant 126 : index
    %546 = vector.load %arg26[%c8_368, %c126_369] : memref<24x512xf32, #tpu.memory_space<vmem>>, vector<8x4xf32>
    %547 = tpu.iota {dimensions = array<i32: 1>} : vector<1x4xi32>
    %c1_i32_370 = arith.constant 1 : i32
    %548 = vector.broadcast %c1_i32_370 : i32 to vector<1x4xi32>
    %549 = arith.andi %547, %548 : vector<1x4xi32>
    %c2_i32_371 = arith.constant 2 : i32
    %550 = vector.broadcast %c2_i32_371 : i32 to vector<1x4xi32>
    %551 = arith.addi %549, %550 : vector<1x4xi32>
    %c0_i32_372 = arith.constant 0 : i32
    %552 = vector.broadcast %c0_i32_372 : i32 to vector<1x4xi32>
    %553 = arith.cmpi sge, %551, %552 : vector<1x4xi32>
    %c2_i32_373 = arith.constant 2 : i32
    %554 = vector.broadcast %c2_i32_373 : i32 to vector<1x4xi32>
    %555 = arith.addi %549, %554 : vector<1x4xi32>
    %c2_i32_374 = arith.constant 2 : i32
    %556 = vector.broadcast %c2_i32_374 : i32 to vector<1x4xi32>
    %557 = arith.cmpi slt, %555, %556 : vector<1x4xi32>
    %558 = arith.andi %553, %557 : vector<1x4xi1>
    %559 = arith.extui %558 : vector<1x4xi1> to vector<1x4xi32>
    %560 = arith.sitofp %559 : vector<1x4xi32> to vector<1x4xf32>
    %561 = vector.broadcast %560 : vector<1x4xf32> to vector<8x4xf32>
    %562 = arith.mulf %546, %561 : vector<8x4xf32>
    %c88_375 = arith.constant 88 : index
    %c0_376 = arith.constant 0 : index
    %563 = vector.load %arg25[%c88_375, %c0_376] : memref<216x256xf32, #tpu.memory_space<vmem>>, vector<8x4xf32>
    tpu.vector_store %arg25[%c88_375, %c0_376], %562 {strides = array<i32>} : memref<216x256xf32, #tpu.memory_space<vmem>>, vector<8x4xf32>,
    %c0_377 = arith.constant 0 : index
    %c127_378 = arith.constant 127 : index
    %564 = vector.load %arg26[%c0_377, %c127_378] : memref<24x512xf32, #tpu.memory_space<vmem>>, vector<8x4xf32>
    %565 = vector.broadcast %502 : vector<1x4xf32> to vector<8x4xf32>
    %566 = arith.mulf %564, %565 : vector<8x4xf32>
    %c24_379 = arith.constant 24 : index
    %c0_380 = arith.constant 0 : index
    %567 = vector.load %arg25[%c24_379, %c0_380] : memref<216x256xf32, #tpu.memory_space<vmem>>, vector<8x4xf32>
    tpu.vector_store %arg25[%c24_379, %c0_380], %566 {strides = array<i32>} : memref<216x256xf32, #tpu.memory_space<vmem>>, vector<8x4xf32>,
    %c8_381 = arith.constant 8 : index
    %c126_382 = arith.constant 126 : index
    %568 = vector.load %arg26[%c8_381, %c126_382] : memref<24x512xf32, #tpu.memory_space<vmem>>, vector<8x4xf32>
    %569 = vector.broadcast %520 : vector<1x4xf32> to vector<8x4xf32>
    %570 = arith.mulf %568, %569 : vector<8x4xf32>
    %c96_383 = arith.constant 96 : index
    %c0_384 = arith.constant 0 : index
    %571 = vector.load %arg25[%c96_383, %c0_384] : memref<216x256xf32, #tpu.memory_space<vmem>>, vector<8x4xf32>
    tpu.vector_store %arg25[%c96_383, %c0_384], %570 {strides = array<i32>} : memref<216x256xf32, #tpu.memory_space<vmem>>, vector<8x4xf32>,
    %c0_385 = arith.constant 0 : index
    %c128_386 = arith.constant 128 : index
    %572 = vector.load %arg26[%c0_385, %c128_386] : memref<24x512xf32, #tpu.memory_space<vmem>>, vector<8x4xf32>
    %c32_387 = arith.constant 32 : index
    %c0_388 = arith.constant 0 : index
    %573 = vector.load %arg25[%c32_387, %c0_388] : memref<216x256xf32, #tpu.memory_space<vmem>>, vector<8x4xf32>
    tpu.vector_store %arg25[%c32_387, %c0_388], %572 {strides = array<i32>} : memref<216x256xf32, #tpu.memory_space<vmem>>, vector<8x4xf32>,
    %c8_389 = arith.constant 8 : index
    %c128_390 = arith.constant 128 : index
    %574 = vector.load %arg26[%c8_389, %c128_390] : memref<24x512xf32, #tpu.memory_space<vmem>>, vector<8x4xf32>
    %c104_391 = arith.constant 104 : index
    %c0_392 = arith.constant 0 : index
    %575 = vector.load %arg25[%c104_391, %c0_392] : memref<216x256xf32, #tpu.memory_space<vmem>>, vector<8x4xf32>
    tpu.vector_store %arg25[%c104_391, %c0_392], %574 {strides = array<i32>} : memref<216x256xf32, #tpu.memory_space<vmem>>, vector<8x4xf32>,
    %c0_393 = arith.constant 0 : index
    %c129_394 = arith.constant 129 : index
    %576 = vector.load %arg26[%c0_393, %c129_394] : memref<24x512xf32, #tpu.memory_space<vmem>>, vector<8x4xf32>
    %577 = vector.broadcast %542 : vector<1x4xf32> to vector<8x4xf32>
    %578 = arith.mulf %576, %577 : vector<8x4xf32>
    %c40_395 = arith.constant 40 : index
    %c0_396 = arith.constant 0 : index
    %579 = vector.load %arg25[%c40_395, %c0_396] : memref<216x256xf32, #tpu.memory_space<vmem>>, vector<8x4xf32>
    tpu.vector_store %arg25[%c40_395, %c0_396], %578 {strides = array<i32>} : memref<216x256xf32, #tpu.memory_space<vmem>>, vector<8x4xf32>,
    %c8_397 = arith.constant 8 : index
    %c130_398 = arith.constant 130 : index
    %580 = vector.load %arg26[%c8_397, %c130_398] : memref<24x512xf32, #tpu.memory_space<vmem>>, vector<8x4xf32>
    %581 = vector.broadcast %560 : vector<1x4xf32> to vector<8x4xf32>
    %582 = arith.mulf %580, %581 : vector<8x4xf32>
    %c112_399 = arith.constant 112 : index
    %c0_400 = arith.constant 0 : index
    %583 = vector.load %arg25[%c112_399, %c0_400] : memref<216x256xf32, #tpu.memory_space<vmem>>, vector<8x4xf32>
    tpu.vector_store %arg25[%c112_399, %c0_400], %582 {strides = array<i32>} : memref<216x256xf32, #tpu.memory_space<vmem>>, vector<8x4xf32>,
    %c0_401 = arith.constant 0 : index
    %c129_402 = arith.constant 129 : index
    %584 = vector.load %arg26[%c0_401, %c129_402] : memref<24x512xf32, #tpu.memory_space<vmem>>, vector<8x4xf32>
    %585 = vector.broadcast %502 : vector<1x4xf32> to vector<8x4xf32>
    %586 = arith.mulf %584, %585 : vector<8x4xf32>
    %c48_403 = arith.constant 48 : index
    %c0_404 = arith.constant 0 : index
    %587 = vector.load %arg25[%c48_403, %c0_404] : memref<216x256xf32, #tpu.memory_space<vmem>>, vector<8x4xf32>
    tpu.vector_store %arg25[%c48_403, %c0_404], %586 {strides = array<i32>} : memref<216x256xf32, #tpu.memory_space<vmem>>, vector<8x4xf32>,
    %c8_405 = arith.constant 8 : index
    %c130_406 = arith.constant 130 : index
    %588 = vector.load %arg26[%c8_405, %c130_406] : memref<24x512xf32, #tpu.memory_space<vmem>>, vector<8x4xf32>
    %589 = vector.broadcast %520 : vector<1x4xf32> to vector<8x4xf32>
    %590 = arith.mulf %588, %589 : vector<8x4xf32>
    %c120_407 = arith.constant 120 : index
    %c0_408 = arith.constant 0 : index
    %591 = vector.load %arg25[%c120_407, %c0_408] : memref<216x256xf32, #tpu.memory_space<vmem>>, vector<8x4xf32>
    tpu.vector_store %arg25[%c120_407, %c0_408], %590 {strides = array<i32>} : memref<216x256xf32, #tpu.memory_space<vmem>>, vector<8x4xf32>,
    %c0_409 = arith.constant 0 : index
    %c130_410 = arith.constant 130 : index
    %592 = vector.load %arg26[%c0_409, %c130_410] : memref<24x512xf32, #tpu.memory_space<vmem>>, vector<8x4xf32>
    %c56_411 = arith.constant 56 : index
    %c0_412 = arith.constant 0 : index
    %593 = vector.load %arg25[%c56_411, %c0_412] : memref<216x256xf32, #tpu.memory_space<vmem>>, vector<8x4xf32>
    tpu.vector_store %arg25[%c56_411, %c0_412], %592 {strides = array<i32>} : memref<216x256xf32, #tpu.memory_space<vmem>>, vector<8x4xf32>,
    %c8_413 = arith.constant 8 : index
    %c132_414 = arith.constant 132 : index
    %594 = vector.load %arg26[%c8_413, %c132_414] : memref<24x512xf32, #tpu.memory_space<vmem>>, vector<8x4xf32>
    %c128_415 = arith.constant 128 : index
    %c0_416 = arith.constant 0 : index
    %595 = vector.load %arg25[%c128_415, %c0_416] : memref<216x256xf32, #tpu.memory_space<vmem>>, vector<8x4xf32>
    tpu.vector_store %arg25[%c128_415, %c0_416], %594 {strides = array<i32>} : memref<216x256xf32, #tpu.memory_space<vmem>>, vector<8x4xf32>,
    %c0_417 = arith.constant 0 : index
    %c131_418 = arith.constant 131 : index
    %596 = vector.load %arg26[%c0_417, %c131_418] : memref<24x512xf32, #tpu.memory_space<vmem>>, vector<8x4xf32>
    %597 = vector.broadcast %542 : vector<1x4xf32> to vector<8x4xf32>
    %598 = arith.mulf %596, %597 : vector<8x4xf32>
    %c64_419 = arith.constant 64 : index
    %c0_420 = arith.constant 0 : index
    %599 = vector.load %arg25[%c64_419, %c0_420] : memref<216x256xf32, #tpu.memory_space<vmem>>, vector<8x4xf32>
    tpu.vector_store %arg25[%c64_419, %c0_420], %598 {strides = array<i32>} : memref<216x256xf32, #tpu.memory_space<vmem>>, vector<8x4xf32>,
    %c8_421 = arith.constant 8 : index
    %c134_422 = arith.constant 134 : index
    %600 = vector.load %arg26[%c8_421, %c134_422] : memref<24x512xf32, #tpu.memory_space<vmem>>, vector<8x4xf32>
    %601 = vector.broadcast %560 : vector<1x4xf32> to vector<8x4xf32>
    %602 = arith.mulf %600, %601 : vector<8x4xf32>
    %c136_423 = arith.constant 136 : index
    %c0_424 = arith.constant 0 : index
    %603 = vector.load %arg25[%c136_423, %c0_424] : memref<216x256xf32, #tpu.memory_space<vmem>>, vector<8x4xf32>
    tpu.vector_store %arg25[%c136_423, %c0_424], %602 {strides = array<i32>} : memref<216x256xf32, #tpu.memory_space<vmem>>, vector<8x4xf32>,
    %c0_425 = arith.constant 0 : index
    %c0_426 = arith.constant 0 : index
    %604 = vector.load %arg25[%c0_425, %c0_426] : memref<216x256xf32, #tpu.memory_space<vmem>>, vector<144x4xf32>
    %c0_427 = arith.constant 0 : index
    %c0_428 = arith.constant 0 : index
    %605 = vector.load %arg22[%c0_427, %c0_428] : memref<16x144xbf16, #tpu.memory_space<vmem>>, vector<16x144xbf16>
    %606 = arith.truncf %604 : vector<144x4xf32> to vector<144x4xbf16>
    %cst_429 = arith.constant dense<0.000000e+00> : vector<16x4xf32>
    %607 = tpu.matmul %605, %606, %cst_429 {dimension_numbers = #tpu.dot_dimension_numbers<[1], [0], [0], [1], [0, 0, 1, 1], [], []>} : vector<16x144xbf16>, vector<144x4xbf16>, vector<16x4xf32> -> vector<16x4xf32>
    %c0_430 = arith.constant 0 : index
    %c0_431 = arith.constant 0 : index
    %608 = vector.load %arg8[%c0_430, %c0_431] : memref<16x1xf32, #tpu.memory_space<vmem>>, vector<16x1xf32>
    %609 = vector.broadcast %608 : vector<16x1xf32> to vector<16x4xf32>
    %610 = arith.addf %607, %609 : vector<16x4xf32>
    %cst_432 = arith.constant 0.000000e+00 : f32
    %611 = vector.broadcast %cst_432 : f32 to vector<16x4xf32>
    %612 = arith.maximumf %610, %611 : vector<16x4xf32>
    %c0_433 = arith.constant 0 : index
    %c0_434 = arith.constant 0 : index
    %613 = vector.load %arg13[%c0_433, %c0_434] : memref<64x256xbf16, #tpu.memory_space<vmem>>, vector<64x256xbf16>
    %614 = arith.truncf %350 : vector<16x64xf32> to vector<16x64xbf16>
    %cst_435 = arith.constant dense<0.000000e+00> : vector<16x256xf32>
    %615 = tpu.matmul %614, %613, %cst_435 {dimension_numbers = #tpu.dot_dimension_numbers<[1], [0], [0], [1], [0, 0, 1, 1], [], []>} : vector<16x64xbf16>, vector<64x256xbf16>, vector<16x256xf32> -> vector<16x256xf32>
    %616 = arith.addf %11, %615 : vector<16x256xf32>
    %c0_436 = arith.constant 0 : index
    %c0_437 = arith.constant 0 : index
    %617 = vector.load %arg14[%c0_436, %c0_437] : memref<16x256xbf16, #tpu.memory_space<vmem>>, vector<16x256xbf16>
    %618 = arith.truncf %481 : vector<16x16xf32> to vector<16x16xbf16>
    %cst_438 = arith.constant dense<0.000000e+00> : vector<16x256xf32>
    %619 = tpu.matmul %618, %617, %cst_438 {dimension_numbers = #tpu.dot_dimension_numbers<[1], [0], [0], [1], [0, 0, 1, 1], [], []>} : vector<16x16xbf16>, vector<16x256xbf16>, vector<16x256xf32> -> vector<16x256xf32>
    %620 = arith.addf %616, %619 : vector<16x256xf32>
    %c0_439 = arith.constant 0 : index
    %c0_440 = arith.constant 0 : index
    %621 = vector.load %arg15[%c0_439, %c0_440] : memref<4x256xbf16, #tpu.memory_space<vmem>>, vector<4x256xbf16>
    %622 = arith.truncf %612 : vector<16x4xf32> to vector<16x4xbf16>
    %cst_441 = arith.constant dense<0.000000e+00> : vector<16x256xf32>
    %623 = tpu.matmul %622, %621, %cst_441 {dimension_numbers = #tpu.dot_dimension_numbers<[1], [0], [0], [1], [0, 0, 1, 1], [], []>} : vector<16x4xbf16>, vector<4x256xbf16>, vector<16x256xf32> -> vector<16x256xf32>
    %624 = arith.addf %620, %623 : vector<16x256xf32>
    %c0_442 = arith.constant 0 : index
    %c128_443 = arith.constant 128 : index
    %625 = vector.load %arg26[%c0_442, %c128_443] : memref<24x512xf32, #tpu.memory_space<vmem>>, vector<16x256xf32>
    tpu.vector_store %arg26[%c0_442, %c128_443], %624 {strides = array<i32>} : memref<24x512xf32, #tpu.memory_space<vmem>>, vector<16x256xf32>,
    %c16_444 = arith.constant 16 : index
    %c128_445 = arith.constant 128 : index
    %626 = vector.load %arg26[%c16_444, %c128_445] : memref<24x512xf32, #tpu.memory_space<vmem>>, vector<4x256xf32>
    tpu.vector_store %arg26[%c16_444, %c128_445], %219 {strides = array<i32>} : memref<24x512xf32, #tpu.memory_space<vmem>>, vector<4x256xf32>,
    %c0_446 = arith.constant 0 : index
    %c111 = arith.constant 111 : index
    %627 = vector.load %arg26[%c0_446, %c111] : memref<24x512xf32, #tpu.memory_space<vmem>>, vector<24x256xf32>
    %628 = tpu.iota {dimensions = array<i32: 1>} : vector<1x256xi32>
    %c15_i32_447 = arith.constant 15 : i32
    %629 = vector.broadcast %c15_i32_447 : i32 to vector<1x256xi32>
    %630 = arith.andi %628, %629 : vector<1x256xi32>
    %c-1_i32_448 = arith.constant -1 : i32
    %631 = vector.broadcast %c-1_i32_448 : i32 to vector<1x256xi32>
    %632 = arith.addi %630, %631 : vector<1x256xi32>
    %c0_i32_449 = arith.constant 0 : i32
    %633 = vector.broadcast %c0_i32_449 : i32 to vector<1x256xi32>
    %634 = arith.cmpi sge, %632, %633 : vector<1x256xi32>
    %c-1_i32_450 = arith.constant -1 : i32
    %635 = vector.broadcast %c-1_i32_450 : i32 to vector<1x256xi32>
    %636 = arith.addi %630, %635 : vector<1x256xi32>
    %c16_i32_451 = arith.constant 16 : i32
    %637 = vector.broadcast %c16_i32_451 : i32 to vector<1x256xi32>
    %638 = arith.cmpi slt, %636, %637 : vector<1x256xi32>
    %639 = arith.andi %634, %638 : vector<1x256xi1>
    %640 = arith.extui %639 : vector<1x256xi1> to vector<1x256xi32>
    %641 = arith.sitofp %640 : vector<1x256xi32> to vector<1x256xf32>
    %642 = vector.broadcast %641 : vector<1x256xf32> to vector<24x256xf32>
    %643 = arith.mulf %627, %642 : vector<24x256xf32>
    %c0_452 = arith.constant 0 : index
    %c0_453 = arith.constant 0 : index
    %644 = vector.load %arg25[%c0_452, %c0_453] : memref<216x256xf32, #tpu.memory_space<vmem>>, vector<24x256xf32>
    tpu.vector_store %arg25[%c0_452, %c0_453], %643 {strides = array<i32>} : memref<216x256xf32, #tpu.memory_space<vmem>>, vector<24x256xf32>,
    %c0_454 = arith.constant 0 : index
    %c112_455 = arith.constant 112 : index
    %645 = vector.load %arg26[%c0_454, %c112_455] : memref<24x512xf32, #tpu.memory_space<vmem>>, vector<24x256xf32>
    %c24_456 = arith.constant 24 : index
    %c0_457 = arith.constant 0 : index
    %646 = vector.load %arg25[%c24_456, %c0_457] : memref<216x256xf32, #tpu.memory_space<vmem>>, vector<24x256xf32>
    tpu.vector_store %arg25[%c24_456, %c0_457], %645 {strides = array<i32>} : memref<216x256xf32, #tpu.memory_space<vmem>>, vector<24x256xf32>,
    %c0_458 = arith.constant 0 : index
    %c113 = arith.constant 113 : index
    %647 = vector.load %arg26[%c0_458, %c113] : memref<24x512xf32, #tpu.memory_space<vmem>>, vector<24x256xf32>
    %648 = tpu.iota {dimensions = array<i32: 1>} : vector<1x256xi32>
    %c15_i32_459 = arith.constant 15 : i32
    %649 = vector.broadcast %c15_i32_459 : i32 to vector<1x256xi32>
    %650 = arith.andi %648, %649 : vector<1x256xi32>
    %c1_i32_460 = arith.constant 1 : i32
    %651 = vector.broadcast %c1_i32_460 : i32 to vector<1x256xi32>
    %652 = arith.addi %650, %651 : vector<1x256xi32>
    %c0_i32_461 = arith.constant 0 : i32
    %653 = vector.broadcast %c0_i32_461 : i32 to vector<1x256xi32>
    %654 = arith.cmpi sge, %652, %653 : vector<1x256xi32>
    %c1_i32_462 = arith.constant 1 : i32
    %655 = vector.broadcast %c1_i32_462 : i32 to vector<1x256xi32>
    %656 = arith.addi %650, %655 : vector<1x256xi32>
    %c16_i32_463 = arith.constant 16 : i32
    %657 = vector.broadcast %c16_i32_463 : i32 to vector<1x256xi32>
    %658 = arith.cmpi slt, %656, %657 : vector<1x256xi32>
    %659 = arith.andi %654, %658 : vector<1x256xi1>
    %660 = arith.extui %659 : vector<1x256xi1> to vector<1x256xi32>
    %661 = arith.sitofp %660 : vector<1x256xi32> to vector<1x256xf32>
    %662 = vector.broadcast %661 : vector<1x256xf32> to vector<24x256xf32>
    %663 = arith.mulf %647, %662 : vector<24x256xf32>
    %c48_464 = arith.constant 48 : index
    %c0_465 = arith.constant 0 : index
    %664 = vector.load %arg25[%c48_464, %c0_465] : memref<216x256xf32, #tpu.memory_space<vmem>>, vector<24x256xf32>
    tpu.vector_store %arg25[%c48_464, %c0_465], %663 {strides = array<i32>} : memref<216x256xf32, #tpu.memory_space<vmem>>, vector<24x256xf32>,
    %c0_466 = arith.constant 0 : index
    %c127_467 = arith.constant 127 : index
    %665 = vector.load %arg26[%c0_466, %c127_467] : memref<24x512xf32, #tpu.memory_space<vmem>>, vector<24x256xf32>
    %666 = vector.broadcast %641 : vector<1x256xf32> to vector<24x256xf32>
    %667 = arith.mulf %665, %666 : vector<24x256xf32>
    %c72_468 = arith.constant 72 : index
    %c0_469 = arith.constant 0 : index
    %668 = vector.load %arg25[%c72_468, %c0_469] : memref<216x256xf32, #tpu.memory_space<vmem>>, vector<24x256xf32>
    tpu.vector_store %arg25[%c72_468, %c0_469], %667 {strides = array<i32>} : memref<216x256xf32, #tpu.memory_space<vmem>>, vector<24x256xf32>,
    %c0_470 = arith.constant 0 : index
    %c128_471 = arith.constant 128 : index
    %669 = vector.load %arg26[%c0_470, %c128_471] : memref<24x512xf32, #tpu.memory_space<vmem>>, vector<24x256xf32>
    %c96_472 = arith.constant 96 : index
    %c0_473 = arith.constant 0 : index
    %670 = vector.load %arg25[%c96_472, %c0_473] : memref<216x256xf32, #tpu.memory_space<vmem>>, vector<24x256xf32>
    tpu.vector_store %arg25[%c96_472, %c0_473], %669 {strides = array<i32>} : memref<216x256xf32, #tpu.memory_space<vmem>>, vector<24x256xf32>,
    %c0_474 = arith.constant 0 : index
    %c129_475 = arith.constant 129 : index
    %671 = vector.load %arg26[%c0_474, %c129_475] : memref<24x512xf32, #tpu.memory_space<vmem>>, vector<24x256xf32>
    %672 = vector.broadcast %661 : vector<1x256xf32> to vector<24x256xf32>
    %673 = arith.mulf %671, %672 : vector<24x256xf32>
    %c120_476 = arith.constant 120 : index
    %c0_477 = arith.constant 0 : index
    %674 = vector.load %arg25[%c120_476, %c0_477] : memref<216x256xf32, #tpu.memory_space<vmem>>, vector<24x256xf32>
    tpu.vector_store %arg25[%c120_476, %c0_477], %673 {strides = array<i32>} : memref<216x256xf32, #tpu.memory_space<vmem>>, vector<24x256xf32>,
    %c0_478 = arith.constant 0 : index
    %c143 = arith.constant 143 : index
    %675 = vector.load %arg26[%c0_478, %c143] : memref<24x512xf32, #tpu.memory_space<vmem>>, vector<24x256xf32>
    %676 = vector.broadcast %641 : vector<1x256xf32> to vector<24x256xf32>
    %677 = arith.mulf %675, %676 : vector<24x256xf32>
    %c144_479 = arith.constant 144 : index
    %c0_480 = arith.constant 0 : index
    %678 = vector.load %arg25[%c144_479, %c0_480] : memref<216x256xf32, #tpu.memory_space<vmem>>, vector<24x256xf32>
    tpu.vector_store %arg25[%c144_479, %c0_480], %677 {strides = array<i32>} : memref<216x256xf32, #tpu.memory_space<vmem>>, vector<24x256xf32>,
    %c0_481 = arith.constant 0 : index
    %c144_482 = arith.constant 144 : index
    %679 = vector.load %arg26[%c0_481, %c144_482] : memref<24x512xf32, #tpu.memory_space<vmem>>, vector<24x256xf32>
    %c168 = arith.constant 168 : index
    %c0_483 = arith.constant 0 : index
    %680 = vector.load %arg25[%c168, %c0_483] : memref<216x256xf32, #tpu.memory_space<vmem>>, vector<24x256xf32>
    tpu.vector_store %arg25[%c168, %c0_483], %679 {strides = array<i32>} : memref<216x256xf32, #tpu.memory_space<vmem>>, vector<24x256xf32>,
    %c0_484 = arith.constant 0 : index
    %c145 = arith.constant 145 : index
    %681 = vector.load %arg26[%c0_484, %c145] : memref<24x512xf32, #tpu.memory_space<vmem>>, vector<24x256xf32>
    %682 = vector.broadcast %661 : vector<1x256xf32> to vector<24x256xf32>
    %683 = arith.mulf %681, %682 : vector<24x256xf32>
    %c192_485 = arith.constant 192 : index
    %c0_486 = arith.constant 0 : index
    %684 = vector.load %arg25[%c192_485, %c0_486] : memref<216x256xf32, #tpu.memory_space<vmem>>, vector<24x256xf32>
    tpu.vector_store %arg25[%c192_485, %c0_486], %683 {strides = array<i32>} : memref<216x256xf32, #tpu.memory_space<vmem>>, vector<24x256xf32>,
    %c0_487 = arith.constant 0 : index
    %c0_488 = arith.constant 0 : index
    %685 = vector.load %arg25[%c0_487, %c0_488] : memref<216x256xf32, #tpu.memory_space<vmem>>, vector<216x256xf32>
    %c0_489 = arith.constant 0 : index
    %c0_490 = arith.constant 0 : index
    %686 = vector.load %arg16[%c0_489, %c0_490] : memref<32x216xbf16, #tpu.memory_space<vmem>>, vector<32x216xbf16>
    %687 = arith.truncf %685 : vector<216x256xf32> to vector<216x256xbf16>
    %cst_491 = arith.constant dense<0.000000e+00> : vector<32x256xf32>
    %688 = tpu.matmul %686, %687, %cst_491 {dimension_numbers = #tpu.dot_dimension_numbers<[1], [0], [0], [1], [0, 0, 1, 1], [], []>} : vector<32x216xbf16>, vector<216x256xbf16>, vector<32x256xf32> -> vector<32x256xf32>
    %c0_492 = arith.constant 0 : index
    %c0_493 = arith.constant 0 : index
    %689 = vector.load %arg2[%c0_492, %c0_493] : memref<32x1xf32, #tpu.memory_space<vmem>>, vector<32x1xf32>
    %690 = vector.broadcast %689 : vector<32x1xf32> to vector<32x256xf32>
    %691 = arith.addf %688, %690 : vector<32x256xf32>
    %cst_494 = arith.constant 0.000000e+00 : f32
    %692 = vector.broadcast %cst_494 : f32 to vector<32x256xf32>
    %693 = arith.maximumf %691, %692 : vector<32x256xf32>
    %c0_495 = arith.constant 0 : index
    %c0_496 = arith.constant 0 : index
    %c0_497 = arith.constant 0 : index
    %694 = vector.load %arg24[%c0_495, %c0_496, %c0_497] : memref<1x32x256xf32, #tpu.memory_space<vmem>>, vector<1x32x256xf32>
    %695 = vector.shape_cast %694 : vector<1x32x256xf32> to vector<32x256xf32>
    %696 = vector.shape_cast %693 : vector<32x256xf32> to vector<1x32x256xf32>
    tpu.vector_store %arg24[%c0_495, %c0_496, %c0_497], %696 {strides = array<i32>} : memref<1x32x256xf32, #tpu.memory_space<vmem>>, vector<1x32x256xf32>,
    return
  }
  func.func @transform_0(%arg0: i32) -> (i32, i32, i32) {
    %c0_i32 = arith.constant 0 : i32
    %c0_i32_0 = arith.constant 0 : i32
    %c0_i32_1 = arith.constant 0 : i32
    return %arg0, %c0_i32, %c0_i32_0 : i32, i32, i32
  }
  func.func @transform_1(%arg0: i32) -> (i32, i32) {
    %c0_i32 = arith.constant 0 : i32
    %c0_i32_0 = arith.constant 0 : i32
    %c0_i32_1 = arith.constant 0 : i32
    return %c0_i32, %c0_i32_0 : i32, i32
  }
  func.func @transform_2(%arg0: i32) -> (i32, i32) {
    %c0_i32 = arith.constant 0 : i32
    %c0_i32_0 = arith.constant 0 : i32
    %c0_i32_1 = arith.constant 0 : i32
    return %c0_i32, %c0_i32_0 : i32, i32
  }
  func.func @transform_3(%arg0: i32) -> (i32, i32) {
    %c0_i32 = arith.constant 0 : i32
    %c0_i32_0 = arith.constant 0 : i32
    %c0_i32_1 = arith.constant 0 : i32
    return %c0_i32, %c0_i32_0 : i32, i32
  }
  func.func @transform_4(%arg0: i32) -> (i32, i32) {
    %c0_i32 = arith.constant 0 : i32
    %c0_i32_0 = arith.constant 0 : i32
    %c0_i32_1 = arith.constant 0 : i32
    return %c0_i32, %c0_i32_0 : i32, i32
  }
  func.func @transform_5(%arg0: i32) -> (i32, i32) {
    %c0_i32 = arith.constant 0 : i32
    %c0_i32_0 = arith.constant 0 : i32
    %c0_i32_1 = arith.constant 0 : i32
    return %c0_i32, %c0_i32_0 : i32, i32
  }
  func.func @transform_6(%arg0: i32) -> (i32, i32) {
    %c0_i32 = arith.constant 0 : i32
    %c0_i32_0 = arith.constant 0 : i32
    %c0_i32_1 = arith.constant 0 : i32
    return %c0_i32, %c0_i32_0 : i32, i32
  }
  func.func @transform_7(%arg0: i32) -> (i32, i32) {
    %c0_i32 = arith.constant 0 : i32
    %c0_i32_0 = arith.constant 0 : i32
    %c0_i32_1 = arith.constant 0 : i32
    return %c0_i32, %c0_i32_0 : i32, i32
  }
  func.func @transform_8(%arg0: i32) -> (i32, i32) {
    %c0_i32 = arith.constant 0 : i32
    %c0_i32_0 = arith.constant 0 : i32
    %c0_i32_1 = arith.constant 0 : i32
    return %c0_i32, %c0_i32_0 : i32, i32
  }
  func.func @transform_9(%arg0: i32) -> (i32, i32) {
    %c0_i32 = arith.constant 0 : i32
    %c0_i32_0 = arith.constant 0 : i32
    %c0_i32_1 = arith.constant 0 : i32
    return %c0_i32, %c0_i32_0 : i32, i32
  }
  func.func @transform_10(%arg0: i32) -> (i32, i32) {
    %c0_i32 = arith.constant 0 : i32
    %c0_i32_0 = arith.constant 0 : i32
    %c0_i32_1 = arith.constant 0 : i32
    return %c0_i32, %c0_i32_0 : i32, i32
  }
  func.func @transform_11(%arg0: i32) -> (i32, i32) {
    %c0_i32 = arith.constant 0 : i32
    %c0_i32_0 = arith.constant 0 : i32
    %c0_i32_1 = arith.constant 0 : i32
    return %c0_i32, %c0_i32_0 : i32, i32
  }
  func.func @transform_12(%arg0: i32) -> (i32, i32) {
    %c0_i32 = arith.constant 0 : i32
    %c0_i32_0 = arith.constant 0 : i32
    %c0_i32_1 = arith.constant 0 : i32
    return %c0_i32, %c0_i32_0 : i32, i32
  }
  func.func @transform_13(%arg0: i32) -> (i32, i32) {
    %c0_i32 = arith.constant 0 : i32
    %c0_i32_0 = arith.constant 0 : i32
    %c0_i32_1 = arith.constant 0 : i32
    return %c0_i32, %c0_i32_0 : i32, i32
  }
  func.func @transform_14(%arg0: i32) -> (i32, i32) {
    %c0_i32 = arith.constant 0 : i32
    %c0_i32_0 = arith.constant 0 : i32
    %c0_i32_1 = arith.constant 0 : i32
    return %c0_i32, %c0_i32_0 : i32, i32
  }
  func.func @transform_15(%arg0: i32) -> (i32, i32) {
    %c0_i32 = arith.constant 0 : i32
    %c0_i32_0 = arith.constant 0 : i32
    %c0_i32_1 = arith.constant 0 : i32
    return %c0_i32, %c0_i32_0 : i32, i32
  }
  func.func @transform_16(%arg0: i32) -> (i32, i32) {
    %c0_i32 = arith.constant 0 : i32
    %c0_i32_0 = arith.constant 0 : i32
    %c0_i32_1 = arith.constant 0 : i32
    return %c0_i32, %c0_i32_0 : i32, i32
  }
  func.func @transform_17(%arg0: i32) -> (i32, i32) {
    %c0_i32 = arith.constant 0 : i32
    %c0_i32_0 = arith.constant 0 : i32
    %c0_i32_1 = arith.constant 0 : i32
    return %c0_i32, %c0_i32_0 : i32, i32
  }
  func.func @transform_18(%arg0: i32) -> (i32, i32) {
    %c0_i32 = arith.constant 0 : i32
    %c0_i32_0 = arith.constant 0 : i32
    %c0_i32_1 = arith.constant 0 : i32
    return %c0_i32, %c0_i32_0 : i32, i32
  }
  func.func @transform_19(%arg0: i32) -> (i32, i32) {
    %c0_i32 = arith.constant 0 : i32
    %c0_i32_0 = arith.constant 0 : i32
    %c0_i32_1 = arith.constant 0 : i32
    return %c0_i32, %c0_i32_0 : i32, i32
  }
  func.func @transform_20(%arg0: i32) -> (i32, i32) {
    %c0_i32 = arith.constant 0 : i32
    %c0_i32_0 = arith.constant 0 : i32
    %c0_i32_1 = arith.constant 0 : i32
    return %c0_i32, %c0_i32_0 : i32, i32
  }
  func.func @transform_21(%arg0: i32) -> (i32, i32) {
    %c0_i32 = arith.constant 0 : i32
    %c0_i32_0 = arith.constant 0 : i32
    %c0_i32_1 = arith.constant 0 : i32
    return %c0_i32, %c0_i32_0 : i32, i32
  }
  func.func @transform_22(%arg0: i32) -> (i32, i32) {
    %c0_i32 = arith.constant 0 : i32
    %c0_i32_0 = arith.constant 0 : i32
    %c0_i32_1 = arith.constant 0 : i32
    return %c0_i32, %c0_i32_0 : i32, i32
  }
  func.func @transform_23(%arg0: i32) -> (i32, i32, i32) {
    %c0_i32 = arith.constant 0 : i32
    %c0_i32_0 = arith.constant 0 : i32
    %c0_i32_1 = arith.constant 0 : i32
    return %arg0, %c0_i32, %c0_i32_0 : i32, i32, i32
  }
}

</mosaic_0001>

<bundles_post_ra>
// kernel: fsm_forward_pallas.1
= control target key start
LH: loop header
LB: loop body
LE: loop exit
PB: predicated region body
PF: predicated region fallthrough
CT: control target
= control target key end

     0   :  { %s6091_s0 = inlined_call_operand.vmem [shape: bf16[2,4,256], index: 0, kind: input, shape index: {}]   ;;  %s6092_s1 = inlined_call_operand.vmem [shape: f32[32,1], index: 1, kind: input, shape index: {}]   ;;  %s6093_s2 = inlined_call_operand.vmem [shape: f32[4,1], index: 2, kind: input, shape index: {}]   ;;  %s6094_s3 = inlined_call_operand.vmem [shape: f32[4,1], index: 3, kind: input, shape index: {}]   ;;  %s6095_s4 = inlined_call_operand.vmem [shape: f32[4,1], index: 4, kind: input, shape index: {}]   ;;  %s6096_s5 = inlined_call_operand.vmem [shape: f32[16,1], index: 5, kind: input, shape index: {}]   ;;  %s6097_s6 = inlined_call_operand.vmem [shape: f32[16,1], index: 6, kind: input, shape index: {}]   ;;  %s6098_s7 = inlined_call_operand.vmem [shape: f32[16,1], index: 7, kind: input, shape index: {}]   ;;  %s6099_s8 = inlined_call_operand.vmem [shape: f32[20,1], index: 8, kind: input, shape index: {}]   ;;  %s6100_s9 = inlined_call_operand.vmem [shape: bf16[256,64], index: 9, kind: input, shape index: {}]   ;;  %s6101_s10 = inlined_call_operand.vmem [shape: bf16[64,16], index: 10, kind: input, shape index: {}]   ;;  %s6102_s11 = inlined_call_operand.vmem [shape: bf16[16,4], index: 11, kind: input, shape index: {}]   ;;  %s6103_s12 = inlined_call_operand.vmem [shape: bf16[64,256], index: 12, kind: input, shape index: {}]   ;;  %s6104_s13 = inlined_call_operand.vmem [shape: bf16[16,256], index: 13, kind: input, shape index: {}]   ;;  %s6105_s14 = inlined_call_operand.vmem [shape: bf16[4,256], index: 14, kind: input, shape index: {}]   ;;  %s6106_s15 = inlined_call_operand.vmem [shape: bf16[32,216], index: 15, kind: input, shape index: {}]   ;;  %s6107_s16 = inlined_call_operand.vmem [shape: bf16[4,72], index: 16, kind: input, shape index: {}]   ;;  %s6108_s17 = inlined_call_operand.vmem [shape: bf16[4,72], index: 17, kind: input, shape index: {}]   ;;  %s6109_s18 = inlined_call_operand.vmem [shape: bf16[4,72], index: 18, kind: input, shape index: {}]   ;;  %s6110_s19 = inlined_call_operand.vmem [shape: bf16[16,144], index: 19, kind: input, shape index: {}]   ;;  %s6111_s20 = inlined_call_operand.vmem [shape: bf16[16,144], index: 20, kind: input, shape index: {}]   ;;  %s6112_s21 = inlined_call_operand.vmem [shape: bf16[16,144], index: 21, kind: input, shape index: {}]   ;;  %s6113_s22 = inlined_call_operand.vmem [shape: bf16[20,4], index: 22, kind: input, shape index: {}]   ;;  %s6114_s23 = inlined_call_operand.vmem [shape: f32[2,32,256], index: 23, kind: output, shape index: {}]  }
   0x1   :  { %6166 = sst [smem:[#allocation4_spill]] %s6091_s0 }
   0x2   :  { %6167 = sst [smem:[#allocation5_spill]] %s6092_s1 }
   0x3   :  { %6168 = sst [smem:[#allocation6_spill]] %s6093_s2 }
   0x4   :  { %6169 = sst [smem:[#allocation7_spill]] %s6094_s3 }
   0x5   :  { %6170 = sst [smem:[#allocation8_spill]] %s6095_s4  ;;  %s4771_s4 = smov 0  }
   0x6   :  { %6171 = sst [smem:[#allocation9_spill]] %s6096_s5 }
   0x7   :  { %6172 = sst [smem:[#allocation10_spill]] %s6097_s6 }
   0x8   :  { %6173 = sst [smem:[#allocation11_spill]] %s6098_s7 }
   0x9   :  { %6174 = sst [smem:[#allocation12_spill]] %s6099_s8 }
   0xa   :  { %6175 = sst [smem:[#allocation13_spill]] %s6100_s9 }
   0xb   :  { %6176 = sst [smem:[#allocation14_spill]] %s6101_s10 }
   0xc   :  { %6177 = sst [smem:[#allocation15_spill]] %s6107_s16 }
   0xd   :  { %6178 = sst [smem:[#allocation16_spill]] %s6108_s17 }
   0xe LB: > { %s4192_s30 = sadd.s32 4294967295, %s4603_s4   ;;  %p4196_p0 = scmp.ge.s32.totalorder %s4603_s4, 1  ;;  %s4603_s4 = sphi %s4771_s4, %s33_s4  }
   0xf   : > { %p637_p1 = scmp.lt.s32.totalorder %s4603_s4, 3 }
  0x11   : > { %p638_p2 = pnand %p4196_p0, %p637_p1 }
  0x12   : > { %p701_p3 = scmp.lt.s32.totalorder (!%p638_p2), %s4192_s30, 1  ;;  %v839_v0 = vlaneseq (!%p638_p2)  ;;  %v4605_v1 = vmov (!%p638_p2), 0   ;;  %s6179_s8 = sld [smem:[#allocation12_spill]] (!%p638_p2)  ;;  %v4606_v3 = vmov (!%p638_p2), 0.0   ;;  %vm770_vm0 = vcmask (!%p638_p2), 1041408   ;;  %v4542_v10 = vld [vmem:[%s6113_s22] sm:$0xff] (!%p638_p2)  }
  0x13   : > { %641 = sbr.rel (%p638_p2) target bundleno = 3325 (0xcfd), region = 112  ;;  %809 = vmatprep.mubr.bf16.mxu0 (!%p638_p2), %v4605_v1  ;;  %4410 = vset.pattern.permute.xlu0 (!%p638_p2), %v4605_v1  ;;  %712 = vst [vmem:[#allocation3] sm:$0xff] (!%p638_p2), %v4606_v3  ;;  %713 = vst [vmem:[#allocation3 + $0x8] sm:$0xff] (!%p638_p2), %v4606_v3  ;;  %s6180_s2 = sld [smem:[#allocation4_spill]] (!%p638_p2)  ;;  %vm763_vm1 = vcmask (!%p638_p2), 31744   ;;  %vm862_vm6 = vcmask (!%p638_p2), 211968  }
  0x14   : > { %714 = vst [vmem:[#allocation3 + $0x10] sm:$0xff] (!%p638_p2), %v4606_v3  ;;  %717 = vst [vmem:[#allocation3 + $0x28] sm:$0xff] (!%p638_p2), %v4606_v3  ;;  %4441 = vset.pattern.permute.xlu1 (!%p638_p2), %v4605_v1  ;;  %1825 = vmatprep.mubr.bf16.mxu1 (!%p638_p2), %v4605_v1  ;;  %v4794_v4 = vand.u32 (!%p638_p2), 127, %v839_v0  ;;  %v4543_v22 = vld [vmem:[%s6113_s22 + $0x8] ss:$0 sps:$4 sm:$0x33] (!%p638_p2)  }
  0x15   : > { %721 = vst [vmem:[#allocation3 + $0x48] sm:$0xff] (!%p638_p2), %v4606_v3  ;;  %722 = vst [vmem:[#allocation3 + $0x50] sm:$0xff] (!%p638_p2), %v4606_v3  ;;  %s4607_s3 = smov (!%p638_p2), 26   ;;  %s4608_s0 = smov (!%p638_p2), 38   ;;  %vm926_vm7 = vcmask (!%p638_p2), 310272   ;;  %vm957_vm8 = vcmask (!%p638_p2), 998400  }
  0x16   : > { %v841_v5 = vadd.s32 (!%p638_p2), 128, %v4794_v4  ;;  %v4802_v6 = vand.u32 (!%p638_p2), 15, %v4794_v4  ;;  %s6125_s24 = smov (!%p638_p2), 122   ;;  %s6123_s25 = smov (!%p638_p2), 6   ;;  %vm974_vm9 = vcmask (!%p638_p2), 48128   ;;  %vm879_vm10 = vcmask (!%p638_p2), 834560  }
  0x17   : > { %s4612_s1 = smov (!%p638_p2), 102   ;;  %s6143_s26 = smov (!%p638_p2), 32   ;;  %vm943_vm11 = vcmask (!%p638_p2), 736256  }
  0x18   : > { %v730_v2 = vld [vmem:[%s6179_s8 + $0x10] sm:$0xf] (!%p638_p2)  ;;  %v4808_v11 = vand.u32 (!%p638_p2), 15, %v841_v5  ;;  %v844_v12 = vadd.s32 (!%p638_p2), 4294967290, %v4802_v6  ;;  %v908_v13 = vadd.s32 (!%p638_p2), 6, %v4802_v6  ;;  %s6181_s7 = sld [smem:[#allocation6_spill]] (!%p638_p2) }
  0x19   : > { %743 = vperm.xlu0 (!%p638_p2), %4410, %v730_v2   ;;  %s4615_s28 = smov (!%p638_p2), 68   ;;  %s4616_s29 = smov (!%p638_p2), 60  }
  0x1a   : > { %s6219_s30 = smov (!%p701_p3, %s4192_s30), 1  ;;  %v845_v14 = vadd.s32 4294967290, %v4808_v11  ;;  %vm846_vm2 = vcmp.ge.s32.totalorder %v844_v12, 0  ;;  %v909_v15 = vadd.s32 6, %v4808_v11  ;;  %vm912_vm3 = vcmp.lt.s32.totalorder %v908_v13, 16  ;;  %s6182_s16 = sld [smem:[#allocation15_spill]] }
  0x1b   : > { %s4295_s5 = sshll.u32 %s6219_s30, 2  ;;  %v4207_v16 = vsel %vm846_vm2, 1.0, %v4606_v3  ;;  %v4209_v17 = vsel %vm912_vm3, 1.0, %v4606_v3  ;;  %vm898_vm2 = vcmask 785408   ;;  %vm1055_vm3 = vcmask 261120   ;;  %s4624_s27 = smov 30  }
  0x1c   : > { %s705_s6 = scalar_lea.vmem %s6180_s2, %s4295_s5  ;;  %vm847_vm4 = vcmp.ge.s32.totalorder %v845_v14, 0  ;;  %vm913_vm5 = vcmp.lt.s32.totalorder %v909_v15, 16  ;;  %s4611_s5 = smov 90  }
  0x1d   : > { %v4203_v7 = vld.sshfl [vmem:[%s705_s6] sm:$0x33 pattern:$0x76325410]  ;;  %v4208_v18 = vsel %vm847_vm4, 1.0, %v4606_v3  ;;  %v4210_v19 = vsel %vm913_vm5, 1.0, %v4606_v3 }
  0x1e   : > { %v762_v8 = vcombine.high %v4203_v7, %v4203_v7  ;;  %v772_v9 = vsel %vm770_vm0, %v4203_v7, 0  ;;  %v4411_v20 = vpack.i.bf16 %v4208_v18, %v4207_v16  ;;  %v4416_v21 = vpack.i.bf16 %v4210_v19, %v4209_v17  ;;  %s6149_s2 = smov 96   ;;  %s4619_s6 = smov 64  }
  0x1f   : > { %vm1130_vm4 = vcmask 1043456   ;;  %vm1126_vm5 = vcmask 588800   ;;  %s6184_s9 = sld [smem:[#allocation13_spill]]  ;;  %s6185_s17 = sld [smem:[#allocation16_spill]] }
  0x20   : > { %4204 = vmatprep.subr.msk.bf16.mxu0 %vm770_vm0, %v762_v8  ;;  %4412 = vrot.lane.b32.xlu0 %v4411_v20, %s4607_s3  ;;  %s6201_s10 = sld [smem:[#allocation14_spill]] }
  0x21   : > { %778 = vmatpush1.bf16.msra.mxu0 %v772_v9  ;;  %4417 = vrot.lane.b32.xlu1 %v4416_v21, %s4608_s0 }
  0x24   : > { %4205 = vmatmul.mubr.msk.bf16.vlgmr.msra.gmra.mrb[0].mxu0 %vm763_vm1, %v4542_v10  ;;  %4427 = vrot.lane.b32.xlu0 %v4416_v21, %s6123_s25 }
  0x25   : > { %819 = vmatprep.mubr.bf16.mxu0 %v4605_v1  ;;  %4422 = vrot.lane.b32.xlu1 %v4411_v20, %s6125_s24 }
  0x28   : > { %4437 = vrot.lane.b32.xlu0 %v4416_v21, %s4612_s1  ;;  %v1186_v21 = vadd.s32 4294967292, %v4808_v11 }
  0x29   : > { %4432 = vrot.lane.b32.xlu1 %v4411_v20, %s4611_s5  ;;  %v1185_v20 = vadd.s32 4294967292, %v4802_v6 }
  0x2a   : > { %vm1188_vm13 = vcmp.ge.s32.totalorder %v1186_v21, 0 }
  0x2b   : > { %vm1187_vm12 = vcmp.ge.s32.totalorder %v1185_v20, 0 }
  0x2c   : > { %4206 = vmatmul.mubr.msk.bf16.gmra.mrb[4].mxu0 %vm763_vm1, %v4543_v22  ;;  %892 = vrot.lane.b32.xlu0 %v4606_v3, %s6149_s2  ;;  %v1249_v22 = vadd.s32 4, %v4802_v6 }
  0x2d   : > { %1169 = vmatprep.mubr.bf16.mxu0 %v4605_v1  ;;  %1053 = vrot.lane.b32.xlu1 %v4606_v3, %s6143_s26 }
  0x2e   : > { %vm1253_vm14 = vcmp.lt.s32.totalorder %v1249_v22, 16 }
  0x93   : > { %v4836_v23 = vpop.permute.xlu1 %4417 }
  0x94   : > { %v4419_v29 = vunpack.i.l.bf16 %v4836_v23  ;;  %v4420_v54 = vunpack.i.h.bf16 %v4836_v23  ;;  %v1250_v23 = vadd.s32 4, %v4808_v11 }
  0x96   : > { %v931_v34 = vmul.f32 0.0, %v4419_v29  ;;  %v927_v59 = vsel %vm926_vm7, %v4419_v29, %v4420_v54  ;;  %vm1254_vm15 = vcmp.lt.s32.totalorder %v1250_v23, 16 }
  0x97   : > { %v4838_v25 = vpop.permute.xlu1 %4422  ;;  %v4216_v29 = vsel %vm1254_vm15, 1.0, %v4606_v3 }
  0x98   : > { %v744_v24 = vpop.permute.xlu0 %743  ;;  %v4424_v27 = vunpack.i.l.bf16 %v4838_v25  ;;  %v4425_v58 = vunpack.i.h.bf16 %v4838_v25  ;;  %v4213_v25 = vsel %vm1187_vm12, 1.0, %v4606_v3 }
  0x9a   : > { %v962_v30 = vmul.f32 0.0, %v4424_v27  ;;  %v958_v62 = vsel %vm957_vm8, %v4424_v27, %v4425_v58 }
  0x9b   : > { %v4842_v32 = vpop.permute.xlu1 %4432 }
  0x9c   : > { %v4413_v26 = vpop.permute.xlu0 %4412  ;;  %968 = vrot.lane.b32.xlu0 %v962_v30, %s6123_s25  ;;  %v4435_v35 = vunpack.i.h.bf16 %v4842_v32  ;;  %v4434_v57 = vunpack.i.l.bf16 %v4842_v32 }
  0x9d   : > { %v4414_v28 = vunpack.i.l.bf16 %v4413_v26  ;;  %v4415_v51 = vunpack.i.h.bf16 %v4413_v26  ;;  %v4214_v26 = vsel %vm1188_vm13, 1.0, %v4606_v3 }
  0x9e   : > { %v1027_v38 = vmul.f32 0.0, %v4435_v35  ;;  %v1021_v17 = vsel %vm943_vm11, %v4434_v57, %v4435_v35 }
  0x9f   : > { %v867_v31 = vmul.f32 0.0, %v4414_v28  ;;  %v863_v55 = vsel %vm862_vm6, %v4414_v28, %v4415_v51  ;;  %v4215_v28 = vsel %vm1253_vm14, 1.0, %v4606_v3  ;;  %v1054_v32 = vpop.permute.xlu1 %1053 }
  0xa0   : > { %v4428_v33 = vpop.permute.xlu0 %4427  ;;  %v4447_v30 = vpack.i.bf16 %v4216_v29, %v4215_v28 }
  0xa1   : > { %873 = vrot.lane.b32.xlu1 %v867_v31, %s4612_s1  ;;  %v4430_v36 = vunpack.i.h.bf16 %v4428_v33  ;;  %v4429_v2 = vunpack.i.l.bf16 %v4428_v33  ;;  %v4442_v31 = vpack.i.bf16 %v4214_v26, %v4213_v25 }
  0xa3   : > { %v998_v37 = vmul.f32 0.0, %v4430_v36  ;;  %v992_v9 = vsel %vm974_vm9, %v4429_v2, %v4430_v36 }
  0xa4   : > { %v4438_v8 = vpop.permute.xlu0 %4437 }
  0xa5   : > { %937 = vrot.lane.b32.xlu1 %v931_v34, %s4611_s5  ;;  %1006 = vrot.lane.b32.xlu0 %v998_v37, %s6125_s24  ;;  %v4440_v12 = vunpack.i.h.bf16 %v4438_v8  ;;  %v4439_v13 = vunpack.i.l.bf16 %v4438_v8 }
  0xa7   : > { %v1069_v16 = vsel %vm879_vm10, %v4439_v13, %v4440_v12  ;;  %v1075_v27 = vmul.f32 0.0, %v4440_v12 }
  0xa8   : > { %v893_v33 = vpop.permute.xlu0 %892 }
  0xa9   : > { %1035 = vrot.lane.b32.xlu1 %v1027_v38, %s4608_s0 }
  0xf7   : > { %v4852_v39 = vpop.f32.mrb[0].mxu0 }
  0xf8   : > { %v4854_v40 = vpop.f32.mrb[1].mxu0 }
  0xf9   : > { %v4856_v41 = vpop.f32.mrb[2].mxu0 }
  0xfa   : > { %v4858_v42 = vpop.f32.mrb[3].mxu0 }
  0xff   : > { %v821_v43 = vpop.f32.mrb[4].mxu0 }
 0x100   : > { %v4860_v44 = vadd.f32 %v821_v43, %v744_v24  ;;  %v823_v45 = vpop.f32.mrb[5].mxu0 }
 0x101   : > { %v4862_v46 = vadd.f32 %v823_v45, %v744_v24  ;;  %v825_v47 = vpop.f32.mrb[6].mxu0  ;;  %v1120_v24 = vld [vmem:[%s6181_s7] sm:$0xf]  ;;  %s4625_s7 = smov 34  }
 0x102   : > { %v832_v48 = vmax.f32 %v4860_v44, 0.0  ;;  %v826_v49 = vpop.f32.mrb[7].mxu0 }
 0x103   : > { %v833_v50 = vmax.f32 %v4862_v46, 0.0 }
 0x104   : > { %834 = vst [vmem:[#allocation3 + $0x8] sm:$0xf] %v832_v48 }
 0x105   : > { %835 = vst [vmem:[#allocation3 + $0x10] sm:$0xf] %v833_v50 }
 0x10b   : > { %v4870_v52 = vld [vmem:[#allocation3 + $0x8] sm:$0xff] }
 0x10c   : > { %v4872_v53 = vld [vmem:[#allocation3 + $0x10] sm:$0xff]  ;;  %894 = vrot.lane.b32.xlu1 %v4870_v52, %s6149_s2  ;;  %v868_v56 = vmul.f32 %v4870_v52, %v863_v55  ;;  %v932_v60 = vmul.f32 %v4870_v52, %v927_v59  ;;  %v1025_v61 = vmul.f32 %v4434_v57, %v4870_v52  ;;  %v963_v63 = vmul.f32 %v4870_v52, %v958_v62 }
 0x10d   : > { %896 = vrot.lane.b32.xlu0 %v4872_v53, %s6149_s2  ;;  %v869_v0 = vmul.f32 %v4415_v51, %v4872_v53  ;;  %v996_v5 = vmul.f32 %v4429_v2, %v4870_v52  ;;  %v933_v7 = vmul.f32 %v4420_v54, %v4872_v53  ;;  %v997_v10 = vmul.f32 %v992_v9, %v4872_v53  ;;  %s6188_s2 = smov 9  }
 0x10e   : > { %v964_v14 = vmul.f32 %v4425_v58, %v4872_v53  ;;  %v1073_v15 = vmul.f32 %v4439_v13, %v4870_v52  ;;  %v1074_v18 = vmul.f32 %v1069_v16, %v4872_v53  ;;  %v1026_v19 = vmul.f32 %v1021_v17, %v4872_v53  ;;  %v969_v35 = vpop.permute.xlu0 %968 }
 0x110   : > { %875 = vrot.lane.b32.xlu1 %v868_v56, %s4612_s1 }
 0x111   : > { %1051 = vrot.lane.b32.xlu0 %v4872_v53, %s6143_s26 }
 0x113   : > { %v874_v34 = vpop.permute.xlu1 %873 }
 0x114   : > { %939 = vrot.lane.b32.xlu1 %v932_v60, %s4611_s5 }
 0x115   : > { %1031 = vrot.lane.b32.xlu0 %v1025_v61, %s4608_s0 }
 0x117   : > { %v938_v36 = vpop.permute.xlu1 %937  ;;  %v1007_v38 = vpop.permute.xlu0 %1006 }
 0x118   : > { %970 = vrot.lane.b32.xlu1 %v963_v63, %s6123_s25 }
 0x119   : > { %877 = vrot.lane.b32.xlu0 %v869_v0, %s4612_s1  ;;  %s6130_s1 = smov 121  }
 0x11b   : > { %v1036_v37 = vpop.permute.xlu1 %1035 }
 0x11c   : > { %1002 = vrot.lane.b32.xlu1 %v996_v5, %s6125_s24 }
 0x11d   : > { %941 = vrot.lane.b32.xlu0 %v933_v7, %s4611_s5  ;;  %s6119_s5 = smov 124  }
 0x120   : > { %1004 = vrot.lane.b32.xlu1 %v997_v10, %s6125_s24  ;;  %s6133_s24 = smov 110  }
 0x121   : > { %972 = vrot.lane.b32.xlu0 %v964_v14, %s6123_s25  ;;  %s6131_s25 = smov 127  }
 0x124   : > { %1049 = vrot.lane.b32.xlu1 %v4870_v52, %s6143_s26 }
 0x125   : > { %1079 = vrot.lane.b32.xlu0 %v1073_v15, %s4607_s3 }
 0x128   : > { %1081 = vrot.lane.b32.xlu1 %v1074_v18, %s4607_s3 }
 0x129   : > { %1033 = vrot.lane.b32.xlu0 %v1026_v19, %s4608_s0  ;;  %s6121_s0 = smov 4  }
 0x12c   : > { %1123 = vperm.xlu1 %4441, %v1120_v24  }
 0x12d   : > { %1083 = vrot.lane.b32.xlu0 %v1075_v27, %s4607_s3  ;;  %s6129_s3 = smov 119  }
 0x130   : > { %4448 = vrot.lane.b32.xlu1 %v4447_v30, %s4615_s28 }
 0x131   : > { %4443 = vrot.lane.b32.xlu0 %v4442_v31, %s4616_s29 }
 0x134   : > { %4458 = vrot.lane.b32.xlu1 %v4447_v30, %s6121_s0 }
 0x135   : > { %4453 = vrot.lane.b32.xlu0 %v4442_v31, %s6119_s5 }
 0x138   : > { %1233 = vrot.lane.b32.xlu1 %v4606_v3, %s4619_s6 }
 0x17e   : > { %v895_v43 = vpop.permute.xlu1 %894 }
 0x17f   : > { %v897_v45 = vpop.permute.xlu0 %896  ;;  %v899_v60 = vsel %vm898_vm2, %v893_v33, %v895_v43  ;;  %v1109_v33 = vld [vmem:[%s6182_s16] sm:$0x3]  ;;  %s6215_s16 = smov 16  }
 0x180   : > { %v900_v58 = vsel %vm898_vm2, %v895_v43, %v897_v45 }
 0x182   : > { %v876_v47 = vpop.permute.xlu1 %875 }
 0x183   : > { %v1052_v49 = vpop.permute.xlu0 %1051  ;;  %v880_v56 = vsel %vm879_vm10, %v874_v34, %v876_v47 }
 0x184   : > { %v1110_v63 = vpack.c.bf16 %v899_v60, %v880_v56  ;;  %v1057_v21 = vsel %vm1055_vm3, %v1052_v49, %v1054_v32 }
 0x186   : > { %v940_v51 = vpop.permute.xlu1 %939 }
 0x187   : > { %v1032_v54 = vpop.permute.xlu0 %1031  ;;  %v944_v12 = vsel %vm943_vm11, %v938_v36, %v940_v51 }
 0x18a   : > { %v971_v55 = vpop.permute.xlu1 %970 }
 0x18b   : > { %v878_v57 = vpop.permute.xlu0 %877  ;;  %v975_v5 = vsel %vm974_vm9, %v969_v35, %v971_v55 }
 0x18c   : > { %v881_v59 = vsel %vm879_vm10, %v876_v47, %v878_v57  ;;  %v1112_v15 = vpack.c.bf16 %v975_v5, %v944_v12  ;;  %vm1296_vm10 = vcmask 1014784  }
 0x18d   : > { %v1111_v61 = vpack.c.bf16 %v900_v58, %v881_v59 }
 0x18e   : > { %v1003_v62 = vpop.permute.xlu1 %1002 }
 0x18f   : > { %v942_v0 = vpop.permute.xlu0 %941  ;;  %1137 = vmatprep.subr.bf16.mxu0 %v1111_v61 }
 0x190   : > { %1138 = vmatpush1.bf16.msra.mxu0 %v1110_v63  ;;  %v945_v8 = vsel %vm943_vm11, %v940_v51, %v942_v0 }
 0x192   : > { %v1005_v2 = vpop.permute.xlu1 %1004 }
 0x193   : > { %v973_v7 = vpop.permute.xlu0 %972  ;;  %v1009_v9 = vsel %vm957_vm8, %v1005_v2, %v1007_v38  ;;  %v1008_v16 = vsel %vm957_vm8, %v1003_v62, %v1005_v2  ;;  %vm1220_vm8 = vcmask 556032  }
 0x194   : > { %v976_v10 = vsel %vm974_vm9, %v971_v55, %v973_v7  ;;  %v1115_v18 = vpack.c.bf16 %v1009_v9, %v4872_v53  ;;  %v1114_v20 = vpack.c.bf16 %v1008_v16, %v4870_v52 }
 0x195   : > { %v1113_v13 = vpack.c.bf16 %v976_v10, %v945_v8 }
 0x196   : > { %v1050_v14 = vpop.permute.xlu1 %1049 }
 0x197   : > { %v1080_v17 = vpop.permute.xlu0 %1079  ;;  %1139 = vmatprep.subr.bf16.mxu0 %v1113_v13  ;;  %v1056_v23 = vsel %vm1055_vm3, %v1050_v14, %v1052_v49 }
 0x198   : > { %1140 = vmatpush1.bf16.msra.mxu0 %v1112_v15 }
 0x199   : > { %1141 = vmatprep.subr.bf16.mxu0 %v1115_v18 }
 0x19a   : > { %v1082_v19 = vpop.permute.xlu1 %1081 }
 0x19b   : > { %v1034_v22 = vpop.permute.xlu0 %1033  ;;  %v1085_v24 = vsel %vm862_vm6, %v1080_v17, %v1082_v19 }
 0x19c   : > { %v1037_v25 = vsel %vm926_vm7, %v1032_v54, %v1034_v22  ;;  %v1038_v26 = vsel %vm926_vm7, %v1034_v22, %v1036_v37  ;;  %1142 = vmatpush1.bf16.msra.mxu0 %v1114_v20  ;;  %v1118_v29 = vpack.c.bf16 %v1085_v24, %v1085_v24  ;;  %vm1203_vm7 = vcmask 490496  }
 0x19d   : > { %v1117_v27 = vpack.c.bf16 %v1057_v21, %v1038_v26  ;;  %v1116_v53 = vpack.c.bf16 %v1056_v23, %v1037_v25 }
 0x19e   : > { %v1132_v31 = vsel %vm1130_vm4, %v1118_v29, 0 }
 0x19f   : > { %v1084_v28 = vpop.permute.xlu0 %1083  ;;  %1143 = vmatprep.subr.bf16.mxu0 %v1117_v27 }
 0x1a0   : > { %v1086_v30 = vsel %vm862_vm6, %v1082_v19, %v1084_v28  ;;  %1144 = vmatpush1.bf16.msra.mxu0 %v1116_v53  ;;  %vm1239_vm6 = vcmask 523264   ;;  %v728_v53 = vld [vmem:[%s6179_s8] sm:$0xff] }
 0x1a1   : > { %v1119_v52 = vpack.c.bf16 %v1086_v30, %v1086_v30  ;;  %v729_v30 = vld [vmem:[%s6179_s8 + $0x8] sm:$0xff]  ;;  %s6209_s8 = sld [smem:[#allocation10_spill]] }
 0x1a3   : > { %4211 = vmatprep.subr.msk.bf16.mxu0 %vm1130_vm4, %v1119_v52  ;;  %v4444_v32 = vpop.permute.xlu0 %4443  ;;  %v1504_v52 = vadd.s32 4294967294, %v4802_v6 }
 0x1a4   : > { %1146 = vmatpush1.bf16.msra.mxu0 %v1132_v31  ;;  %v4445_v34 = vunpack.i.l.bf16 %v4444_v32  ;;  %v4446_v45 = vunpack.i.h.bf16 %v4444_v32  ;;  %v1505_v31 = vadd.s32 4294967294, %v4808_v11  ;;  %v1567_v32 = vadd.s32 2, %v4802_v6 }
 0x1a5   : > { %vm1506_vm11 = vcmp.ge.s32.totalorder %v1504_v52, 0 }
 0x1a6   : > { %v1208_v35 = vmul.f32 0.0, %v4445_v34  ;;  %v1357_v47 = vmul.f32 0.0, %v4446_v45  ;;  %v1204_v9 = vsel %vm1203_vm7, %v4445_v34, %v4446_v45  ;;  %vm1507_vm12 = vcmp.ge.s32.totalorder %v1505_v31, 0 }
 0x1a7   : > { %4212 = vmatmul.mubr.msk.bf16.vlgmr.msra.gmra.mrb[8].mxu0 %vm1126_vm5, %v1109_v33  ;;  %v4454_v49 = vpop.permute.xlu0 %4453  ;;  %v1568_v33 = vadd.s32 2, %v4808_v11  ;;  %vm1571_vm13 = vcmp.lt.s32.totalorder %v1567_v32, 16 }
 0x1a8   : > { %1214 = vrot.lane.b32.xlu0 %v1208_v35, %s4615_s28  ;;  %1488 = vmatprep.mubr.bf16.mxu0 %v4605_v1  ;;  %v4455_v51 = vunpack.i.l.bf16 %v4454_v49  ;;  %v4456_v12 = vunpack.i.h.bf16 %v4454_v49  ;;  %v4220_v35 = vsel %vm1507_vm12, 1.0, %v4606_v3 }
 0x1a9   : > { %vm1572_vm14 = vcmp.lt.s32.totalorder %v1568_v33, 16 }
 0x1aa   : > { %v1301_v55 = vmul.f32 0.0, %v4455_v51  ;;  %v1297_v16 = vsel %vm1296_vm10, %v4455_v51, %v4456_v12 }
 0x1ab   : > { %v1124_v36 = vpop.permute.xlu1 %1123 }
 0x1ac   : > { %1307 = vrot.lane.b32.xlu1 %v1301_v55, %s6121_s0 }
 0x1af   : > { %v4449_v37 = vpop.permute.xlu1 %4448 }
 0x1b0   : > { %v4450_v38 = vunpack.i.l.bf16 %v4449_v37  ;;  %v4451_v8 = vunpack.i.h.bf16 %v4449_v37  ;;  %v4222_v37 = vsel %vm1572_vm14, 1.0, %v4606_v3  ;;  %vm1633_vm14 = vcmask 15360  }
 0x1b2   : > { %v1271_v43 = vmul.f32 0.0, %v4450_v38  ;;  %v1267_v13 = vsel %vm1220_vm8, %v4450_v38, %v4451_v8  ;;  %v1396_v28 = vmul.f32 0.0, %v4451_v8 }
 0x1b3   : > { %v4459_v54 = vpop.permute.xlu1 %4458 }
 0x1b4   : > { %1277 = vrot.lane.b32.xlu0 %v1271_v43, %s4616_s29  ;;  %v4461_v56 = vunpack.i.h.bf16 %v4459_v54  ;;  %v4460_v19 = vunpack.i.l.bf16 %v4459_v54 }
 0x1b6   : > { %v1336_v57 = vmul.f32 0.0, %v4461_v56  ;;  %v1330_v22 = vsel %vm763_vm1, %v4460_v19, %v4461_v56 }
 0x1b8   : > { %1365 = vrot.lane.b32.xlu0 %v1357_v47, %s4615_s28  ;;  %1344 = vrot.lane.b32.xlu1 %v1336_v57, %s6119_s5 }
 0x1bc   : > { %1383 = vrot.lane.b32.xlu0 %v4606_v3, %s4619_s6 }
 0x27a   : > { %v1171_v58 = vpop.f32.mrb[8].mxu0 }
 0x27b   : > { %v4967_v59 = vadd.f32 %v1171_v58, %v1124_v36  ;;  %v1173_v60 = vpop.f32.mrb[9].mxu0 }
 0x27c   : > { %v4969_v61 = vadd.f32 %v1173_v60, %v1124_v36  ;;  %v1175_v62 = vpop.f32.mrb[10].mxu0  ;;  %v4221_v36 = vsel %vm1571_vm13, 1.0, %v4606_v3  ;;  %v1215_v60 = vpop.permute.xlu0 %1214 }
 0x27d   : > { %v1178_v63 = vmax.f32 %v4967_v59, 0.0  ;;  %v1176_v0 = vpop.f32.mrb[11].mxu0  ;;  %v4467_v43 = vpack.i.bf16 %v4222_v37, %v4221_v36  ;;  %v1234_v62 = vpop.permute.xlu1 %1233 }
 0x27e   : > { %v1179_v2 = vmax.f32 %v4969_v61, 0.0 }
 0x27f   : > { %1180 = vst [vmem:[#allocation3 + $0x8] sm:$0xf] %v1178_v63 }
 0x280   : > { %1181 = vst [vmem:[#allocation3 + $0x10] sm:$0xf] %v1179_v2  ;;  %v1278_v0 = vpop.permute.xlu0 %1277 }
 0x286   : > { %v4977_v5 = vld [vmem:[#allocation3 + $0x8] sm:$0xff] }
 0x287   : > { %1235 = vrot.lane.b32.xlu0 %v4977_v5, %s4619_s6  ;;  %v4981_v7 = vld [vmem:[#allocation3 + $0x10] sm:$0xff]  ;;  %v1209_v10 = vmul.f32 %v4977_v5, %v1204_v9  ;;  %v1272_v14 = vmul.f32 %v1267_v13, %v4977_v5  ;;  %v1355_v15 = vmul.f32 %v4445_v34, %v4977_v5  ;;  %v1302_v17 = vmul.f32 %v1297_v16, %v4977_v5 }
 0x288   : > { %1237 = vrot.lane.b32.xlu1 %v4981_v7, %s4619_s6  ;;  %v1210_v18 = vmul.f32 %v4446_v45, %v4981_v7  ;;  %v1334_v20 = vmul.f32 %v4460_v19, %v4977_v5  ;;  %v1273_v21 = vmul.f32 %v4451_v8, %v4981_v7  ;;  %v1335_v23 = vmul.f32 %v1330_v22, %v4981_v7  ;;  %v1308_v8 = vpop.permute.xlu1 %1307 }
 0x289   : > { %v1303_v24 = vmul.f32 %v4456_v12, %v4981_v7  ;;  %v1394_v25 = vmul.f32 %v4450_v38, %v4977_v5  ;;  %v1395_v26 = vmul.f32 %v1267_v13, %v4981_v7  ;;  %v1356_v27 = vmul.f32 %v4981_v7, %v1204_v9  ;;  %v1366_v9 = vpop.permute.xlu0 %1365 }
 0x28a   : > { %v4219_v34 = vsel %vm1506_vm11, 1.0, %v4606_v3  ;;  %v2022_v45 = vand.u32 7, %v4794_v4 }
 0x28b   : > { %1216 = vrot.lane.b32.xlu0 %v1209_v10, %s4615_s28  ;;  %v4462_v38 = vpack.i.bf16 %v4220_v35, %v4219_v34 }
 0x28c   : > { %1381 = vrot.lane.b32.xlu1 %v4981_v7, %s4619_s6  ;;  %v2023_v47 = vadd.s32 4294967295, %v2022_v45  ;;  %v2095_v49 = vadd.s32 1, %v2022_v45  ;;  %v2047_v55 = vadd.s32 4294967294, %v2022_v45  ;;  %v2119_v56 = vadd.s32 2, %v2022_v45  ;;  %v1345_v12 = vpop.permute.xlu1 %1344 }
 0x28d   : > { %v1384_v10 = vpop.permute.xlu0 %1383 }
 0x28e   : > { %vm2024_vm15 = vcmp.ge.s32.totalorder %v2023_v47, 0  ;;  %vm2097_vm11 = vcmp.lt.s32.totalorder %v2095_v49, 8  ;;  %vm2048_vm12 = vcmp.ge.s32.totalorder %v2047_v55, 0  ;;  %vm2121_vm13 = vcmp.lt.s32.totalorder %v2119_v56, 8 }
 0x28f   : > { %1279 = vrot.lane.b32.xlu0 %v1272_v14, %s4616_s29  ;;  %v4241_v51 = vsel %vm2024_vm15, 1.0, %v4606_v3  ;;  %v4243_v54 = vsel %vm2097_vm11, 1.0, %v4606_v3  ;;  %v4242_v57 = vsel %vm2048_vm12, 1.0, %v4606_v3  ;;  %v4244_v58 = vsel %vm2121_vm13, 1.0, %v4606_v3 }
 0x290   : > { %1361 = vrot.lane.b32.xlu1 %v1355_v15, %s4615_s28  ;;  %vm2015_vm15 = vcmask 1048064   ;;  %vm1602_vm11 = vcmask 244736   ;;  %vm1539_vm12 = vcmask 277504   ;;  %vm2089_vm13 = vcmask 130048  }
 0x293   : > { %1309 = vrot.lane.b32.xlu0 %v1302_v17, %s6121_s0 }
 0x294   : > { %1218 = vrot.lane.b32.xlu1 %v1210_v18, %s4615_s28 }
 0x297   : > { %1340 = vrot.lane.b32.xlu0 %v1334_v20, %s6119_s5 }
 0x298   : > { %1281 = vrot.lane.b32.xlu1 %v1273_v21, %s4616_s29 }
 0x29b   : > { %1342 = vrot.lane.b32.xlu0 %v1335_v23, %s6119_s5  ;;  %s6158_s5 = smov 2  }
 0x29c   : > { %1311 = vrot.lane.b32.xlu1 %v1303_v24, %s6121_s0  ;;  %s6147_s0 = smov 126  }
 0x29f   : > { %1379 = vrot.lane.b32.xlu0 %v4977_v5, %s4619_s6  ;;  %s6183_s6 = sld [smem:[#allocation7_spill]] }
 0x2a0   : > { %1400 = vrot.lane.b32.xlu1 %v1394_v25, %s4616_s29 }
 0x2a3   : > { %1402 = vrot.lane.b32.xlu0 %v1395_v26, %s4616_s29 }
 0x2a4   : > { %1363 = vrot.lane.b32.xlu1 %v1356_v27, %s4615_s28  ;;  %s6127_s28 = smov 94  }
 0x2a5   : > { %v1441_v29 = vld [vmem:[%s6183_s6] sm:$0xf]  ;;  %s6137_s6 = smov 1  }
 0x2a7   : > { %733 = vperm.xlu0 %4410, %v728_v53  }
 0x2a8   : > { %1404 = vrot.lane.b32.xlu1 %v1396_v28, %s4616_s29  ;;  %s4621_s29 = smov 98  }
 0x2ab   : > { %1444 = vperm.xlu0 %4410, %v1441_v29  }
 0x2ac   : > { %738 = vperm.xlu1 %4441, %v729_v30  }
 0x2af   : > { %4468 = vrot.lane.b32.xlu0 %v4467_v43, %s4621_s29 }
 0x2b0   : > { %4463 = vrot.lane.b32.xlu1 %v4462_v38, %s6127_s28  ;;  %s6139_s28 = smov 7  }
 0x2b3   : > { %4478 = vrot.lane.b32.xlu0 %v4467_v43, %s6158_s5 }
 0x2b4   : > { %4473 = vrot.lane.b32.xlu1 %v4462_v38, %s6147_s0 }
 0x2b7   : > { %4488 = vrot.lane.b32.xlu0 %v4467_v43, %s4625_s7 }
 0x2b8   : > { %4483 = vrot.lane.b32.xlu1 %v4462_v38, %s4624_s27 }
 0x2bb   : > { %2102 = vrot.lane.b32.xlu0 %v4243_v54, %s6130_s1  ;;  %s6134_s1 = smov 114  }
 0x2bc   : > { %2030 = vrot.lane.b32.xlu1 %v4241_v51, %s6129_s3  ;;  %s6145_s3 = smov 9  }
 0x2bf   : > { %2179 = vrot.lane.b32.xlu0 %v4243_v54, %s6137_s6  ;;  %s6186_s6 = smov 96  }
 0x2c0   : > { %2143 = vrot.lane.b32.xlu1 %v4241_v51, %s6131_s25  ;;  %s6135_s25 = smov 14  }
 0x2c3   : > { %2054 = vrot.lane.b32.xlu0 %v4242_v57, %s6133_s24  ;;  %s6141_s24 = smov 18  }
 0x2c4   : > { %2199 = vrot.lane.b32.xlu1 %v4241_v51, %s6139_s28  ;;  %s6190_s28 = smov 32  }
 0x2c7   : > { %2126 = vrot.lane.b32.xlu0 %v4244_v58, %s6134_s1  ;;  %s6189_s1 = smov 94  }
 0x2c8   : > { %2231 = vrot.lane.b32.xlu1 %v4243_v54, %s6145_s3  ;;  %s6151_s3 = smov 16  }
 0x2cb   : > { %2189 = vrot.lane.b32.xlu0 %v4244_v58, %s6158_s5 }
 0x2cc   : > { %2160 = vrot.lane.b32.xlu1 %v4242_v57, %s6147_s0  ;;  %s6194_s0 = smov 127  }
 0x2cf   : > { %2241 = vrot.lane.b32.xlu0 %v4244_v58, %s6141_s24  ;;  %s6192_s24 = smov 7  }
 0x2d0   : > { %2209 = vrot.lane.b32.xlu1 %v4242_v57, %s6135_s25  ;;  %s6187_s25 = smov 126  }
 0x2d3   : > { %1552 = vrot.lane.b32.xlu0 %v4606_v3, %s6143_s26  ;;  %s6153_s26 = smov 120  }
 0x2f9   : > { %v1236_v13 = vpop.permute.xlu0 %1235 }
 0x2fa   : > { %v1238_v14 = vpop.permute.xlu1 %1237  ;;  %v1240_v3 = vsel %vm1239_vm6, %v1234_v62, %v1236_v13 }
 0x2fb   : > { %v1241_v22 = vsel %vm1239_vm6, %v1236_v13, %v1238_v14  ;;  %v4547_v13 = vld [vmem:[%s6184_s9 + $0x8] sm:$0xff]   ;;  %v4548_v14 = vld [vmem:[%s6184_s9 + $0x50] sm:$0xff]  }
 0x2fd   : > { %v1217_v15 = vpop.permute.xlu0 %1216 }
 0x2fe   : > { %v1382_v16 = vpop.permute.xlu1 %1381  ;;  %v1221_v20 = vsel %vm1220_vm8, %v1215_v60, %v1217_v15 }
 0x2ff   : > { %v1431_v26 = vpack.c.bf16 %v1240_v3, %v1221_v20  ;;  %v1386_v47 = vsel %vm1239_vm6, %v1382_v16, %v1384_v10  ;;  %v4545_v10 = vld [vmem:[%s6184_s9] sm:$0xff]   ;;  %v4551_v20 = vld [vmem:[%s6184_s9 + $0x18] sm:$0xff]  }
 0x301   : > { %v1280_v17 = vpop.permute.xlu0 %1279 }
 0x302   : > { %v1362_v18 = vpop.permute.xlu1 %1361  ;;  %v1283_v32 = vsel %vm1203_vm7, %v1278_v0, %v1280_v17  ;;  %v4544_v0 = vld [vmem:[%s6184_s9 + $0x40] sm:$0xff]  }
 0x305   : > { %v1310_v19 = vpop.permute.xlu0 %1309 }
 0x306   : > { %v1219_v21 = vpop.permute.xlu1 %1218  ;;  %v1313_v28 = vsel %vm763_vm1, %v1308_v8, %v1310_v19 }
 0x307   : > { %v1222_v23 = vsel %vm1220_vm8, %v1217_v15, %v1219_v21  ;;  %v1433_v35 = vpack.c.bf16 %v1313_v28, %v1283_v32  ;;  %v4559_v32 = vld [vmem:[%s6184_s9 + $0x38] sm:$0xff]  }
 0x308   : > { %v1432_v24 = vpack.c.bf16 %v1241_v22, %v1222_v23  ;;  %v4552_v22 = vld [vmem:[%s6184_s9 + $0x60] sm:$0xff]  }
 0x309   : > { %v1341_v25 = vpop.permute.xlu0 %1340 }
 0x30a   : > { %v1282_v27 = vpop.permute.xlu1 %1281  ;;  %1456 = vmatprep.subr.bf16.mxu0 %v1432_v24  ;;  %v4554_v24 = vld [vmem:[%s6184_s9 + $0x68] sm:$0xff]  }
 0x30b   : > { %1457 = vmatpush1.bf16.msra.mxu0 %v1431_v26  ;;  %v1284_v30 = vsel %vm1203_vm7, %v1280_v17, %v1282_v27  ;;  %v4550_v17 = vld [vmem:[%s6184_s9 + $0x58] sm:$0xff]   ;;  %v4556_v26 = vld [vmem:[%s6184_s9 + $0x70] sm:$0xff]  }
 0x30d   : > { %v1343_v53 = vpop.permute.xlu0 %1342 }
 0x30e   : > { %v1312_v29 = vpop.permute.xlu1 %1311  ;;  %v1347_v52 = vsel %vm1296_vm10, %v1343_v53, %v1345_v12  ;;  %v1346_v36 = vsel %vm1296_vm10, %v1341_v25, %v1343_v53  ;;  %v4546_v12 = vld [vmem:[%s6184_s9 + $0x48] sm:$0xff]   ;;  %v4557_v53 = vld [vmem:[%s6184_s9 + $0x30] sm:$0xff]   ;;  %vm1616_vm10 = vcmask 1031168  }
 0x30f   : > { %v1314_v31 = vsel %vm763_vm1, %v1310_v19, %v1312_v29  ;;  %v1436_v38 = vpack.c.bf16 %v1347_v52, %v4981_v7  ;;  %v1435_v45 = vpack.c.bf16 %v1346_v36, %v4977_v5  ;;  %v4555_v25 = vld [vmem:[%s6184_s9 + $0x28] sm:$0xff]   ;;  %v4558_v29 = vld [vmem:[%s6184_s9 + $0x78] sm:$0xff]  }
 0x310   : > { %v1434_v33 = vpack.c.bf16 %v1314_v31, %v1284_v30 }
 0x311   : > { %v1380_v34 = vpop.permute.xlu0 %1379 }
 0x312   : > { %v1401_v37 = vpop.permute.xlu1 %1400  ;;  %1458 = vmatprep.subr.bf16.mxu0 %v1434_v33  ;;  %v1385_v51 = vsel %vm1239_vm6, %v1380_v34, %v1382_v16  ;;  %v4549_v16 = vld [vmem:[%s6184_s9 + $0x10] sm:$0xff]  }
 0x313   : > { %1459 = vmatpush1.bf16.msra.mxu0 %v1433_v35  ;;  %v5157_v35 = vld [vmem:[#allocation3] sm:$0xff] }
 0x314   : > { %1460 = vmatprep.subr.bf16.mxu0 %v1436_v38 }
 0x315   : > { %v1403_v43 = vpop.permute.xlu0 %1402 }
 0x316   : > { %v1364_v49 = vpop.permute.xlu1 %1363  ;;  %v1406_v54 = vsel %vm1203_vm7, %v1401_v37, %v1403_v43 }
 0x317   : > { %v1367_v55 = vsel %vm1220_vm8, %v1362_v18, %v1364_v49  ;;  %v1368_v56 = vsel %vm1220_vm8, %v1364_v49, %v1366_v9  ;;  %1461 = vmatpush1.bf16.msra.mxu0 %v1435_v45  ;;  %v1439_v60 = vpack.c.bf16 %v1406_v54, %v1406_v54  ;;  %v1430_v9 = vld [vmem:[%s6185_s17] sm:$0x3]  ;;  %vm1585_vm8 = vcmask 801792  }
 0x318   : > { %v1438_v57 = vpack.c.bf16 %v1386_v47, %v1368_v56  ;;  %v1437_v58 = vpack.c.bf16 %v1385_v51, %v1367_v55 }
 0x319   : > { %v1451_v8 = vsel %vm1130_vm4, %v1439_v60, 0 }
 0x31a   : > { %v1405_v7 = vpop.permute.xlu1 %1404  ;;  %1462 = vmatprep.subr.bf16.mxu0 %v1438_v57 }
 0x31b   : > { %v1407_v62 = vsel %vm1203_vm7, %v1403_v43, %v1405_v7  ;;  %1463 = vmatpush1.bf16.msra.mxu0 %v1437_v58  ;;  %vm1522_vm7 = vcmask 769024  }
 0x31c   : > { %v1440_v5 = vpack.c.bf16 %v1407_v62, %v1407_v62 }
 0x31e   : > { %4217 = vmatprep.subr.msk.bf16.mxu0 %vm1130_vm4, %v1440_v5 }
 0x31f   : > { %1465 = vmatpush1.bf16.msra.mxu0 %v1451_v8 }
 0x320   : > { %4297 = vmatprep.subr.bf16.mxu0 %v4544_v0 }
 0x322   : > { %4218 = vmatmul.mubr.msk.bf16.vlgmr.msra.gmra.mrb[12].mxu0 %vm1126_vm5, %v1430_v9 }
 0x323   : > { %4298 = vmatpush3.bf16.msra.mxu0 %v4545_v10 }
 0x324   : > { %4299 = vmatprep.subr.bf16.mxu0 %v4546_v12 }
 0x326   : > { %v734_v15 = vpop.permute.xlu0 %733 }
 0x327   : > { %4300 = vmatpush3.bf16.msra.mxu0 %v4547_v13  ;;  %v5106_v18 = vadd.f32 %v4854_v40, %v734_v15  ;;  %v4553_v40 = vld [vmem:[%s6184_s9 + $0x20] sm:$0xff]   ;;  %v5145_v30 = vadd.f32 %v4852_v39, %v734_v15  ;;  %v1836_v13 = vadd.f32 %v1178_v63, %v832_v48  ;;  %s6210_s9 = smov 118  }
 0x328   : > { %4301 = vmatprep.subr.bf16.mxu0 %v4548_v14 }
 0x329   : > { %v829_v23 = vmax.f32 %v5106_v18, 0.0  ;;  %v828_v36 = vmax.f32 %v5145_v30, 0.0 }
 0x32a   : > { %v1445_v27 = vpop.permute.xlu0 %1444 }
 0x32b   : > { %v739_v19 = vpop.permute.xlu1 %738  ;;  %4302 = vmatpush3.bf16.msra.mxu0 %v4549_v16  ;;  %v1837_v16 = vadd.f32 %v1179_v2, %v833_v50 }
 0x32c   : > { %v5112_v21 = vadd.f32 %v4858_v42, %v739_v19  ;;  %4303 = vmatprep.subr.bf16.mxu0 %v4550_v17  ;;  %v5139_v28 = vadd.f32 %v4856_v41, %v739_v19 }
 0x32e   : > { %v831_v3 = vmax.f32 %v5112_v21, 0.0  ;;  %v5149_v31 = vpop.permute.xlu0 %4468  ;;  %v830_v34 = vmax.f32 %v5139_v28, 0.0 }
 0x32f   : > { %4304 = vmatpush3.bf16.msra.mxu0 %v4551_v20  ;;  %v5147_v52 = vpop.permute.xlu1 %4463  ;;  %v4470_v33 = vunpack.i.l.bf16 %v5149_v31  ;;  %v4471_v48 = vunpack.i.h.bf16 %v5149_v31 }
 0x330   : > { %v1875_v42 = vpack.c.bf16 %v831_v3, %v829_v23  ;;  %4305 = vmatprep.subr.bf16.mxu0 %v4552_v22  ;;  %v4465_v41 = vunpack.i.l.bf16 %v5147_v52  ;;  %v1874_v38 = vpack.c.bf16 %v830_v34, %v828_v36  ;;  %v4466_v46 = vunpack.i.h.bf16 %v5147_v52 }
 0x331   : > { %v1590_v37 = vmul.f32 %v5157_v35, %v4470_v33 }
 0x332   : > { %2004 = vmatprep.mubr.bf16.mxu0 %v1875_v42  ;;  %v1527_v39 = vmul.f32 %v5157_v35, %v4465_v41  ;;  %v5181_v55 = vpop.permute.xlu0 %4478  ;;  %v1523_v59 = vsel %vm1522_vm7, %v4465_v41, %v4466_v46  ;;  %v1586_v42 = vsel %vm1585_vm8, %v4470_v33, %v4471_v48 }
 0x333   : > { %4306 = vmatpush3.bf16.msra.mxu0 %v4553_v40  ;;  %v5171_v43 = vpop.permute.xlu1 %4473  ;;  %v4481_v56 = vunpack.i.h.bf16 %v5181_v55  ;;  %v4480_v52 = vunpack.i.l.bf16 %v5181_v55 }
 0x334   : > { %4307 = vmatprep.subr.bf16.mxu0 %v4554_v24  ;;  %1533 = vrot.lane.b32.xlu1 %v1527_v39, %s4625_s7  ;;  %v4475_v49 = vunpack.i.l.bf16 %v5171_v43  ;;  %v4476_v2 = vunpack.i.h.bf16 %v5171_v43 }
 0x335   : > { %v1657_v57 = vmul.f32 %v5157_v35, %v4481_v56 }
 0x336   : > { %v1621_v54 = vmul.f32 %v5157_v35, %v4475_v49  ;;  %v5189_v58 = vpop.permute.xlu0 %4488 }
 0x337   : > { %4308 = vmatpush3.bf16.msra.mxu0 %v4555_v25  ;;  %v5173_v45 = vpop.permute.xlu1 %4483  ;;  %v4491_v7 = vunpack.i.h.bf16 %v5189_v58  ;;  %v4490_v40 = vunpack.i.l.bf16 %v5189_v58 }
 0x338   : > { %4309 = vmatprep.subr.bf16.mxu0 %v4556_v26  ;;  %1596 = vrot.lane.b32.xlu1 %v1590_v37, %s4624_s27  ;;  %v4486_v47 = vunpack.i.h.bf16 %v5173_v45  ;;  %v4485_v50 = vunpack.i.l.bf16 %v5173_v45  ;;  %v1617_v26 = vsel %vm1616_vm10, %v4475_v49, %v4476_v2  ;;  %v1651_v37 = vsel %vm1633_vm14, %v4480_v52, %v4481_v56 }
 0x339   : > { %1627 = vrot.lane.b32.xlu0 %v1621_v54, %s6158_s5  ;;  %v1733_v5 = vmul.f32 %v5157_v35, %v4491_v7 }
 0x33a   : > { %v1686_v51 = vmul.f32 %v5157_v35, %v4486_v47  ;;  %v1680_v55 = vsel %vm1602_vm11, %v4485_v50, %v4486_v47 }
 0x33b   : > { %4310 = vmatpush3.bf16.msra.mxu0 %v4557_v53  ;;  %v5194_v60 = vpop.permute.xlu1 %2030  ;;  %v2103_v53 = vpop.permute.xlu0 %2102 }
 0x33c   : > { %4311 = vmatprep.subr.bf16.mxu0 %v4558_v29  ;;  %1694 = vrot.lane.b32.xlu1 %v1686_v51, %s4621_s29  ;;  %v2033_v62 = vmul.f32 %v5157_v35, %v5194_v60  ;;  %v2105_v58 = vmul.f32 %v5157_v35, %v2103_v53 }
 0x33d   : > { %1665 = vrot.lane.b32.xlu0 %v1657_v57, %s6187_s25 }
 0x33f   : > { %4312 = vmatpush3.bf16.msra.mxu0 %v4559_v32  ;;  %v2180_v39 = vpop.permute.xlu0 %2179 }
 0x340   : > { %4326 = vmatprep.subr.bf16.mxu0 %v5157_v35  ;;  %1712 = vrot.lane.b32.xlu1 %v5157_v35, %s6186_s6 }
 0x341   : > { %1741 = vrot.lane.b32.xlu0 %v1733_v5, %s6189_s1  ;;  %v1727_v5 = vsel %vm1539_vm12, %v4490_v40, %v4491_v7 }
 0x342   : > { %2005 = vmatmul.mubr.bf16.vlgmr.msra.gmra.mrb[16].mxu0 %v1874_v38 }
 0x343   : > { %v2055_v56 = vpop.permute.xlu0 %2054 }
 0x344   : > { %2037 = vrot.lane.b32.xlu1 %v2033_v62, %s6188_s2  ;;  %v2057_v45 = vmul.f32 %v5157_v35, %v2055_v56 }
 0x3f5   : > { %v1490_v0 = vpop.f32.mrb[12].mxu0 }
 0x3f6   : > { %v1491_v8 = vadd.f32 %v1490_v0, %v1445_v27  ;;  %v1492_v9 = vpop.f32.mrb[13].mxu0 }
 0x3f7   : > { %v1493_v10 = vadd.f32 %v1492_v9, %v1445_v27  ;;  %v1494_v12 = vpop.f32.mrb[14].mxu0  ;;  %v2144_v9 = vpop.permute.xlu1 %2143 }
 0x3f8   : > { %v1497_v14 = vmax.f32 %v1491_v8, 0.0  ;;  %v1495_v15 = vpop.f32.mrb[15].mxu0  ;;  %v2146_v7 = vmul.f32 %v5157_v35, %v2144_v9 }
 0x3f9   : > { %v1498_v17 = vmax.f32 %v1493_v10, 0.0 }
 0x3fa   : > { %1499 = vst [vmem:[#allocation3 + $0x8] sm:$0xf] %v1497_v14  ;;  %v5212_v19 = vadd.f32 %v1836_v13, %v1497_v14 }
 0x3fb   : > { %v5214_v20 = vadd.f32 %v1837_v16, %v1498_v17  ;;  %1500 = vst [vmem:[#allocation3 + $0x10] sm:$0xf] %v1498_v17  ;;  %v2200_v13 = vpop.permute.xlu1 %2199 }
 0x3ff   : > { %v2232_v16 = vpop.permute.xlu1 %2231 }
 0x401   : > { %v5216_v22 = vld [vmem:[#allocation3 + $0x8] sm:$0xff] }
 0x402   : > { %1642 = vst [vmem:[#allocation2 + $0x40] sm:$0xff] %v5216_v22  ;;  %1554 = vrot.lane.b32.xlu1 %v5216_v22, %s6190_s28  ;;  %v5221_v44 = vld [vmem:[#allocation3 + $0x10] sm:$0xff]  ;;  %v1528_v61 = vmul.f32 %v5216_v22, %v1523_v59  ;;  %v1684_v63 = vmul.f32 %v4485_v50, %v5216_v22  ;;  %v1591_v24 = vmul.f32 %v5216_v22, %v1586_v42 }
 0x403   : > { %1556 = vrot.lane.b32.xlu0 %v5221_v44, %s6190_s28  ;;  %2017 = vst.msk [vmem:[#allocation3 + $0x10] sm:$0xff] %vm1239_vm6, %v5157_v35  ;;  %v1731_v25 = vmul.f32 %v4490_v40, %v5216_v22  ;;  %v1622_v27 = vmul.f32 %v5216_v22, %v1617_v26  ;;  %v1529_v29 = vmul.f32 %v4466_v46, %v5221_v44  ;;  %v2127_v46 = vpop.permute.xlu0 %2126  ;;  %v2161_v59 = vpop.permute.xlu1 %2160  ;;  %s6154_s28 = smov 112  }
 0x404   : > { %v1655_v31 = vmul.f32 %v4480_v52, %v5216_v22  ;;  %v1592_v41 = vmul.f32 %v4471_v48, %v5221_v44  ;;  %v1656_v51 = vmul.f32 %v1651_v37, %v5221_v44  ;;  %v1623_v57 = vmul.f32 %v4476_v2, %v5221_v44  ;;  %2427 = vst.msk [vmem:[#allocation3 + $0x10] sm:$0xff] %vm2089_vm13, %v5157_v35 }
 0x405   : > { %v1685_v62 = vmul.f32 %v1680_v55, %v5221_v44  ;;  %v1732_v47 = vmul.f32 %v1727_v5, %v5221_v44  ;;  %2809 = vst.msk [vmem:[#allocation3 + $0x10] sm:$0xff] %vm763_vm1, %v5157_v35  ;;  %v2129_v50 = vmul.f32 %v5157_v35, %v2127_v46 }
 0x406   : > { %1708 = vrot.lane.b32.xlu1 %v5216_v22, %s6186_s6 }
 0x407   : > { %1710 = vrot.lane.b32.xlu0 %v5221_v44, %s6186_s6  ;;  %s6195_s6 = smov 121   ;;  %v2190_v2 = vpop.permute.xlu0 %2189 }
 0x40a   : > { %1535 = vrot.lane.b32.xlu1 %v1528_v61, %s4625_s7  ;;  %v2163_v61 = vmul.f32 %v5157_v35, %v2161_v59 }
 0x40b   : > { %1690 = vrot.lane.b32.xlu0 %v1684_v63, %s4621_s29  ;;  %v2242_v26 = vpop.permute.xlu0 %2241 }
 0x40e   : > { %1598 = vrot.lane.b32.xlu1 %v1591_v24, %s4624_s27  ;;  %v2210_v24 = vpop.permute.xlu1 %2209 }
 0x40f   : > { %1737 = vrot.lane.b32.xlu0 %v1731_v25, %s6189_s1 }
 0x412   : > { %1629 = vrot.lane.b32.xlu1 %v1622_v27, %s6158_s5  ;;  %v1534_v52 = vpop.permute.xlu1 %1533 }
 0x413   : > { %1537 = vrot.lane.b32.xlu0 %v1529_v29, %s4625_s7  ;;  %s6191_s7 = smov 18  }
 0x415   : > { %v4313_v32 = vpop.f32.mrb[16].mxu0 }
 0x416   : > { %v4314_v33 = vpop.f32.mrb[17].mxu0  ;;  %1661 = vrot.lane.b32.xlu1 %v1655_v31, %s6187_s25  ;;  %v1597_v31 = vpop.permute.xlu1 %1596 }
 0x417   : > { %v4315_v38 = vadd.f32 %v4314_v33, %v4313_v32  ;;  %v4316_v43 = vpop.f32.mrb[18].mxu0  ;;  %1600 = vrot.lane.b32.xlu0 %v1592_v41, %s4624_s27  ;;  %s4636_s27 = smov 8   ;;  %v1553_v32 = vpop.permute.xlu0 %1552 }
 0x418   : > { %v4317_v49 = vpop.f32.mrb[19].mxu0 }
 0x419   : > { %2013 = vst.msk [vmem:[#allocation3 + $0x8] sm:$0xff] %vm1239_vm6, %v4315_v38  ;;  %v4318_v54 = vadd.f32 %v4317_v49, %v4316_v43 }
 0x41a   : > { %2016 = vst.msk [vmem:[#allocation3 + $0x8] sm:$0xff] %vm2015_vm15, %v5157_v35  ;;  %1663 = vrot.lane.b32.xlu1 %v1656_v51, %s6187_s25  ;;  %v1695_v41 = vpop.permute.xlu1 %1694 }
 0x41b   : > { %2014 = vst.msk [vmem:[#allocation3 + $0x28] sm:$0xff] %vm1239_vm6, %v4318_v54  ;;  %1631 = vrot.lane.b32.xlu0 %v1623_v57, %s6158_s5  ;;  %v1628_v33 = vpop.permute.xlu0 %1627 }
 0x41c   : > { %2018 = vst.msk [vmem:[#allocation3 + $0x28] sm:$0xff] %vm2015_vm15, %v5157_v35  ;;  %vm4640_vm15 = vmmov 0  }
 0x41d   : > { %4334 = vmatprep.mubr.msk.bf16.mxu0 %vm4640_vm15, %v5157_v35 }
 0x41e   : > { %2073 = vrot.lane.b32.xlu1 %v5157_v35, %s4636_s27 }
 0x41f   : > { %1692 = vrot.lane.b32.xlu0 %v1685_v62, %s4621_s29  ;;  %s6193_s29 = smov 1   ;;  %v1666_v37 = vpop.permute.xlu0 %1665 }
 0x421   : > { %v2094_v0 = vld [vmem:[#allocation3 + $0x8] sm:$0xff] }
 0x422   : > { %1739 = vrot.lane.b32.xlu1 %v1732_v47, %s6189_s1  ;;  %2175 = vst.msk [vmem:[#allocation2 + $0x40] sm:$0xff] %vm1239_vm6, %v2094_v0  ;;  %v2034_v10 = vmul.f32 %v2094_v0, %v5194_v60  ;;  %v2106_v12 = vmul.f32 %v2103_v53, %v2094_v0  ;;  %v2182_v14 = vmul.f32 %v2180_v39, %v2094_v0  ;;  %s6197_s1 = smov 14   ;;  %v1713_v39 = vpop.permute.xlu1 %1712 }
 0x423   : > { %v2176_v8 = vld [vmem:[#allocation3 + $0x28] sm:$0xff]  ;;  %2061 = vrot.lane.b32.xlu0 %v2057_v45, %s6191_s7  ;;  %v2147_v60 = vmul.f32 %v2144_v9, %v2094_v0  ;;  %v2202_v15 = vmul.f32 %v2200_v13, %v2094_v0  ;;  %v2234_v17 = vmul.f32 %v2232_v16, %v2094_v0  ;;  %v1742_v43 = vpop.permute.xlu0 %1741 }
 0x424   : > { %2177 = vst.msk [vmem:[#allocation2 + $0xd0] sm:$0xff] %vm1239_vm6, %v2176_v8  ;;  %v2058_v48 = vmul.f32 %v2176_v8, %v2055_v56  ;;  %v2130_v63 = vmul.f32 %v2176_v8, %v2127_v46  ;;  %v2192_v40 = vmul.f32 %v2190_v2, %v2176_v8  ;;  %v2164_v42 = vmul.f32 %v2176_v8, %v2161_v59 }
 0x425   : > { %v2212_v25 = vmul.f32 %v2210_v24, %v2176_v8  ;;  %v2244_v27 = vmul.f32 %v2242_v26, %v2176_v8 }
 0x426   : > { %2109 = vrot.lane.b32.xlu1 %v2105_v58, %s6192_s24  ;;  %v5322_v38 = vpop.permute.xlu1 %2037 }
 0x427   : > { %2075 = vrot.lane.b32.xlu0 %v2094_v0, %s4636_s27 }
 0x42a   : > { %2150 = vrot.lane.b32.xlu1 %v2146_v7, %s6193_s29 }
 0x42b   : > { %2039 = vrot.lane.b32.xlu0 %v2034_v10, %s6188_s2  ;;  %s6196_s2 = smov 119  }
 0x42e   : > { %2220 = vrot.lane.b32.xlu1 %v2094_v0, %s6153_s26  ;;  %s6203_s26 = smov 6  }
 0x42f   : > { %2111 = vrot.lane.b32.xlu0 %v2106_v12, %s6192_s24  ;;  %s6160_s24 = smov 3  }
 0x432   : > { %2184 = vrot.lane.b32.xlu1 %v2182_v14, %s6194_s0 }
 0x433   : > { %2152 = vrot.lane.b32.xlu0 %v2147_v60, %s6193_s29 }
 0x436   : > { %2085 = vrot.lane.b32.xlu1 %v5157_v35, %s6151_s3 }
 0x437   : > { %2204 = vrot.lane.b32.xlu0 %v2202_v15, %s6195_s6  ;;  %s6202_s6 = smov 122  }
 0x43a   : > { %2063 = vrot.lane.b32.xlu1 %v2058_v48, %s6191_s7  ;;  %s6198_s7 = smov 114  }
 0x43b   : > { %2236 = vrot.lane.b32.xlu0 %v2234_v17, %s6196_s2  ;;  %s6199_s2 = sld [smem:[#allocation9_spill]] }
 0x43e   : > { %2133 = vrot.lane.b32.xlu1 %v2129_v50, %s6197_s1 }
 0x43f   : > { %2087 = vrot.lane.b32.xlu0 %v2176_v8, %s6151_s3  ;;  %s6200_s3 = smov 110  }
 0x441   : > { %v2279_v53 = vld [vmem:[%s6199_s2] sm:$0xff]  ;;  %v2280_v29 = vld [vmem:[%s6199_s2 + $0x8] sm:$0xff]  ;;  %s6216_s2 = smov 112  }
 0x442   : > { %2167 = vrot.lane.b32.xlu1 %v2163_v61, %s6158_s5 }
 0x443   : > { %2135 = vrot.lane.b32.xlu0 %v2130_v63, %s6197_s1  ;;  %s4645_s1 = smov 5  }
 0x446   : > { %2194 = vrot.lane.b32.xlu1 %v2192_v40, %s6187_s25 }
 0x447   : > { %2169 = vrot.lane.b32.xlu0 %v2164_v42, %s6158_s5 }
 0x44a   : > { %2226 = vrot.lane.b32.xlu1 %v2176_v8, %s6154_s28  ;;  %s6156_s28 = smov 123  }
 0x44b   : > { %2214 = vrot.lane.b32.xlu0 %v2212_v25, %s6198_s7  ;;  %s6157_s7 = smov 118  }
 0x44e   : > { %2283 = vperm.xlu1 %4441, %v2279_v53  }
 0x44f   : > { %2246 = vrot.lane.b32.xlu0 %v2244_v27, %s6200_s3  ;;  %s6163_s3 = smov 125  }
 0x453   : > { %2288 = vperm.xlu0 %4410, %v2280_v29  }
 0x474   : > { %v1555_v49 = vpop.permute.xlu1 %1554 }
 0x475   : > { %v1558_v51 = vsel %vm1055_vm3, %v1553_v32, %v1555_v49  ;;  %v1557_v54 = vpop.permute.xlu0 %1556 }
 0x476   : > { %1562 = vst [vmem:[#allocation2 + $0x10] sm:$0xff] %v1558_v51  ;;  %v1559_v10 = vsel %vm1055_vm3, %v1555_v49, %v1557_v54  ;;  %vm2077_vm3 = vcmask 64512  }
 0x478   : > { %v1709_v57 = vpop.permute.xlu1 %1708 }
 0x479   : > { %v1711_v55 = vpop.permute.xlu0 %1710 }
 0x47a   : > { %v1714_v56 = vsel %vm898_vm2, %v1709_v57, %v1711_v55  ;;  %v1715_v26 = vsel %vm898_vm2, %v1711_v55, %v1713_v39  ;;  %vm2041_vm2 = vcmask 72704   ;;  %v1767_v57 = vld [vmem:[%s6109_s18] sm:$0x3]  ;;  %v4560_v55 = vld [vmem:[%s6110_s19 + $0x4] ss:$8 sps:$4 sm:$0xff]  }
 0x47b   : > { %1718 = vst [vmem:[#allocation2 + $0x70] sm:$0xff] %v1714_v56 }
 0x47c   : > { %v1536_v62 = vpop.permute.xlu1 %1535 }
 0x47d   : > { %v1540_v5 = vsel %vm1539_vm12, %v1534_v52, %v1536_v62  ;;  %v1691_v45 = vpop.permute.xlu0 %1690 }
 0x47e   : > { %1544 = vst [vmem:[#allocation2] sm:$0xff] %v1540_v5  ;;  %v1768_v60 = vpack.c.bf16 %v1558_v51, %v1540_v5 }
 0x480   : > { %v1599_v47 = vpop.permute.xlu1 %1598 }
 0x481   : > { %v1603_v0 = vsel %vm1602_vm11, %v1597_v31, %v1599_v47  ;;  %v1738_v8 = vpop.permute.xlu0 %1737 }
 0x482   : > { %1607 = vst [vmem:[#allocation2 + $0x20] sm:$0xff] %v1603_v0 }
 0x484   : > { %v1630_v9 = vpop.permute.xlu1 %1629 }
 0x485   : > { %v1634_v58 = vsel %vm1633_vm14, %v1628_v33, %v1630_v9  ;;  %v1538_v7 = vpop.permute.xlu0 %1537 }
 0x486   : > { %1638 = vst [vmem:[#allocation2 + $0x30] sm:$0xff] %v1634_v58  ;;  %v1541_v12 = vsel %vm1539_vm12, %v1536_v62, %v1538_v7  ;;  %v1770_v2 = vpack.c.bf16 %v1634_v58, %v1603_v0 }
 0x487   : > { %v1769_v13 = vpack.c.bf16 %v1559_v10, %v1541_v12 }
 0x488   : > { %v1662_v14 = vpop.permute.xlu1 %1661 }
 0x489   : > { %v1601_v15 = vpop.permute.xlu0 %1600  ;;  %1793 = vmatprep.subr.bf16.mxu1 %v1769_v13 }
 0x48a   : > { %1794 = vmatpush1.bf16.msra.mxu1 %v1768_v60  ;;  %v1604_v48 = vsel %vm1602_vm11, %v1599_v47, %v1601_v15 }
 0x48c   : > { %v1664_v16 = vpop.permute.xlu1 %1663 }
 0x48d   : > { %v1667_v17 = vsel %vm1616_vm10, %v1662_v14, %v1664_v16  ;;  %v1632_v46 = vpop.permute.xlu0 %1631  ;;  %v1668_v50 = vsel %vm1616_vm10, %v1664_v16, %v1666_v37  ;;  %v2254_v16 = vld [vmem:[#allocation2 + $0x40] sm:$0xff]  ;;  %vm2137_vm10 = vcmask 113664  }
 0x48e   : > { %1671 = vst [vmem:[#allocation2 + $0x50] sm:$0xff] %v1667_v17  ;;  %v1635_v59 = vsel %vm1633_vm14, %v1630_v9, %v1632_v46  ;;  %v1773_v42 = vpack.c.bf16 %v1668_v50, %v5221_v44  ;;  %v1772_v53 = vpack.c.bf16 %v1667_v17, %v5216_v22 }
 0x48f   : > { %v1771_v61 = vpack.c.bf16 %v1635_v59, %v1604_v48 }
 0x490   : > { %v2074_v63 = vpop.permute.xlu1 %2073 }
 0x491   : > { %v1693_v40 = vpop.permute.xlu0 %1692  ;;  %1795 = vmatprep.subr.bf16.mxu1 %v1771_v61 }
 0x492   : > { %v1696_v24 = vsel %vm1585_vm8, %v1691_v45, %v1693_v40  ;;  %v1697_v25 = vsel %vm1585_vm8, %v1693_v40, %v1695_v41  ;;  %1796 = vmatpush1.bf16.msra.mxu1 %v1770_v2  ;;  %vm2154_vm8 = vcmask 7168  }
 0x493   : > { %1700 = vst [vmem:[#allocation2 + $0x60] sm:$0xff] %v1696_v24  ;;  %1797 = vmatprep.subr.bf16.mxu1 %v1773_v42  ;;  %v1775_v31 = vpack.c.bf16 %v1715_v26, %v1697_v25  ;;  %v1774_v41 = vpack.c.bf16 %v1714_v56, %v1696_v24 }
 0x494   : > { %v1740_v27 = vpop.permute.xlu1 %1739 }
 0x495   : > { %v1743_v29 = vsel %vm1522_vm7, %v1738_v8, %v1740_v27  ;;  %v2062_v52 = vpop.permute.xlu0 %2061  ;;  %v1744_v32 = vsel %vm1522_vm7, %v1740_v27, %v1742_v43  ;;  %vm2113_vm7 = vcmask 56320  }
 0x496   : > { %1747 = vst [vmem:[#allocation2 + $0x80] sm:$0xff] %v1743_v29  ;;  %1798 = vmatpush1.bf16.msra.mxu1 %v1772_v53  ;;  %v1777_v37 = vpack.c.bf16 %v1744_v32, %v1744_v32  ;;  %v1776_v49 = vpack.c.bf16 %v1743_v29, %v1743_v29 }
 0x497   : > { %1799 = vmatprep.subr.bf16.mxu1 %v1775_v31 }
 0x498   : > { %v2110_v44 = vpop.permute.xlu1 %2109  ;;  %v1788_v43 = vsel %vm1130_vm4, %v1776_v49, 0 }
 0x499   : > { %v2076_v33 = vpop.permute.xlu0 %2075 }
 0x49a   : > { %v2078_v39 = vsel %vm2077_vm3, %v2074_v63, %v2076_v33  ;;  %1800 = vmatpush1.bf16.msra.mxu1 %v1774_v41 }
 0x49b   : > { %2080 = vst.msk [vmem:[#allocation2 + $0x10] sm:$0xff] %vm1239_vm6, %v2078_v39  ;;  %4223 = vmatprep.subr.msk.bf16.mxu1 %vm1130_vm4, %v1777_v37  ;;  %v2263_v37 = vld [vmem:[#allocation2 + $0xd0] sm:$0xff] }
 0x49c   : > { %v2151_v22 = vpop.permute.xlu1 %2150 }
 0x49d   : > { %v2040_v51 = vpop.permute.xlu0 %2039 }
 0x49e   : > { %v2042_v54 = vsel %vm2041_vm2, %v5322_v38, %v2040_v51  ;;  %1802 = vmatpush1.bf16.msra.mxu1 %v1788_v43 }
 0x49f   : > { %2044 = vst.msk [vmem:[#allocation2] sm:$0xff] %vm1239_vm6, %v2042_v54  ;;  %2303 = vmatprep.subr.bf16.mxu1 %v4605_v1 }
 0x4a0   : > { %v2221_v56 = vpop.permute.xlu1 %2220 }
 0x4a1   : > { %2223 = vst.msk [vmem:[#allocation2 + $0x70] sm:$0xff] %vm1239_vm6, %v2221_v56  ;;  %v2112_v62 = vpop.permute.xlu0 %2111  ;;  %4224 = vmatmul.mubr.msk.bf16.vlgmr.msra.gmra.mrb[0].mxu1 %vm1126_vm5, %v1767_v57  ;;  %vm2065_vm5 = vcmask 146432  }
 0x4a2   : > { %v2114_v38 = vsel %vm2113_vm7, %v2110_v44, %v2112_v62  ;;  %4247 = vmatprep.mubr.msk.bf16.mxu1 %vm2089_vm13, %v4560_v55  ;;  %v2251_v8 = vld [vmem:[#allocation2 + $0x10] sm:$0xff]  ;;  %v4562_v62 = vld [vmem:[%s6110_s19] ss:$8 sps:$4 sm:$0xff]  }
 0x4a3   : > { %2116 = vst.msk [vmem:[#allocation2 + $0x20] sm:$0xff] %vm1239_vm6, %v2114_v38  ;;  %v4563_v38 = vld [vmem:[%s6201_s10] sm:$0xff]  }
 0x4a4   : > { %v2185_v5 = vpop.permute.xlu1 %2184  ;;  %4327 = vmatpush3.bf16.msra.mxu0 %v4563_v38 }
 0x4a5   : > { %2187 = vst.msk [vmem:[#allocation2 + $0x50] sm:$0xff] %vm1239_vm6, %v2185_v5  ;;  %v2153_v45 = vpop.permute.xlu0 %2152  ;;  %v4564_v5 = vld [vmem:[%s6201_s10 + $0x8] sm:$0xff]   ;;  %4328 = vmatprep.subr.bf16.mxu0 %v5157_v35 }
 0x4a6   : > { %v2155_v47 = vsel %vm2154_vm8, %v2151_v22, %v2153_v45  ;;  %v2250_v0 = vld [vmem:[#allocation2] sm:$0xff]  ;;  %v4565_v45 = vld [vmem:[%s6201_s10 + $0x10] sm:$0xff]  }
 0x4a7   : > { %2157 = vst.msk [vmem:[#allocation2 + $0x30] sm:$0xff] %vm1239_vm6, %v2155_v47  ;;  %v2270_v9 = vpack.c.bf16 %v2251_v8, %v2250_v0  ;;  %v4566_v47 = vld [vmem:[%s6201_s10 + $0x18] sm:$0xff]   ;;  %v2432_v0 = vand.u32 3, %v4794_v4  ;;  %s6212_s10 = smov 3  }
 0x4a8   : > { %v2086_v58 = vpop.permute.xlu1 %2085  ;;  %v2257_v42 = vld [vmem:[#allocation2 + $0x70] sm:$0xff]  ;;  %4329 = vmatpush3.bf16.msra.mxu0 %v4564_v5 }
 0x4a9   : > { %v2205_v7 = vpop.permute.xlu0 %2204  ;;  %2304 = vmatpush1.bf16.msra.mxu1 %v2270_v9  ;;  %4330 = vmatprep.subr.bf16.mxu0 %v5157_v35  ;;  %v2433_v8 = vadd.s32 4294967295, %v2432_v0  ;;  %v2503_v9 = vadd.s32 1, %v2432_v0 }
 0x4aa   : > { %2207 = vst.msk [vmem:[#allocation2 + $0x60] sm:$0xff] %vm1239_vm6, %v2205_v7  ;;  %2305 = vmatprep.subr.bf16.mxu1 %v4605_v1  ;;  %v2252_v14 = vld [vmem:[#allocation2 + $0x20] sm:$0xff] }
 0x4ab   : > { %vm2434_vm11 = vcmp.ge.s32.totalorder %v2433_v8, 0  ;;  %vm2505_vm12 = vcmp.lt.s32.totalorder %v2503_v9, 4 }
 0x4ac   : > { %v2064_v10 = vpop.permute.xlu1 %2063  ;;  %v2255_v17 = vld [vmem:[#allocation2 + $0x50] sm:$0xff]  ;;  %4331 = vmatpush3.bf16.msra.mxu0 %v4565_v45  ;;  %v4253_v7 = vsel %vm2434_vm11, 1.0, %v5157_v35  ;;  %vm2475_vm11 = vcmask 80896  }
 0x4ad   : > { %v2066_v12 = vsel %vm2065_vm5, %v2062_v52, %v2064_v10  ;;  %v2237_v13 = vpop.permute.xlu0 %2236  ;;  %v2272_v59 = vpack.c.bf16 %v2255_v17, %v2254_v16  ;;  %4332 = vmatprep.subr.bf16.mxu0 %v5157_v35  ;;  %v4255_v10 = vsel %vm2505_vm12, 1.0, %v5157_v35  ;;  %2440 = vrot.lane.b32.xlu1 %v4253_v7, %s6156_s28  ;;  %s4646_s28 = smov 10   ;;  %vm2425_vm5 = vcmask 1047680  }
 0x4ae   : > { %2068 = vst.msk [vmem:[#allocation2 + $0x90] sm:$0xff] %vm1239_vm6, %v2066_v12  ;;  %2239 = vst.msk [vmem:[#allocation2 + $0x80] sm:$0xff] %vm1239_vm6, %v2237_v13  ;;  %v2253_v60 = vld [vmem:[#allocation2 + $0x30] sm:$0xff]  ;;  %2510 = vrot.lane.b32.xlu0 %v4255_v10, %s6163_s3  ;;  %v2527_v12 = vadd.s32 2, %v2432_v0 }
 0x4af   : > { %v2271_v15 = vpack.c.bf16 %v2253_v60, %v2252_v14 }
 0x4b0   : > { %v2134_v46 = vpop.permute.xlu1 %2133  ;;  %4333 = vmatpush3.bf16.msra.mxu0 %v4566_v47  ;;  %vm2529_vm7 = vcmp.lt.s32.totalorder %v2527_v12, 4 }
 0x4b1   : > { %v2088_v48 = vpop.permute.xlu0 %2087  ;;  %2306 = vmatpush1.bf16.msra.mxu1 %v2271_v15  ;;  %v2256_v61 = vld [vmem:[#allocation2 + $0x60] sm:$0xff]  ;;  %2709 = vmatprep.subr.bf16.mxu0 %v4605_v1  ;;  %v4256_v14 = vsel %vm2529_vm7, 1.0, %v5157_v35 }
 0x4b2   : > { %v2090_v50 = vsel %vm2089_vm13, %v2086_v58, %v2088_v48  ;;  %2307 = vmatprep.subr.bf16.mxu1 %v4605_v1  ;;  %v2273_v24 = vpack.c.bf16 %v2257_v42, %v2256_v61  ;;  %v2457_v58 = vadd.s32 4294967294, %v2432_v0  ;;  %2585 = vrot.lane.b32.xlu0 %v4255_v10, %s6193_s29 }
 0x4b3   : > { %2092 = vst.msk [vmem:[#allocation2 + $0xa0] sm:$0xff] %vm1239_vm6, %v2090_v50  ;;  %2550 = vrot.lane.b32.xlu1 %v4253_v7, %s6194_s0 }
 0x4b4   : > { %v2168_v63 = vpop.permute.xlu1 %2167  ;;  %vm2458_vm2 = vcmp.ge.s32.totalorder %v2457_v58, 0 }
 0x4b5   : > { %v2136_v2 = vpop.permute.xlu0 %2135  ;;  %2308 = vmatpush1.bf16.msra.mxu1 %v2272_v59  ;;  %v2258_v25 = vld [vmem:[#allocation2 + $0x80] sm:$0xff]  ;;  %v2259_v26 = vld [vmem:[#allocation2 + $0x90] sm:$0xff]  ;;  %v4254_v13 = vsel %vm2458_vm2, 1.0, %v5157_v35 }
 0x4b6   : > { %v2138_v40 = vsel %vm2137_vm10, %v2134_v46, %v2136_v2  ;;  %2309 = vmatprep.subr.bf16.mxu1 %v4605_v1  ;;  %v2274_v52 = vpack.c.bf16 %v2259_v26, %v2258_v25  ;;  %2464 = vrot.lane.b32.xlu0 %v4254_v13, %s6157_s7  ;;  %s6204_s7 = smov 4   ;;  %vm2451_vm10 = vcmask 39936  }
 0x4b7   : > { %2140 = vst.msk [vmem:[#allocation2 + $0xb0] sm:$0xff] %vm1239_vm6, %v2138_v40  ;;  %2605 = vrot.lane.b32.xlu1 %v4253_v7, %s6160_s24 }
 0x4b8   : > { %v2195_v27 = vpop.permute.xlu1 %2194 }
 0x4b9   : > { %v2170_v53 = vpop.permute.xlu0 %2169  ;;  %2310 = vmatpush1.bf16.msra.mxu1 %v2273_v24  ;;  %2197 = vst.msk [vmem:[#allocation2 + $0xe0] sm:$0xff] %vm1239_vm6, %v2195_v27 }
 0x4ba   : > { %v2171_v29 = vsel %vm1633_vm14, %v2168_v63, %v2170_v53  ;;  %2311 = vmatprep.subr.bf16.mxu1 %v4605_v1  ;;  %v2260_v44 = vld [vmem:[#allocation2 + $0xa0] sm:$0xff]  ;;  %2534 = vrot.lane.b32.xlu0 %v4256_v14, %s6202_s6 }
 0x4bb   : > { %2173 = vst.msk [vmem:[#allocation2 + $0xc0] sm:$0xff] %vm1239_vm6, %v2171_v29  ;;  %2637 = vrot.lane.b32.xlu1 %v4255_v10, %s4645_s1 }
 0x4bc   : > { %v2227_v31 = vpop.permute.xlu1 %2226 }
 0x4bd   : > { %2312 = vmatpush1.bf16.msra.mxu1 %v2274_v52  ;;  %v2215_v32 = vpop.permute.xlu0 %2214  ;;  %2229 = vst.msk [vmem:[#allocation2 + $0x100] sm:$0xff] %vm1239_vm6, %v2227_v31 }
 0x4be   : > { %2217 = vst.msk [vmem:[#allocation2 + $0xf0] sm:$0xff] %vm1239_vm6, %v2215_v32  ;;  %2313 = vmatprep.subr.bf16.mxu1 %v4605_v1  ;;  %v2261_v41 = vld [vmem:[#allocation2 + $0xb0] sm:$0xff]  ;;  %2595 = vrot.lane.b32.xlu0 %v4256_v14, %s6158_s5  ;;  %s6205_s5 = smov 124  }
 0x4bf   : > { %v2275_v33 = vpack.c.bf16 %v2261_v41, %v2260_v44  ;;  %2566 = vrot.lane.b32.xlu1 %v4254_v13, %s6187_s25 }
 0x4c0   : > { %v2264_v51 = vld [vmem:[#allocation2 + $0xe0] sm:$0xff] }
 0x4c1   : > { %2314 = vmatpush1.bf16.msra.mxu1 %v2275_v33  ;;  %v2247_v49 = vpop.permute.xlu0 %2246 }
 0x4c2   : > { %2249 = vst.msk [vmem:[#allocation2 + $0x110] sm:$0xff] %vm1239_vm6, %v2247_v49  ;;  %2315 = vmatprep.subr.bf16.mxu1 %v4605_v1  ;;  %v2262_v39 = vld [vmem:[#allocation2 + $0xc0] sm:$0xff]  ;;  %2647 = vrot.lane.b32.xlu0 %v4256_v14, %s4646_s28 }
 0x4c3   : > { %v2276_v22 = vpack.c.bf16 %v2263_v37, %v2262_v39  ;;  %2615 = vrot.lane.b32.xlu1 %v4254_v13, %s6203_s26 }
 0x4c4   : > { %v2266_v57 = vld [vmem:[#allocation2 + $0x100] sm:$0xff] }
 0x4c5   : > { %2316 = vmatpush1.bf16.msra.mxu1 %v2276_v22  ;;  %v2265_v43 = vld [vmem:[#allocation2 + $0xf0] sm:$0xff] }
 0x4c6   : > { %2317 = vmatprep.subr.bf16.mxu1 %v4605_v1  ;;  %v2277_v54 = vpack.c.bf16 %v2265_v43, %v2264_v51 }
 0x4c9   : > { %2318 = vmatpush1.bf16.msra.mxu1 %v2277_v54  ;;  %v2267_v55 = vld [vmem:[#allocation2 + $0x110] sm:$0xff] }
 0x4ca   : > { %2319 = vmatprep.subr.bf16.mxu1 %v4605_v1  ;;  %v2278_v56 = vpack.c.bf16 %v2267_v55, %v2266_v57 }
 0x4cd   : > { %2320 = vmatpush1.bf16.msra.mxu1 %v2278_v56  ;;  %v2284_v46 = vpop.permute.xlu1 %2283 }
 0x4ce   : > { %4338 = vmatprep.subr.bf16.mxu1 %v5157_v35 }
 0x4d0   : > { %2336 = vmatmul.mubr.bf16.vlgmr.msra.gmra.mrb[4].mxu1 %v4562_v62 }
 0x4d1   : > { %4340 = vmatprep.mubr.msk.bf16.mxu1 %vm4640_vm15, %v5157_v35  ;;  %vm2521_vm15 = vcmask 23552  }
 0x4d2   : > { %v2289_v48 = vpop.permute.xlu0 %2288 }
 0x51f   : > { %v2441_v63 = vpop.permute.xlu1 %2440 }
 0x520   : > { %v2443_v40 = vmul.f32 %v5157_v35, %v2441_v63  ;;  %v2511_v27 = vpop.permute.xlu0 %2510 }
 0x521   : > { %v2513_v29 = vmul.f32 %v5157_v35, %v2511_v27 }
 0x522   : > { %2447 = vrot.lane.b32.xlu1 %v2443_v40, %s4645_s1 }
 0x524   : > { %v2586_v52 = vpop.permute.xlu0 %2585 }
 0x525   : > { %v2551_v32 = vpop.permute.xlu1 %2550 }
 0x526   : > { %2483 = vrot.lane.b32.xlu1 %v5157_v35, %s6204_s7  ;;  %v2553_v41 = vmul.f32 %v5157_v35, %v2551_v32 }
 0x528   : > { %v2465_v31 = vpop.permute.xlu0 %2464 }
 0x529   : > { %v2467_v44 = vmul.f32 %v5157_v35, %v2465_v31  ;;  %v2606_v43 = vpop.permute.xlu1 %2605 }
 0x52a   : > { %2517 = vrot.lane.b32.xlu1 %v2513_v29, %s6160_s24 }
 0x52b   : > { %2471 = vrot.lane.b32.xlu0 %v2467_v44, %s4646_s28 }
 0x52c   : > { %v2535_v62 = vpop.permute.xlu0 %2534 }
 0x52d   : > { %v2638_v56 = vpop.permute.xlu1 %2637  ;;  %v2537_v47 = vmul.f32 %v5157_v35, %v2535_v62 }
 0x52e   : > { %2557 = vrot.lane.b32.xlu1 %v2553_v41, %s6193_s29 }
 0x530   : > { %v2596_v58 = vpop.permute.xlu0 %2595 }
 0x531   : > { %v2567_v0 = vpop.permute.xlu1 %2566 }
 0x532   : > { %v2569_v9 = vmul.f32 %v5157_v35, %v2567_v0 }
 0x535   : > { %v2616_v13 = vpop.permute.xlu1 %2615 }
 0x574   : > { %v5421_v60 = vpop.f32.mrb[0].mxu1 }
 0x575   : > { %v5423_v15 = vpop.f32.mrb[1].mxu1 }
 0x576   : > { %v1831_v16 = vpop.f32.mrb[2].mxu1 }
 0x577   : > { %v1832_v17 = vpop.f32.mrb[3].mxu1  ;;  %v2648_v16 = vpop.permute.xlu0 %2647 }
 0x5a3   : > { %v2337_v50 = vpop.f32.mrb[4].mxu1 }
 0x5a4   : > { %v2338_v59 = vadd.f32 %v2337_v50, %v2284_v46  ;;  %v2339_v61 = vpop.f32.mrb[5].mxu1  ;;  %v4567_v46 = vld [vmem:[%s6111_s20 + $0x4] ss:$8 sps:$4 sm:$0xff]   ;;  %v2448_v50 = vpop.permute.xlu1 %2447 }
 0x5a5   : > { %v2340_v2 = vpop.f32.mrb[6].mxu1 }
 0x5a6   : > { %v2341_v42 = vadd.f32 %v2340_v2, %v2289_v48  ;;  %v2342_v24 = vpop.f32.mrb[7].mxu1  ;;  %v2344_v25 = vmax.f32 %v2338_v59, 0.0  ;;  %v2686_v48 = vld [vmem:[%s6209_s8 + $0x8] sm:$0xff] }
 0x5a8   : > { %v2345_v26 = vmax.f32 %v2341_v42, 0.0  ;;  %v2484_v59 = vpop.permute.xlu1 %2483 }
 0x5aa   : > { %v5427_v53 = vpack.c.bf16 %v2345_v26, %v2344_v25 }
 0x5ac   : > { %4335 = vmatmul.mubr.msk.bf16.vlgmr.msra.gmra.mrb[20].mxu0 %vm1239_vm6, %v5427_v53  ;;  %v2518_v61 = vpop.permute.xlu1 %2517 }
 0x5ad   : > { %4259 = vmatprep.mubr.msk.bf16.mxu0 %vm2089_vm13, %v4567_v46 }
 0x5b0   : > { %v2558_v2 = vpop.permute.xlu1 %2557 }
 0x67f   : > { %v2416_v33 = vpop.f32.mrb[20].mxu0 }
 0x680   : > { %2423 = vst.msk [vmem:[#allocation3 + $0x8] sm:$0xff] %vm2089_vm13, %v2416_v33  ;;  %v4336_v37 = vpop.f32.mrb[21].mxu0 }
 0x681   : > { %v2419_v49 = vpop.f32.mrb[22].mxu0  ;;  %2426 = vst.msk [vmem:[#allocation3 + $0x8] sm:$0xff] %vm2425_vm5, %v5157_v35 }
 0x682   : > { %2424 = vst.msk [vmem:[#allocation3 + $0x28] sm:$0xff] %vm2089_vm13, %v2419_v49  ;;  %v4337_v39 = vpop.f32.mrb[23].mxu0 }
 0x683   : > { %2428 = vst.msk [vmem:[#allocation3 + $0x28] sm:$0xff] %vm2425_vm5, %v5157_v35 }
 0x688   : > { %v2549_v22 = vld [vmem:[#allocation3 + $0x8] sm:$0xff] }
 0x689   : > { %2485 = vrot.lane.b32.xlu0 %v2549_v22, %s6204_s7  ;;  %2626 = vrot.lane.b32.xlu1 %v2549_v22, %s6205_s5  ;;  %2581 = vst.msk [vmem:[#allocation2 + $0x40] sm:$0xff] %vm2089_vm13, %v2549_v22  ;;  %v2444_v54 = vmul.f32 %v2549_v22, %v2441_v63  ;;  %v2588_v57 = vmul.f32 %v2586_v52, %v2549_v22  ;;  %v2472_v63 = vpop.permute.xlu0 %2471 }
 0x68a   : > { %v2456_v51 = vld [vmem:[#allocation3 + $0x28] sm:$0xff]  ;;  %v2514_v55 = vmul.f32 %v2549_v22, %v2511_v27  ;;  %v2554_v5 = vmul.f32 %v2551_v32, %v2549_v22  ;;  %v2608_v45 = vmul.f32 %v2606_v43, %v2549_v22  ;;  %v2640_v8 = vmul.f32 %v2638_v56, %v2549_v22 }
 0x68b   : > { %2583 = vst.msk [vmem:[#allocation2 + $0xd0] sm:$0xff] %vm2089_vm13, %v2456_v51  ;;  %v2468_v38 = vmul.f32 %v2465_v31, %v2456_v51  ;;  %v2598_v7 = vmul.f32 %v2596_v58, %v2456_v51  ;;  %v2538_v10 = vmul.f32 %v2535_v62, %v2456_v51  ;;  %v2570_v12 = vmul.f32 %v2567_v0, %v2456_v51 }
 0x68c   : > { %v2618_v14 = vmul.f32 %v2616_v13, %v2456_v51  ;;  %v2650_v17 = vmul.f32 %v2648_v16, %v2456_v51 }
 0x68d   : > { %2449 = vrot.lane.b32.xlu0 %v2444_v54, %s4645_s1  ;;  %2590 = vrot.lane.b32.xlu1 %v2588_v57, %s6194_s0  ;;  %s6206_s1 = smov 123  }
 0x690   : > { %v2660_v62 = vld [vmem:[#allocation2 + $0x40] sm:$0xff] }
 0x691   : > { %2519 = vrot.lane.b32.xlu0 %v2514_v55, %s6160_s24  ;;  %2494 = vrot.lane.b32.xlu1 %v5157_v35, %s4636_s27  ;;  %s6207_s24 = smov 2   ;;  %v2685_v35 = vld [vmem:[%s6209_s8] sm:$0xff]  ;;  %s6211_s8 = smov 125  }
 0x695   : > { %2559 = vrot.lane.b32.xlu0 %v2554_v5, %s6193_s29  ;;  %2473 = vrot.lane.b32.xlu1 %v2468_v38, %s4646_s28  ;;  %s6208_s28 = smov 120  }
 0x699   : > { %2541 = vrot.lane.b32.xlu1 %v2537_v47, %s6203_s26  ;;  %2610 = vrot.lane.b32.xlu0 %v2608_v45, %s6163_s3 }
 0x69d   : > { %2642 = vrot.lane.b32.xlu0 %v2640_v8, %s6206_s1  ;;  %2573 = vrot.lane.b32.xlu1 %v2569_v9, %s6207_s24  ;;  %s4650_s1 = smov 15  }
 0x6a1   : > { %2496 = vrot.lane.b32.xlu0 %v2456_v51, %s4636_s27  ;;  %2600 = vrot.lane.b32.xlu1 %v2598_v7, %s6187_s25 }
 0x6a5   : > { %2543 = vrot.lane.b32.xlu0 %v2538_v10, %s6203_s26  ;;  %2632 = vrot.lane.b32.xlu1 %v2456_v51, %s6208_s28 }
 0x6a9   : > { %2575 = vrot.lane.b32.xlu0 %v2570_v12, %s6207_s24  ;;  %2689 = vperm.xlu1 %4441, %v2685_v35  }
 0x6ad   : > { %2620 = vrot.lane.b32.xlu0 %v2618_v14, %s6202_s6 }
 0x6b1   : > { %2652 = vrot.lane.b32.xlu0 %v2650_v17, %s6210_s9  ;;  %s6214_s9 = sld [smem:[#allocation8_spill]] }
 0x6b5   : > { %2694 = vperm.xlu0 %4410, %v2686_v48  }
 0x6fb   : > { %v2486_v40 = vpop.permute.xlu0 %2485  ;;  %v2627_v42 = vpop.permute.xlu1 %2626 }
 0x6fc   : > { %v2487_v24 = vsel %vm763_vm1, %v2484_v59, %v2486_v40  ;;  %2629 = vst.msk [vmem:[#allocation2 + $0x70] sm:$0xff] %vm2089_vm13, %v2627_v42 }
 0x6fd   : > { %2489 = vst.msk [vmem:[#allocation2 + $0x10] sm:$0xff] %vm2089_vm13, %v2487_v24 }
 0x6ff   : > { %v2450_v25 = vpop.permute.xlu0 %2449  ;;  %v2591_v26 = vpop.permute.xlu1 %2590 }
 0x700   : > { %v2452_v27 = vsel %vm2451_vm10, %v2448_v50, %v2450_v25  ;;  %2593 = vst.msk [vmem:[#allocation2 + $0x50] sm:$0xff] %vm2089_vm13, %v2591_v26  ;;  %vm3515_vm10 = vcmask 924672  }
 0x701   : > { %2454 = vst.msk [vmem:[#allocation2] sm:$0xff] %vm2089_vm13, %v2452_v27 }
 0x703   : > { %v2520_v29 = vpop.permute.xlu0 %2519  ;;  %v2495_v52 = vpop.permute.xlu1 %2494  ;;  %v2663_v10 = vld [vmem:[#allocation2 + $0x70] sm:$0xff] }
 0x704   : > { %v2522_v31 = vsel %vm2521_vm15, %v2518_v61, %v2520_v29  ;;  %v2657_v49 = vld [vmem:[#allocation2 + $0x10] sm:$0xff] }
 0x705   : > { %2524 = vst.msk [vmem:[#allocation2 + $0x20] sm:$0xff] %vm2089_vm13, %v2522_v31  ;;  %v2669_v61 = vld [vmem:[#allocation2 + $0xd0] sm:$0xff]  ;;  %v4569_v31 = vld [vmem:[%s6111_s20] ss:$8 sps:$4 sm:$0xff]  }
 0x707   : > { %v2560_v32 = vpop.permute.xlu0 %2559  ;;  %v2474_v44 = vpop.permute.xlu1 %2473  ;;  %v2661_v38 = vld [vmem:[#allocation2 + $0x50] sm:$0xff] }
 0x708   : > { %v2561_v41 = vsel %vm2154_vm8, %v2558_v2, %v2560_v32  ;;  %v2476_v33 = vsel %vm2475_vm11, %v2472_v63, %v2474_v44  ;;  %v2656_v37 = vld [vmem:[#allocation2] sm:$0xff]  ;;  %v2678_v0 = vpack.c.bf16 %v2661_v38, %v2660_v62  ;;  %v4575_v44 = vld [vmem:[%s6103_s12 + $0x14] ss:$8 sps:$4 sm:$0xff]   ;;  %vm3556_vm11 = vcmask 121856  }
 0x709   : > { %2563 = vst.msk [vmem:[#allocation2 + $0x30] sm:$0xff] %vm2089_vm13, %v2561_v41  ;;  %2478 = vst.msk [vmem:[#allocation2 + $0x90] sm:$0xff] %vm2089_vm13, %v2476_v33  ;;  %v2676_v39 = vpack.c.bf16 %v2657_v49, %v2656_v37  ;;  %v4570_v32 = vld [vmem:[%s6103_s12] ss:$8 sps:$4 sm:$0xff]   ;;  %v4573_v41 = vld [vmem:[%s6103_s12 + $0x10] ss:$8 sps:$4 sm:$0xff]  }
 0x70a   : > { %v4578_v33 = vld [vmem:[%s6103_s12 + $0x24] ss:$8 sps:$4 sm:$0xff]   ;;  %v4576_v37 = vld [vmem:[%s6103_s12 + $0x20] ss:$8 sps:$4 sm:$0xff]   ;;  %v4581_v49 = vld [vmem:[%s6103_s12 + $0x34] ss:$8 sps:$4 sm:$0xff]  }
 0x70b   : > { %v2611_v22 = vpop.permute.xlu0 %2610  ;;  %2710 = vmatpush1.bf16.msra.mxu0 %v2676_v39  ;;  %v2542_v51 = vpop.permute.xlu1 %2541  ;;  %v4579_v39 = vld [vmem:[%s6103_s12 + $0x30] ss:$8 sps:$4 sm:$0xff]  }
 0x70c   : > { %2613 = vst.msk [vmem:[#allocation2 + $0x60] sm:$0xff] %vm2089_vm13, %v2611_v22  ;;  %2711 = vmatprep.subr.bf16.mxu0 %v4605_v1  ;;  %v2658_v57 = vld [vmem:[#allocation2 + $0x20] sm:$0xff] }
 0x70d   : > { %v4582_v22 = vld [vmem:[%s6102_s11] sm:$0xff]  }
 0x70e   : > { %4339 = vmatpush3.bf16.msra.mxu1 %v4582_v22 }
 0x70f   : > { %v2643_v43 = vpop.permute.xlu0 %2642  ;;  %v2574_v54 = vpop.permute.xlu1 %2573  ;;  %3077 = vmatprep.subr.bf16.mxu1 %v4605_v1 }
 0x710   : > { %2645 = vst.msk [vmem:[#allocation2 + $0x80] sm:$0xff] %vm2089_vm13, %v2643_v43  ;;  %v2659_v55 = vld [vmem:[#allocation2 + $0x30] sm:$0xff]  ;;  %v4583_v43 = vld [vmem:[%s6104_s13] ss:$8 sps:$4 sm:$0xff]  }
 0x711   : > { %v2677_v56 = vpack.c.bf16 %v2659_v55, %v2658_v57  ;;  %v2665_v16 = vld [vmem:[#allocation2 + $0x90] sm:$0xff] }
 0x712   : > { %v5549_v55 = vld [vmem:[#allocation3] sm:$0xff] }
 0x713   : > { %v2497_v5 = vpop.permute.xlu0 %2496  ;;  %2712 = vmatpush1.bf16.msra.mxu0 %v2677_v56  ;;  %v2601_v45 = vpop.permute.xlu1 %2600  ;;  %v2662_v8 = vld [vmem:[#allocation2 + $0x60] sm:$0xff] }
 0x714   : > { %v2498_v47 = vsel %vm2077_vm3, %v2495_v52, %v2497_v5  ;;  %2713 = vmatprep.subr.bf16.mxu0 %v4605_v1  ;;  %2603 = vst.msk [vmem:[#allocation2 + $0xe0] sm:$0xff] %vm2089_vm13, %v2601_v45  ;;  %v2679_v12 = vpack.c.bf16 %v2663_v10, %v2662_v8  ;;  %v4572_v52 = vld [vmem:[%s6103_s12 + $0x4] ss:$8 sps:$4 sm:$0xff]   ;;  %vm2807_vm3 = vcmask 1047584  }
 0x715   : > { %2500 = vst.msk [vmem:[#allocation2 + $0xa0] sm:$0xff] %vm2089_vm13, %v2498_v47 }
 0x717   : > { %v2544_v9 = vpop.permute.xlu0 %2543  ;;  %2714 = vmatpush1.bf16.msra.mxu0 %v2678_v0  ;;  %v2633_v58 = vpop.permute.xlu1 %2632  ;;  %v2664_v35 = vld [vmem:[#allocation2 + $0x80] sm:$0xff] }
 0x718   : > { %v2545_v7 = vsel %vm974_vm9, %v2542_v51, %v2544_v9  ;;  %2715 = vmatprep.subr.bf16.mxu0 %v4605_v1  ;;  %2635 = vst.msk [vmem:[#allocation2 + $0x100] sm:$0xff] %vm2089_vm13, %v2633_v58  ;;  %v2680_v17 = vpack.c.bf16 %v2665_v16, %v2664_v35  ;;  %v4585_v51 = vld [vmem:[%s6104_s13 + $0x4] ss:$8 sps:$4 sm:$0xff]  }
 0x719   : > { %2547 = vst.msk [vmem:[#allocation2 + $0xb0] sm:$0xff] %vm2089_vm13, %v2545_v7 }
 0x71b   : > { %v2576_v13 = vpop.permute.xlu0 %2575  ;;  %2716 = vmatpush1.bf16.msra.mxu0 %v2679_v12  ;;  %v2670_v42 = vld [vmem:[#allocation2 + $0xe0] sm:$0xff] }
 0x71c   : > { %v2577_v14 = vsel %vm1633_vm14, %v2574_v54, %v2576_v13  ;;  %2717 = vmatprep.subr.bf16.mxu0 %v4605_v1  ;;  %v2666_v48 = vld [vmem:[#allocation2 + $0xa0] sm:$0xff] }
 0x71d   : > { %2579 = vst.msk [vmem:[#allocation2 + $0xc0] sm:$0xff] %vm2089_vm13, %v2577_v14 }
 0x71f   : > { %2718 = vmatpush1.bf16.msra.mxu0 %v2680_v17  ;;  %v2621_v46 = vpop.permute.xlu0 %2620  ;;  %v2672_v26 = vld [vmem:[#allocation2 + $0x100] sm:$0xff] }
 0x720   : > { %2623 = vst.msk [vmem:[#allocation2 + $0xf0] sm:$0xff] %vm2089_vm13, %v2621_v46  ;;  %2719 = vmatprep.subr.bf16.mxu0 %v4605_v1  ;;  %v2667_v50 = vld [vmem:[#allocation2 + $0xb0] sm:$0xff] }
 0x721   : > { %v2681_v59 = vpack.c.bf16 %v2667_v50, %v2666_v48 }
 0x723   : > { %2720 = vmatpush1.bf16.msra.mxu0 %v2681_v59  ;;  %v2653_v63 = vpop.permute.xlu0 %2652 }
 0x724   : > { %2655 = vst.msk [vmem:[#allocation2 + $0x110] sm:$0xff] %vm2089_vm13, %v2653_v63  ;;  %2721 = vmatprep.subr.bf16.mxu0 %v4605_v1  ;;  %v2668_v2 = vld [vmem:[#allocation2 + $0xc0] sm:$0xff] }
 0x725   : > { %v2682_v40 = vpack.c.bf16 %v2669_v61, %v2668_v2 }
 0x727   : > { %2722 = vmatpush1.bf16.msra.mxu0 %v2682_v40  ;;  %v2671_v24 = vld [vmem:[#allocation2 + $0xf0] sm:$0xff] }
 0x728   : > { %2723 = vmatprep.subr.bf16.mxu0 %v4605_v1  ;;  %v2683_v25 = vpack.c.bf16 %v2671_v24, %v2670_v42  ;;  %v2690_v5 = vpop.permute.xlu1 %2689 }
 0x72b   : > { %2724 = vmatpush1.bf16.msra.mxu0 %v2683_v25  ;;  %v2673_v27 = vld [vmem:[#allocation2 + $0x110] sm:$0xff] }
 0x72c   : > { %2725 = vmatprep.subr.bf16.mxu0 %v4605_v1  ;;  %v2684_v29 = vpack.c.bf16 %v2673_v27, %v2672_v26 }
 0x72f   : > { %2726 = vmatpush1.bf16.msra.mxu0 %v2684_v29 }
 0x730   : > { %3168 = vmatprep.subr.bf16.mxu0 %v4572_v52 }
 0x732   : > { %2742 = vmatmul.mubr.bf16.vlgmr.msra.gmra.mrb[24].mxu0 %v4569_v31 }
 0x733   : > { %3169 = vmatpush1.bf16.msra.mxu0 %v4570_v32  ;;  %3200 = vmatprep.mubr.bf16.mxu0 %v4605_v1 }
 0x734   : > { %3170 = vmatprep.subr.bf16.mxu0 %v4575_v44  ;;  %v2695_v45 = vpop.permute.xlu0 %2694 }
 0x737   : > { %3171 = vmatpush1.bf16.msra.mxu0 %v4573_v41 }
 0x738   : > { %3172 = vmatprep.subr.bf16.mxu0 %v4578_v33 }
 0x73b   : > { %3173 = vmatpush1.bf16.msra.mxu0 %v4576_v37 }
 0x73c   : > { %3174 = vmatprep.subr.bf16.mxu0 %v4581_v49 }
 0x73f   : > { %3175 = vmatpush1.bf16.msra.mxu0 %v4579_v39 }
 0x740   : > { %3227 = vmatprep.subr.bf16.mxu0 %v4585_v51 }
 0x742   : > { %4275 = vmatmul.mubr.msk.bf16.vlgmr.msra.gmra.mrb[28].mxu0 %vm1239_vm6, %v5427_v53  ;;  %v2814_v53 = vand.u32 1, %v4794_v4  ;;  %v5564_v4 = vpack.i.bf16 %v5549_v55, %v5549_v55 }
 0x743   : > { %3259 = vmatprep.mubr.bf16.mxu0 %v4605_v1  ;;  %3228 = vmatpush1.bf16.msra.mxu0 %v4583_v43 }
 0x744   : > { %v2815_v54 = vadd.s32 4294967295, %v2814_v53  ;;  %v2872_v57 = vadd.s32 1, %v2814_v53 }
 0x746   : > { %vm2816_vm9 = vcmp.ge.s32.totalorder %v2815_v54, 0  ;;  %vm2874_vm6 = vcmp.lt.s32.totalorder %v2872_v57, 2  ;;  %v3497_v57 = vadd.s32 1, %v4802_v6 }
 0x747   : > { %v4262_v56 = vsel %vm2816_vm9, 1.0, %v5549_v55  ;;  %v4263_v62 = vsel %vm2874_vm6, 1.0, %v5549_v55 }
 0x748   : > { %v4492_v38 = vpack.i.bf16 %v4262_v56, %v4263_v62  ;;  %2822 = vrot.lane.b32.xlu1 %v4262_v56, %s6211_s8  ;;  %vm3501_vm12 = vcmp.lt.s32.totalorder %v3497_v57, 16 }
 0x74a   : > { %4493 = vrot.lane.b32.xlu0 %v4492_v38, %s6194_s0 }
 0x74c   : > { %2953 = vrot.lane.b32.xlu1 %v4263_v62, %s6193_s29 }
 0x74e   : > { %2973 = vrot.lane.b32.xlu0 %v4262_v56, %s6193_s29  ;;  %v3498_v56 = vadd.s32 1, %v4808_v11 }
 0x750   : > { %2844 = vrot.lane.b32.xlu1 %v5549_v55, %s6202_s6  ;;  %vm3502_vm2 = vcmp.lt.s32.totalorder %v3498_v56, 16 }
 0x752   : > { %3005 = vrot.lane.b32.xlu0 %v4263_v62, %s6212_s10 }
 0x754   : > { %2902 = vrot.lane.b32.xlu1 %v5549_v55, %s6187_s25 }
 0x756   : > { %2934 = vrot.lane.b32.xlu0 %v5549_v55, %s6187_s25 }
 0x758   : > { %4498 = vrot.lane.b32.xlu1 %v5564_v4, %s6207_s24 }
 0x75a   : > { %3015 = vrot.lane.b32.xlu0 %v5549_v55, %s6203_s26 }
 0x7ba   : > { %v2823_v9 = vpop.permute.xlu1 %2822 }
 0x7bb   : > { %v2825_v7 = vmul.f32 %v5549_v55, %v2823_v9 }
 0x7bc   : > { %v4494_v35 = vpop.permute.xlu0 %4493 }
 0x7bd   : > { %2829 = vrot.lane.b32.xlu1 %v2825_v7, %s6212_s10  ;;  %v4495_v13 = vunpack.i.l.bf16 %v4494_v35  ;;  %v4496_v46 = vunpack.i.h.bf16 %v4494_v35  ;;  %v3356_v7 = vadd.s32 4294967295, %v4802_v6  ;;  %v4586_v35 = vld [vmem:[%s6112_s21 + $0x4] ss:$8 sps:$4 sm:$0xff]  }
 0x7be   : > { %v2954_v40 = vpop.permute.xlu1 %2953 }
 0x7bf   : > { %v2882_v48 = vmul.f32 %v5549_v55, %v4495_v13  ;;  %v2921_v50 = vmul.f32 %v5549_v55, %v4496_v46  ;;  %vm3358_vm7 = vcmp.ge.s32.totalorder %v3356_v7, 0 }
 0x7c0   : > { %v2974_v42 = vpop.permute.xlu0 %2973 }
 0x7c1   : > { %2857 = vrot.lane.b32.xlu1 %v5549_v55, %s6207_s24 }
 0x7c2   : > { %v2845_v26 = vpop.permute.xlu1 %2844 }
 0x7c3   : > { %v2847_v39 = vmul.f32 %v5549_v55, %v2845_v26 }
 0x7c4   : > { %v3006_v52 = vpop.permute.xlu0 %3005 }
 0x7c5   : > { %2886 = vrot.lane.b32.xlu1 %v2882_v48, %s6193_s29 }
 0x7c6   : > { %v2903_v44 = vpop.permute.xlu1 %2902 }
 0x7c7   : > { %v2905_v54 = vmul.f32 %v5549_v55, %v2903_v44 }
 0x7c8   : > { %v2935_v37 = vpop.permute.xlu0 %2934 }
 0x7c9   : > { %2925 = vrot.lane.b32.xlu1 %v2921_v50, %s6193_s29  ;;  %v2937_v22 = vmul.f32 %v5549_v55, %v2935_v37 }
 0x7ca   : > { %v4499_v49 = vpop.permute.xlu1 %4498 }
 0x7cb   : > { %v4500_v51 = vunpack.i.l.bf16 %v4499_v49 }
 0x805   : > { %v2743_v47 = vpop.f32.mrb[24].mxu0 }
 0x806   : > { %v2744_v0 = vadd.f32 %v2743_v47, %v2690_v5  ;;  %v2745_v8 = vpop.f32.mrb[25].mxu0  ;;  %v4501_v5 = vunpack.i.h.bf16 %v4499_v49  ;;  %v4284_v47 = vsel %vm3501_vm12, 1.0, %v5549_v55 }
 0x807   : > { %v2746_v58 = vpop.f32.mrb[26].mxu0 }
 0x808   : > { %v2747_v10 = vadd.f32 %v2746_v58, %v2695_v45  ;;  %v2748_v12 = vpop.f32.mrb[27].mxu0  ;;  %v2750_v14 = vmax.f32 %v2744_v0, 0.0  ;;  %v1778_v45 = vld [vmem:[%s6214_s9] sm:$0xf]  ;;  %v4285_v0 = vsel %vm3502_vm2, 1.0, %v5549_v55 }
 0x809   : > { %v4507_v58 = vpack.i.bf16 %v4285_v0, %v4284_v47 }
 0x80a   : > { %v2751_v16 = vmax.f32 %v2747_v10, 0.0  ;;  %v3357_v10 = vadd.s32 4294967295, %v4808_v11  ;;  %v4282_v11 = vsel %vm3358_vm7, 1.0, %v5549_v55 }
 0x80c   : > { %v2754_v17 = vpack.c.bf16 %v2751_v16, %v2750_v14  ;;  %vm3359_vm5 = vcmp.ge.s32.totalorder %v3357_v10, 0 }
 0x80e   : > { %4341 = vmatmul.mubr.msk.bf16.vlgmr.msra.gmra.mrb[8].mxu1 %vm2089_vm13, %v2754_v17  ;;  %4278 = vmatmul.mubr.msk.bf16.vlgmr.msra.gmra.mrb[28].mxu0 %vm2089_vm13, %v2754_v17 }
 0x80f   : > { %3326 = vmatprep.mubr.bf16.mxu0 %v4605_v1  ;;  %4266 = vmatprep.mubr.msk.bf16.mxu1 %vm2089_vm13, %v4586_v35 }
 0x82f   : > { %v2830_v16 = vpop.permute.xlu1 %2829 }
 0x833   : > { %v2858_v17 = vpop.permute.xlu1 %2857 }
 0x8e1   : > { %v2798_v59 = vpop.f32.mrb[8].mxu1 }
 0x8e2   : > { %2805 = vst.msk [vmem:[#allocation3 + $0x8] sm:$0xff] %vm763_vm1, %v2798_v59  ;;  %v4342_v61 = vpop.f32.mrb[9].mxu1 }
 0x8e3   : > { %v2801_v63 = vpop.f32.mrb[10].mxu1  ;;  %2808 = vst.msk [vmem:[#allocation3 + $0x8] sm:$0xff] %vm2807_vm3, %v5549_v55 }
 0x8e4   : > { %2806 = vst.msk [vmem:[#allocation3 + $0x28] sm:$0xff] %vm763_vm1, %v2801_v63  ;;  %v4343_v2 = vpop.f32.mrb[11].mxu1 }
 0x8e5   : > { %2810 = vst.msk [vmem:[#allocation3 + $0x28] sm:$0xff] %vm2807_vm3, %v5549_v55 }
 0x8ea   : > { %v2952_v24 = vld [vmem:[#allocation3 + $0x8] sm:$0xff] }
 0x8eb   : > { %v2956_v25 = vmul.f32 %v2954_v40, %v2952_v24  ;;  %2859 = vrot.lane.b32.xlu0 %v2952_v24, %s6207_s24  ;;  %2949 = vst.msk [vmem:[#allocation2 + $0x40] sm:$0xff] %vm763_vm1, %v2952_v24  ;;  %v2826_v29 = vmul.f32 %v2952_v24, %v2823_v9  ;;  %v2883_v31 = vmul.f32 %v4495_v13, %v2952_v24  ;;  %v3016_v9 = vpop.permute.xlu0 %3015  ;;  %v4283_v13 = vsel %vm3359_vm5, 1.0, %v5549_v55 }
 0x8ec   : > { %v2894_v27 = vld [vmem:[#allocation3 + $0x28] sm:$0xff]  ;;  %v3008_v32 = vmul.f32 %v3006_v52, %v2952_v24  ;;  %v2922_v33 = vmul.f32 %v4496_v46, %v2952_v24  ;;  %v2976_v43 = vmul.f32 %v2974_v42, %v2952_v24  ;;  %v4502_v14 = vpack.i.bf16 %v4283_v13, %v4282_v11  ;;  %v2887_v46 = vpop.permute.xlu1 %2886 }
 0x8ed   : > { %2958 = vrot.lane.b32.xlu1 %v2956_v25, %s6194_s0  ;;  %2951 = vst.msk [vmem:[#allocation2 + $0xd0] sm:$0xff] %vm763_vm1, %v2894_v27  ;;  %v2906_v41 = vmul.f32 %v2903_v44, %v2894_v27  ;;  %v2966_v53 = vmul.f32 %v4500_v51, %v2894_v27  ;;  %v2938_v38 = vmul.f32 %v2935_v37, %v2894_v27 }
 0x8ee   : > { %v2986_v8 = vmul.f32 %v4501_v5, %v2894_v27  ;;  %v3018_v12 = vmul.f32 %v3016_v9, %v2894_v27 }
 0x8ef   : > { %2831 = vrot.lane.b32.xlu0 %v2826_v29, %s6212_s10 }
 0x8f0   : > { %v2926_v48 = vpop.permute.xlu1 %2925 }
 0x8f1   : > { %2994 = vrot.lane.b32.xlu1 %v2952_v24, %s6187_s25 }
 0x8f2   : > { %v3028_v51 = vld [vmem:[#allocation2 + $0x40] sm:$0xff] }
 0x8f3   : > { %2888 = vrot.lane.b32.xlu0 %v2883_v31, %s6193_s29 }
 0x8f5   : > { %3010 = vrot.lane.b32.xlu1 %v3008_v32, %s6211_s8 }
 0x8f7   : > { %2927 = vrot.lane.b32.xlu0 %v2922_v33, %s6193_s29 }
 0x8f9   : > { %2911 = vrot.lane.b32.xlu1 %v2906_v41, %s6207_s24 }
 0x8fb   : > { %2849 = vrot.lane.b32.xlu0 %v2847_v39, %s6203_s26  ;;  %s6213_s26 = sld [smem:[#allocation11_spill]] }
 0x8fd   : > { %2941 = vrot.lane.b32.xlu1 %v2937_v22, %s6207_s24 }
 0x8ff   : > { %2978 = vrot.lane.b32.xlu0 %v2976_v43, %s6194_s0 }
 0x901   : > { %2968 = vrot.lane.b32.xlu1 %v2966_v53, %s6187_s25  ;;  %v3053_v62 = vld [vmem:[%s6213_s26] sm:$0xff]  ;;  %v3054_v6 = vld [vmem:[%s6213_s26 + $0x8] sm:$0xff] }
 0x903   : > { %2909 = vrot.lane.b32.xlu0 %v2905_v54, %s6207_s24 }
 0x905   : > { %3000 = vrot.lane.b32.xlu1 %v2894_v27, %s6205_s5  ;;  %s4647_s5 = smov 113  }
 0x907   : > { %2866 = vrot.lane.b32.xlu0 %v5549_v55, %s6204_s7  ;;  %s6217_s7 = sld [smem:[#allocation5_spill]] }
 0x909   : > { %3057 = vperm.xlu1 %4441, %v3053_v62  }
 0x90b   : > { %2943 = vrot.lane.b32.xlu0 %v2938_v38, %s6207_s24 }
 0x90d   : > { %1781 = vperm.xlu1 %4441, %v1778_v45  }
 0x90f   : > { %2988 = vrot.lane.b32.xlu0 %v2986_v8, %s6187_s25  ;;  %s4648_s25 = smov 17  }
 0x911   : > { %4508 = vrot.lane.b32.xlu1 %v4507_v58, %s4647_s5 }
 0x913   : > { %3020 = vrot.lane.b32.xlu0 %v3018_v12, %s6202_s6  ;;  %s4649_s6 = smov 111  }
 0x915   : > { %4518 = vrot.lane.b32.xlu1 %v4507_v58, %s6193_s29 }
 0x917   : > { %3062 = vperm.xlu0 %4410, %v3054_v6   ;;  %v3037_v6 = vld [vmem:[#allocation2 + $0xd0] sm:$0xff] }
 0x919   : > { %4528 = vrot.lane.b32.xlu1 %v4507_v58, %s4648_s25 }
 0x91b   : > { %4503 = vrot.lane.b32.xlu0 %v4502_v14, %s4649_s6 }
 0x91f   : > { %4513 = vrot.lane.b32.xlu0 %v4502_v14, %s6194_s0 }
 0x923   : > { %4523 = vrot.lane.b32.xlu0 %v4502_v14, %s4650_s1 }
 0x95d   : > { %v2860_v50 = vpop.permute.xlu0 %2859 }
 0x95e   : > { %v2861_v59 = vsel %vm1633_vm14, %v2858_v17, %v2860_v50 }
 0x95f   : > { %2863 = vst.msk [vmem:[#allocation2 + $0x10] sm:$0xff] %vm763_vm1, %v2861_v59  ;;  %v2959_v61 = vpop.permute.xlu1 %2958 }
 0x960   : > { %2961 = vst.msk [vmem:[#allocation2 + $0x50] sm:$0xff] %vm763_vm1, %v2959_v61 }
 0x961   : > { %v2832_v63 = vpop.permute.xlu0 %2831 }
 0x962   : > { %v2833_v2 = vsel %vm2521_vm15, %v2830_v16, %v2832_v63  ;;  %vm3588_vm15 = vcmask 1039360  }
 0x963   : > { %2835 = vst.msk [vmem:[#allocation2] sm:$0xff] %vm763_vm1, %v2833_v2  ;;  %v2995_v40 = vpop.permute.xlu1 %2994 }
 0x964   : > { %2997 = vst.msk [vmem:[#allocation2 + $0x70] sm:$0xff] %vm763_vm1, %v2995_v40 }
 0x965   : > { %v2889_v42 = vpop.permute.xlu0 %2888 }
 0x966   : > { %v2890_v24 = vsel %vm2154_vm8, %v2887_v46, %v2889_v42  ;;  %v3025_v52 = vld [vmem:[#allocation2 + $0x10] sm:$0xff] }
 0x967   : > { %2892 = vst.msk [vmem:[#allocation2 + $0x20] sm:$0xff] %vm763_vm1, %v2890_v24  ;;  %v3011_v25 = vpop.permute.xlu1 %3010  ;;  %v3029_v43 = vld [vmem:[#allocation2 + $0x50] sm:$0xff] }
 0x968   : > { %3013 = vst.msk [vmem:[#allocation2 + $0x80] sm:$0xff] %vm763_vm1, %v3011_v25  ;;  %v3046_v57 = vpack.c.bf16 %v3029_v43, %v3028_v51  ;;  %v4588_v25 = vld [vmem:[%s6112_s21] ss:$8 sps:$4 sm:$0xff]  }
 0x969   : > { %v2928_v26 = vpop.permute.xlu0 %2927 }
 0x96a   : > { %v2929_v27 = vsel %vm2154_vm8, %v2926_v48, %v2928_v26  ;;  %v3024_v29 = vld [vmem:[#allocation2] sm:$0xff] }
 0x96b   : > { %2931 = vst.msk [vmem:[#allocation2 + $0x30] sm:$0xff] %vm763_vm1, %v2929_v27  ;;  %v3044_v31 = vpack.c.bf16 %v3025_v52, %v3024_v29  ;;  %v2912_v32 = vpop.permute.xlu1 %2911  ;;  %v3031_v56 = vld [vmem:[#allocation2 + $0x70] sm:$0xff] }
 0x96d   : > { %v2850_v44 = vpop.permute.xlu0 %2849  ;;  %3078 = vmatpush1.bf16.msra.mxu1 %v3044_v31 }
 0x96e   : > { %2852 = vst.msk [vmem:[#allocation2 + $0x90] sm:$0xff] %vm763_vm1, %v2850_v44  ;;  %3079 = vmatprep.subr.bf16.mxu1 %v4605_v1  ;;  %v3026_v37 = vld [vmem:[#allocation2 + $0x20] sm:$0xff] }
 0x96f   : > { %v2942_v41 = vpop.permute.xlu1 %2941  ;;  %v3032_v47 = vld [vmem:[#allocation2 + $0x80] sm:$0xff] }
 0x971   : > { %v2979_v33 = vpop.permute.xlu0 %2978 }
 0x972   : > { %2981 = vst.msk [vmem:[#allocation2 + $0x60] sm:$0xff] %vm763_vm1, %v2979_v33  ;;  %v3027_v49 = vld [vmem:[#allocation2 + $0x30] sm:$0xff] }
 0x973   : > { %v3045_v39 = vpack.c.bf16 %v3027_v49, %v3026_v37  ;;  %v2969_v22 = vpop.permute.xlu1 %2968 }
 0x974   : > { %2971 = vst.msk [vmem:[#allocation2 + $0xe0] sm:$0xff] %vm763_vm1, %v2969_v22 }
 0x975   : > { %v2910_v53 = vpop.permute.xlu0 %2909  ;;  %3080 = vmatpush1.bf16.msra.mxu1 %v3045_v39  ;;  %v3033_v0 = vld [vmem:[#allocation2 + $0x90] sm:$0xff] }
 0x976   : > { %v2913_v54 = vsel %vm1633_vm14, %v2910_v53, %v2912_v32  ;;  %3081 = vmatprep.subr.bf16.mxu1 %v4605_v1  ;;  %v3048_v58 = vpack.c.bf16 %v3033_v0, %v3032_v47  ;;  %v4279_v0 = vld.sshfl [vmem:[%s6105_s14] sm:$0x33 pattern:$0x76325410] }
 0x977   : > { %2915 = vst.msk [vmem:[#allocation2 + $0xb0] sm:$0xff] %vm763_vm1, %v2913_v54  ;;  %v3001_v62 = vpop.permute.xlu1 %3000 }
 0x978   : > { %3003 = vst.msk [vmem:[#allocation2 + $0x100] sm:$0xff] %vm763_vm1, %v3001_v62 }
 0x979   : > { %v2867_v38 = vpop.permute.xlu0 %2866  ;;  %3082 = vmatpush1.bf16.msra.mxu1 %v3046_v57  ;;  %v3030_v5 = vld [vmem:[#allocation2 + $0x60] sm:$0xff] }
 0x97a   : > { %2869 = vst.msk [vmem:[#allocation2 + $0xa0] sm:$0xff] %vm763_vm1, %v2867_v38  ;;  %3083 = vmatprep.subr.bf16.mxu1 %v4605_v1  ;;  %v3047_v45 = vpack.c.bf16 %v3031_v56, %v3030_v5 }
 0x97b   : > { %v3038_v16 = vld [vmem:[#allocation2 + $0xe0] sm:$0xff] }
 0x97d   : > { %v2944_v8 = vpop.permute.xlu0 %2943  ;;  %3084 = vmatpush1.bf16.msra.mxu1 %v3047_v45 }
 0x97e   : > { %v2945_v9 = vsel %vm1633_vm14, %v2942_v41, %v2944_v8  ;;  %3085 = vmatprep.subr.bf16.mxu1 %v4605_v1  ;;  %v3035_v12 = vld [vmem:[#allocation2 + $0xb0] sm:$0xff]  ;;  %vm3374_vm14 = vcmask 908288   ;;  %v3284_v8 = vcombine.high %v4279_v0, %v4279_v0 }
 0x97f   : > { %2947 = vst.msk [vmem:[#allocation2 + $0xc0] sm:$0xff] %vm763_vm1, %v2945_v9  ;;  %v3040_v50 = vld [vmem:[#allocation2 + $0x100] sm:$0xff]  ;;  %v3289_v9 = vsel %vm770_vm0, %v4279_v0, 0 }
 0x980   : > { %4280 = vmatprep.subr.msk.bf16.mxu0 %vm770_vm0, %v3284_v8  ;;  %vm3415_vm0 = vcmask 138240  }
 0x981   : > { %3086 = vmatpush1.bf16.msra.mxu1 %v3048_v58  ;;  %v2989_v7 = vpop.permute.xlu0 %2988  ;;  %v3034_v10 = vld [vmem:[#allocation2 + $0xa0] sm:$0xff]  ;;  %3295 = vmatpush1.bf16.msra.mxu0 %v3289_v9 }
 0x982   : > { %2991 = vst.msk [vmem:[#allocation2 + $0xf0] sm:$0xff] %vm763_vm1, %v2989_v7  ;;  %3087 = vmatprep.subr.bf16.mxu1 %v4605_v1  ;;  %v3049_v35 = vpack.c.bf16 %v3035_v12, %v3034_v10 }
 0x985   : > { %3088 = vmatpush1.bf16.msra.mxu1 %v3049_v35  ;;  %v3021_v11 = vpop.permute.xlu0 %3020 }
 0x986   : > { %3023 = vst.msk [vmem:[#allocation2 + $0x110] sm:$0xff] %vm763_vm1, %v3021_v11  ;;  %3089 = vmatprep.subr.bf16.mxu1 %v4605_v1  ;;  %v3036_v13 = vld [vmem:[#allocation2 + $0xc0] sm:$0xff] }
 0x987   : > { %v3050_v14 = vpack.c.bf16 %v3037_v6, %v3036_v13 }
 0x988   : > { %v5666_v17 = vpop.permute.xlu1 %3057 }
 0x989   : > { %3090 = vmatpush1.bf16.msra.mxu1 %v3050_v14  ;;  %v3039_v46 = vld [vmem:[#allocation2 + $0xf0] sm:$0xff] }
 0x98a   : > { %3091 = vmatprep.subr.bf16.mxu1 %v4605_v1  ;;  %v3051_v48 = vpack.c.bf16 %v3039_v46, %v3038_v16 }
 0x98c   : > { %v1782_v59 = vpop.permute.xlu1 %1781 }
 0x98d   : > { %v1828_v61 = vadd.f32 %v5421_v60, %v1782_v59  ;;  %v1830_v63 = vadd.f32 %v5423_v15, %v1782_v59  ;;  %3092 = vmatpush1.bf16.msra.mxu1 %v3051_v48  ;;  %v3041_v2 = vld [vmem:[#allocation2 + $0x110] sm:$0xff] }
 0x98e   : > { %3093 = vmatprep.subr.bf16.mxu1 %v4605_v1  ;;  %v3052_v40 = vpack.c.bf16 %v3041_v2, %v3040_v50 }
 0x98f   : > { %v1834_v42 = vmax.f32 %v1828_v61, 0.0  ;;  %v1835_v24 = vmax.f32 %v1830_v63, 0.0 }
 0x990   : > { %v4509_v41 = vpop.permute.xlu1 %4508 }
 0x991   : > { %v1840_v26 = vadd.f32 %v5212_v19, %v1834_v42  ;;  %v1841_v27 = vadd.f32 %v5214_v20, %v1835_v24  ;;  %3094 = vmatpush1.bf16.msra.mxu1 %v3052_v40  ;;  %v4510_v33 = vunpack.i.l.bf16 %v4509_v41  ;;  %v5702_v37 = vunpack.i.h.bf16 %v4509_v41 }
 0x993   : > { %3345 = vst [vmem:[#allocation3 + $0x48] sm:$0xf] %v1840_v26  ;;  %3346 = vst [vmem:[#allocation3 + $0x50] sm:$0xf] %v1841_v27  ;;  %v3520_v49 = vmul.f32 %v5549_v55, %v4510_v33  ;;  %v5711_v39 = vsel %vm3515_vm10, %v4510_v33, %v5702_v37 }
 0x994   : > { %3110 = vmatmul.mubr.bf16.vlgmr.msra.gmra.mrb[12].mxu1 %v4588_v25  ;;  %v4519_v38 = vpop.permute.xlu1 %4518 }
 0x995   : > { %v4521_v5 = vunpack.i.h.bf16 %v4519_v38  ;;  %v5744_v58 = vunpack.i.l.bf16 %v4519_v38 }
 0x996   : > { %v5677_v60 = vpop.permute.xlu0 %3062 }
 0x997   : > { %v3681_v47 = vmul.f32 %v5549_v55, %v4521_v5  ;;  %v5751_v7 = vsel %vm2154_vm8, %v5744_v58, %v4521_v5 }
 0x998   : > { %v5761_v35 = vpop.permute.xlu1 %4528 }
 0x99a   : > { %v5679_v15 = vld [vmem:[#allocation3 + $0x48] sm:$0xff]  ;;  %v4504_v1 = vpop.permute.xlu0 %4503  ;;  %v5681_v29 = vld [vmem:[#allocation3 + $0x50] sm:$0xff] }
 0x99b   : > { %3657 = vst [vmem:[#allocation2 + $0xe0] sm:$0xff] %v5679_v15  ;;  %v5684_v52 = vunpack.i.h.bf16 %v4504_v1  ;;  %v4505_v31 = vunpack.i.l.bf16 %v4504_v1  ;;  %v3527_v51 = vmul.f32 %v5679_v15, %v5711_v39  ;;  %v3528_v54 = vmul.f32 %v5702_v37, %v5681_v29 }
 0x99c   : > { %v3683_v10 = vmul.f32 %v5751_v7, %v5681_v29  ;;  %v3682_v12 = vmul.f32 %v5744_v58, %v5679_v15 }
 0x99d   : > { %v3379_v19 = vmul.f32 %v5549_v55, %v4505_v31  ;;  %v5689_v20 = vsel %vm3374_vm14, %v4505_v31, %v5684_v52  ;;  %v3387_v32 = vmul.f32 %v5684_v52, %v5681_v29 }
 0x99e   : > { %v3386_v44 = vmul.f32 %v5679_v15, %v5689_v20  ;;  %v4514_v22 = vpop.permute.xlu0 %4513 }
 0x99f   : > { %3397 = vrot.lane.b32.xlu0 %v3379_v19, %s4648_s25  ;;  %3403 = vrot.lane.b32.xlu1 %v3379_v19, %s4648_s25  ;;  %v5718_v43 = vunpack.i.h.bf16 %v4514_v22  ;;  %v4515_v53 = vunpack.i.l.bf16 %v4514_v22 }
 0x9a1   : > { %v5726_v57 = vsel %vm3588_vm15, %v4515_v53, %v5718_v43  ;;  %v3593_v56 = vmul.f32 %v5549_v55, %v4515_v53  ;;  %v3601_v45 = vmul.f32 %v5718_v43, %v5681_v29 }
 0x9a2   : > { %v3600_v62 = vmul.f32 %v5679_v15, %v5726_v57  ;;  %v5763_v6 = vpop.permute.xlu0 %4523 }
 0x9a3   : > { %3413 = vrot.lane.b32.xlu1 %v3387_v32, %s4648_s25  ;;  %3411 = vrot.lane.b32.xlu0 %v3386_v44, %s4648_s25 }
 0x9a7   : > { %4533 = vrot.lane.b32.xlu1 %v5564_v4, %s6215_s16  ;;  %3409 = vrot.lane.b32.xlu0 %v3379_v19, %s4648_s25 }
 0x9ab   : > { %3468 = vrot.lane.b32.xlu1 %v5681_v29, %s6215_s16  ;;  %3466 = vrot.lane.b32.xlu0 %v5679_v15, %s6215_s16 }
 0x9af   : > { %3464 = vrot.lane.b32.xlu0 %v5549_v55, %s6215_s16  ;;  %3538 = vrot.lane.b32.xlu1 %v3520_v49, %s4650_s1 }
 0x9b3   : > { %3544 = vrot.lane.b32.xlu0 %v3520_v49, %s4650_s1  ;;  %3552 = vrot.lane.b32.xlu1 %v3527_v51, %s4650_s1 }
 0x9b7   : > { %3554 = vrot.lane.b32.xlu0 %v3528_v54, %s4650_s1  ;;  %3550 = vrot.lane.b32.xlu1 %v3520_v49, %s4650_s1 }
 0x9bb   : > { %3611 = vrot.lane.b32.xlu0 %v3593_v56, %s6193_s29  ;;  %3625 = vrot.lane.b32.xlu1 %v3600_v62, %s6193_s29 }
 0x9bf   : > { %3627 = vrot.lane.b32.xlu0 %v3601_v45, %s6193_s29  ;;  %3617 = vrot.lane.b32.xlu1 %v3593_v56, %s6193_s29 }
 0x9c3   : > { %3623 = vrot.lane.b32.xlu0 %v3593_v56, %s6193_s29  ;;  %3704 = vrot.lane.b32.xlu1 %v3681_v47, %s6194_s0 }
 0x9c7   : > { %3698 = vrot.lane.b32.xlu0 %v3681_v47, %s6194_s0  ;;  %3710 = vrot.lane.b32.xlu1 %v3681_v47, %s6194_s0 }
 0x9cb   : > { %3708 = vrot.lane.b32.xlu0 %v3683_v10, %s6194_s0  ;;  %3706 = vrot.lane.b32.xlu1 %v3682_v12, %s6194_s0 }
 0xa11   : > { %v5765_v11 = vpop.permute.xlu0 %3397  ;;  %v5767_v13 = vpop.permute.xlu1 %3403 }
 0xa15   : > { %v3412_v14 = vpop.permute.xlu0 %3411  ;;  %v3414_v16 = vpop.permute.xlu1 %3413 }
 0xa16   : > { %v5770_v46 = vsel %vm3415_vm0, %v3412_v14, %v3414_v16 }
 0xa19   : > { %v3410_v48 = vpop.permute.xlu0 %3409  ;;  %v5772_v50 = vpop.permute.xlu1 %4533 }
 0xa1a   : > { %v5775_v59 = vsel %vm3415_vm0, %v3410_v48, %v3412_v14 }
 0xa1b   : > { %3432 = vst [vmem:[#allocation2 + $0x20] sm:$0xff] %v5775_v59 }
 0xa1d   : > { %v3467_v61 = vpop.permute.xlu0 %3466  ;;  %v3469_v63 = vpop.permute.xlu1 %3468 }
 0xa1e   : > { %v5779_v2 = vsel %vm2089_vm13, %v3467_v61, %v3469_v63 }
 0xa21   : > { %v3465_v40 = vpop.permute.xlu0 %3464  ;;  %v5781_v42 = vpop.permute.xlu1 %3538 }
 0xa22   : > { %v5784_v24 = vsel %vm2089_vm13, %v3465_v40, %v3467_v61 }
 0xa23   : > { %3486 = vst [vmem:[#allocation2 + $0x50] sm:$0xff] %v5784_v24 }
 0xa25   : > { %v5787_v25 = vpop.permute.xlu0 %3544  ;;  %v3553_v26 = vpop.permute.xlu1 %3552 }
 0xa29   : > { %v3555_v27 = vpop.permute.xlu0 %3554  ;;  %v3551_v1 = vpop.permute.xlu1 %3550 }
 0xa2a   : > { %v5790_v31 = vsel %vm3556_vm11, %v3553_v26, %v3555_v27  ;;  %v5793_v19 = vsel %vm3556_vm11, %v3551_v1, %v3553_v26  ;;  %v4525_v1 = vunpack.i.l.bf16 %v5763_v6 }
 0xa2b   : > { %3573 = vst [vmem:[#allocation2 + $0x80] sm:$0xff] %v5793_v19 }
 0xa2d   : > { %v5796_v32 = vpop.permute.xlu0 %3611  ;;  %v3626_v44 = vpop.permute.xlu1 %3625 }
 0xa31   : > { %v3628_v41 = vpop.permute.xlu0 %3627  ;;  %v5798_v33 = vpop.permute.xlu1 %3617 }
 0xa32   : > { %v5801_v49 = vsel %vm2154_vm8, %v3626_v44, %v3628_v41 }
 0xa35   : > { %v3624_v22 = vpop.permute.xlu0 %3623  ;;  %v5803_v51 = vpop.permute.xlu1 %3704 }
 0xa36   : > { %v5806_v53 = vsel %vm2154_vm8, %v3624_v22, %v3626_v44 }
 0xa37   : > { %3645 = vst [vmem:[#allocation2 + $0xb0] sm:$0xff] %v5806_v53 }
 0xa39   : > { %v5809_v54 = vpop.permute.xlu0 %3698  ;;  %v3711_v56 = vpop.permute.xlu1 %3710 }
 0xa3d   : > { %v3709_v62 = vpop.permute.xlu0 %3708  ;;  %v3707_v38 = vpop.permute.xlu1 %3706 }
 0xa3e   : > { %v5812_v5 = vsel %vm3588_vm15, %v3709_v62, %v3711_v56  ;;  %v5815_v45 = vsel %vm3588_vm15, %v3707_v38, %v3709_v62 }
 0xa3f   : > { %3728 = vst [vmem:[#allocation2 + $0x110] sm:$0xff] %v5815_v45 }
 0xa67   : > { %v3111_v47 = vpop.f32.mrb[12].mxu1 }
 0xa68   : > { %v3112_v0 = vadd.f32 %v3111_v47, %v5666_v17  ;;  %v3113_v8 = vpop.f32.mrb[13].mxu1 }
 0xa69   : > { %v3114_v9 = vpop.f32.mrb[14].mxu1 }
 0xa6a   : > { %v3115_v10 = vadd.f32 %v3114_v9, %v5677_v60  ;;  %v3116_v12 = vpop.f32.mrb[15].mxu1  ;;  %v3118_v14 = vmax.f32 %v3112_v0, 0.0 }
 0xa6c   : > { %v3119_v16 = vmax.f32 %v3115_v10, 0.0 }
 0xa6e   : > { %v3275_v48 = vpack.c.bf16 %v3119_v16, %v3118_v14 }
 0xa70   : > { %4281 = vmatmul.mubr.msk.bf16.vlgmr.msra.gmra.mrb[28].mxu0 %vm763_vm1, %v3275_v48  ;;  %vm4055_vm1 = vcmask 719872  }
 0xb43   : > { %v3328_v61 = vpop.f32.mrb[28].mxu0 }
 0xb44   : > { %v5823_v63 = vadd.f32 %v3328_v61, %v828_v36  ;;  %v3330_v40 = vpop.f32.mrb[29].mxu0  ;;  %v4526_v36 = vunpack.i.h.bf16 %v5763_v6  ;;  %v4589_v61 = vld [vmem:[%s6106_s15 + $0x4] ss:$8 sps:$4 sm:$0xff]  }
 0xb45   : > { %v5827_v26 = vadd.f32 %v3330_v40, %v829_v23  ;;  %v3332_v17 = vpop.f32.mrb[30].mxu0  ;;  %4291 = vmatprep.mubr.msk.bf16.mxu1 %vm4055_vm1, %v4589_v61 }
 0xb46   : > { %3341 = vst [vmem:[#allocation3 + $0x8] sm:$0xff] %v5823_v63  ;;  %v5832_v60 = vadd.f32 %v3332_v17, %v830_v34  ;;  %v3334_v27 = vpop.f32.mrb[31].mxu0  ;;  %3454 = vrot.lane.b32.xlu0 %v5823_v63, %s6215_s16  ;;  %3653 = vst [vmem:[#allocation2 + $0xc0] sm:$0xff] %v5823_v63  ;;  %v3380_v23 = vmul.f32 %v5823_v63, %v5689_v20  ;;  %v3521_v28 = vmul.f32 %v5823_v63, %v5711_v39 }
 0xb47   : > { %3342 = vst [vmem:[#allocation3 + $0x10] sm:$0xff] %v5827_v26  ;;  %v5840_v18 = vadd.f32 %v3334_v27, %v831_v3  ;;  %3456 = vrot.lane.b32.xlu1 %v5827_v26, %s6215_s16  ;;  %v3594_v3 = vmul.f32 %v5823_v63, %v5726_v57  ;;  %v3522_v30 = vmul.f32 %v5702_v37, %v5827_v26  ;;  %v4013_v27 = vld [vmem:[%s6217_s7] sm:$0xff] }
 0xb48   : > { %3343 = vst [vmem:[#allocation3 + $0x28] sm:$0xff] %v5832_v60  ;;  %3655 = vst [vmem:[#allocation2 + $0xd0] sm:$0xff] %v5832_v60  ;;  %v3676_v34 = vmul.f32 %v5744_v58, %v5823_v63  ;;  %v3595_v44 = vmul.f32 %v5718_v43, %v5827_v26  ;;  %v3381_v41 = vmul.f32 %v5684_v52, %v5827_v26 }
 0xb49   : > { %v3998_v21 = vpack.c.bf16 %v5840_v18, %v5827_v26  ;;  %v3743_v22 = vsel %vm3556_vm11, %v4525_v1, %v4526_v36  ;;  %v3383_v6 = vmul.f32 %v5832_v60, %v5689_v20  ;;  %v3677_v62 = vmul.f32 %v5827_v26, %v5751_v7 }
 0xb4a   : > { %3399 = vrot.lane.b32.xlu0 %v3380_v23, %s4648_s25  ;;  %v3748_v56 = vmul.f32 %v5827_v26, %v3743_v22  ;;  %v3679_v38 = vmul.f32 %v5744_v58, %v5832_v60  ;;  %v3524_v47 = vmul.f32 %v5832_v60, %v5711_v39  ;;  %v3747_v0 = vmul.f32 %v4525_v1, %v5823_v63  ;;  %v4014_v23 = vld [vmem:[%s6217_s7 + $0x8] sm:$0xff] }
 0xb4b   : > { %3540 = vrot.lane.b32.xlu1 %v3521_v28, %s4650_s1  ;;  %v3597_v20 = vmul.f32 %v5832_v60, %v5726_v57  ;;  %v3754_v8 = vmul.f32 %v3743_v22, %v5681_v29  ;;  %v3384_v58 = vmul.f32 %v5684_v52, %v5840_v18  ;;  %v3749_v39 = vmul.f32 %v5549_v55, %v4526_v36  ;;  %v4015_v28 = vld [vmem:[%s6217_s7 + $0x10] sm:$0xff] }
 0xb4c   : > { %v3753_v57 = vmul.f32 %v4525_v1, %v5679_v15  ;;  %v3525_v52 = vmul.f32 %v5702_v37, %v5840_v18  ;;  %v3750_v9 = vmul.f32 %v4525_v1, %v5832_v60  ;;  %v3598_v10 = vmul.f32 %v5718_v43, %v5840_v18 }
 0xb4d   : > { %v4531_v37 = vunpack.i.h.bf16 %v5761_v35  ;;  %v4530_v43 = vunpack.i.l.bf16 %v5761_v35  ;;  %v3680_v12 = vmul.f32 %v5840_v18, %v5751_v7 }
 0xb4e   : > { %3460 = vrot.lane.b32.xlu0 %v5832_v60, %s6215_s16 }
 0xb4f   : > { %3613 = vrot.lane.b32.xlu1 %v3594_v3, %s6193_s29  ;;  %v3869_v14 = vsel %vm3415_vm0, %v4530_v43, %v4531_v37  ;;  %v3875_v35 = vmul.f32 %v5549_v55, %v4531_v37  ;;  %v3873_v48 = vmul.f32 %v4530_v43, %v5823_v63  ;;  %v3879_v7 = vmul.f32 %v4530_v43, %v5679_v15  ;;  %v4016_v3 = vld [vmem:[%s6217_s7 + $0x18] sm:$0xff] }
 0xb50   : > { %v3874_v16 = vmul.f32 %v5827_v26, %v3869_v14  ;;  %v3876_v40 = vmul.f32 %v4530_v43, %v5832_v60  ;;  %v3880_v17 = vmul.f32 %v3869_v14, %v5681_v29 }
 0xb52   : > { %3542 = vrot.lane.b32.xlu0 %v3522_v30, %s4650_s1  ;;  %v4535_v30 = vunpack.i.l.bf16 %v5772_v50 }
 0xb53   : > { %3694 = vrot.lane.b32.xlu1 %v3676_v34, %s6194_s0 }
 0xb56   : > { %3615 = vrot.lane.b32.xlu0 %v3595_v44, %s6193_s29 }
 0xb57   : > { %3401 = vrot.lane.b32.xlu1 %v3381_v41, %s4648_s25 }
 0xb5a   : > { %3767 = vrot.lane.b32.xlu0 %v3748_v56, %s4647_s5 }
 0xb5b   : > { %3462 = vrot.lane.b32.xlu1 %v5840_v18, %s6215_s16 }
 0xb5e   : > { %3405 = vrot.lane.b32.xlu0 %v3383_v6, %s4648_s25 }
 0xb5f   : > { %3696 = vrot.lane.b32.xlu1 %v3677_v62, %s6194_s0  ;;  %v4536_v62 = vunpack.i.h.bf16 %v5772_v50 }
 0xb62   : > { %3700 = vrot.lane.b32.xlu0 %v3679_v38, %s6194_s0 }
 0xb63   : > { %3546 = vrot.lane.b32.xlu1 %v3524_v47, %s4650_s1 }
 0xb66   : > { %3765 = vrot.lane.b32.xlu0 %v3747_v0, %s4647_s5 }
 0xb67   : > { %3619 = vrot.lane.b32.xlu1 %v3597_v20, %s6193_s29 }
 0xb6a   : > { %3779 = vrot.lane.b32.xlu0 %v3754_v8, %s4647_s5 }
 0xb6b   : > { %3407 = vrot.lane.b32.xlu1 %v3384_v58, %s4648_s25 }
 0xb6e   : > { %3821 = vrot.lane.b32.xlu0 %v5827_v26, %s6216_s2 }
 0xb6f   : > { %3769 = vrot.lane.b32.xlu1 %v3749_v39, %s4647_s5 }
 0xb72   : > { %3777 = vrot.lane.b32.xlu0 %v3753_v57, %s4647_s5 }
 0xb73   : > { %3775 = vrot.lane.b32.xlu1 %v3749_v39, %s4647_s5 }
 0xb76   : > { %3548 = vrot.lane.b32.xlu0 %v3525_v52, %s4650_s1 }
 0xb77   : > { %3771 = vrot.lane.b32.xlu1 %v3750_v9, %s4647_s5 }
 0xb7a   : > { %3827 = vrot.lane.b32.xlu0 %v5840_v18, %s6216_s2 }
 0xb7b   : > { %3781 = vrot.lane.b32.xlu1 %v3749_v39, %s4647_s5 }
 0xb7e   : > { %3621 = vrot.lane.b32.xlu0 %v3598_v10, %s6193_s29  ;;  %s4296_s29 = sshll.u32 %s6219_s30, 6 }
 0xb7f   : > { %4538 = vrot.lane.b32.xlu1 %v5564_v4, %s6216_s2  ;;  %v3751_v4 = vmul.f32 %v5840_v18, %v3743_v22 }
 0xb82   : > { %3835 = vrot.lane.b32.xlu0 %v5549_v55, %s6216_s2  ;;  %v3877_v55 = vmul.f32 %v5840_v18, %v3869_v14 }
 0xb83   : > { %3819 = vrot.lane.b32.xlu1 %v5823_v63, %s6216_s2 }
 0xb86   : > { %3831 = vrot.lane.b32.xlu0 %v5679_v15, %s6216_s2 }
 0xb87   : > { %3833 = vrot.lane.b32.xlu1 %v5681_v29, %s6216_s2 }
 0xb8a   : > { %3702 = vrot.lane.b32.xlu0 %v3680_v12, %s6194_s0 }
 0xb8b   : > { %3825 = vrot.lane.b32.xlu1 %v5832_v60, %s6216_s2 }
 0xb8e   : > { %3773 = vrot.lane.b32.xlu0 %v3751_v4, %s4647_s5  ;;  %s6078_s5 = scalar_lea.vmem %s6114_s23, %s4296_s29 }
 0xb8f   : > { %3893 = vrot.lane.b32.xlu1 %v3874_v16, %s4649_s6 }
 0xb92   : > { %3895 = vrot.lane.b32.xlu0 %v3875_v35, %s4649_s6 }
 0xb93   : > { %3891 = vrot.lane.b32.xlu1 %v3873_v48, %s4649_s6 }
 0xb96   : > { %3901 = vrot.lane.b32.xlu0 %v3875_v35, %s4649_s6 }
 0xb97   : > { %3903 = vrot.lane.b32.xlu1 %v3879_v7, %s4649_s6 }
 0xb9a   : > { %3897 = vrot.lane.b32.xlu0 %v3876_v40, %s4649_s6 }
 0xb9b   : > { %3899 = vrot.lane.b32.xlu1 %v3877_v55, %s4649_s6 }
 0xb9e   : > { %3905 = vrot.lane.b32.xlu0 %v3880_v17, %s4649_s6 }
 0xb9f   : > { %3907 = vrot.lane.b32.xlu1 %v3875_v35, %s4649_s6 }
 0xba2   : > { %4019 = vperm.xlu0 %4410, %v4013_v27  }
 0xba3   : > { %4024 = vperm.xlu1 %4441, %v4014_v23  }
 0xba6   : > { %4029 = vperm.xlu0 %4410, %v4015_v28  }
 0xba7   : > { %4034 = vperm.xlu1 %4441, %v4016_v3  }
 0xbb8   : > { %v3455_v34 = vpop.permute.xlu0 %3454 }
 0xbb9   : > { %v3470_v36 = vsel %vm2089_vm13, %v4535_v30, %v3455_v34  ;;  %v3457_v1 = vpop.permute.xlu1 %3456 }
 0xbba   : > { %3482 = vst [vmem:[#allocation2 + $0x30] sm:$0xff] %v3470_v36  ;;  %v3471_v44 = vsel %vm2089_vm13, %v3455_v34, %v3457_v1 }
 0xbbc   : > { %v3400_v41 = vpop.permute.xlu0 %3399 }
 0xbbd   : > { %v3416_v22 = vsel %vm3415_vm0, %v5765_v11, %v3400_v41  ;;  %v3541_v56 = vpop.permute.xlu1 %3540 }
 0xbbe   : > { %3428 = vst [vmem:[#allocation2] sm:$0xff] %v3416_v22  ;;  %v5977_v6 = vsel %vm3556_vm11, %v5781_v42, %v3541_v56 }
 0xbbf   : > { %3569 = vst [vmem:[#allocation2 + $0x60] sm:$0xff] %v5977_v6 }
 0xbc0   : > { %v3461_v38 = vpop.permute.xlu0 %3460 }
 0xbc1   : > { %v3472_v47 = vsel %vm2089_vm13, %v4536_v62, %v3461_v38  ;;  %v3614_v0 = vpop.permute.xlu1 %3613 }
 0xbc2   : > { %3484 = vst [vmem:[#allocation2 + $0x40] sm:$0xff] %v3472_v47  ;;  %v5984_v20 = vsel %vm2154_vm8, %v5796_v32, %v3614_v0 }
 0xbc3   : > { %3641 = vst [vmem:[#allocation2 + $0x90] sm:$0xff] %v5984_v20 }
 0xbc4   : > { %v3543_v11 = vpop.permute.xlu0 %3542 }
 0xbc5   : > { %v3558_v8 = vsel %vm3556_vm11, %v3541_v56, %v3543_v11  ;;  %v3695_v42 = vpop.permute.xlu1 %3694  ;;  %v3989_v56 = vpack.c.bf16 %v5784_v24, %v3472_v47  ;;  %v3993_v24 = vpack.c.bf16 %v5984_v20, %v5793_v19 }
 0xbc8   : > { %v3616_v58 = vpop.permute.xlu0 %3615 }
 0xbc9   : > { %v3630_v50 = vsel %vm2154_vm8, %v3614_v0, %v3616_v58  ;;  %v3402_v39 = vpop.permute.xlu1 %3401 }
 0xbca   : > { %v3417_v57 = vsel %vm3415_vm0, %v3400_v41, %v3402_v39  ;;  %v3994_v0 = vpack.c.bf16 %v3630_v50, %v5790_v31 }
 0xbcc   : > { %v3768_v52 = vpop.permute.xlu0 %3767 }
 0xbcd   : > { %v3463_v9 = vpop.permute.xlu1 %3462 }
 0xbce   : > { %v3473_v10 = vsel %vm2089_vm13, %v3461_v38, %v3463_v9  ;;  %vm3837_vm13 = vcmask 916480  }
 0xbcf   : > { %v3990_v41 = vpack.c.bf16 %v5779_v2, %v3473_v10 }
 0xbd0   : > { %v3406_v37 = vpop.permute.xlu0 %3405 }
 0xbd1   : > { %v3418_v32 = vsel %vm3415_vm0, %v5767_v13, %v3406_v37  ;;  %v3697_v43 = vpop.permute.xlu1 %3696 }
 0xbd2   : > { %3430 = vst [vmem:[#allocation2 + $0x10] sm:$0xff] %v3418_v32  ;;  %v5994_v12 = vsel %vm3588_vm15, %v3695_v42, %v3697_v43  ;;  %v5998_v4 = vsel %vm3588_vm15, %v3697_v43, %v5809_v54  ;;  %v3985_v23 = vpack.c.bf16 %v3418_v32, %v3416_v22 }
 0xbd3   : > { %3724 = vst [vmem:[#allocation2 + $0xf0] sm:$0xff] %v5994_v12  ;;  %v4000_v10 = vpack.c.bf16 %v5998_v4, %v5681_v29  ;;  %v3999_v43 = vpack.c.bf16 %v5994_v12, %v5679_v15 }
 0xbd4   : > { %v6001_v14 = vpop.permute.xlu0 %3700 }
 0xbd5   : > { %v3547_v16 = vpop.permute.xlu1 %3546 }
 0xbd6   : > { %v3559_v35 = vsel %vm3556_vm11, %v5787_v25, %v3547_v16  ;;  %v3988_v25 = vpack.c.bf16 %v3471_v44, %v5770_v46 }
 0xbd7   : > { %3571 = vst [vmem:[#allocation2 + $0x70] sm:$0xff] %v3559_v35 }
 0xbd8   : > { %v3766_v48 = vpop.permute.xlu0 %3765 }
 0xbd9   : > { %v6006_v13 = vsel %vm3515_vm10, %v3766_v48, %v3768_v52  ;;  %v3620_v7 = vpop.permute.xlu1 %3619 }
 0xbda   : > { %v3631_v61 = vsel %vm2154_vm8, %v5798_v33, %v3620_v7  ;;  %v3987_v33 = vpack.c.bf16 %v3470_v36, %v5775_v59  ;;  %v3991_v59 = vpack.c.bf16 %v3559_v35, %v5977_v6 }
 0xbdb   : > { %3643 = vst [vmem:[#allocation2 + $0xa0] sm:$0xff] %v3631_v61 }
 0xbdc   : > { %v3780_v54 = vpop.permute.xlu0 %3779 }
 0xbdd   : > { %v3408_v40 = vpop.permute.xlu1 %3407 }
 0xbde   : > { %v3419_v55 = vsel %vm3415_vm0, %v3406_v37, %v3408_v40 }
 0xbdf   : > { %v3986_v17 = vpack.c.bf16 %v3419_v55, %v3417_v57  ;;  %v3995_v57 = vpack.c.bf16 %v5806_v53, %v3631_v61 }
 0xbe0   : > { %v3822_v27 = vpop.permute.xlu0 %3821 }
 0xbe1   : > { %v3770_v28 = vpop.permute.xlu1 %3769  ;;  %4068 = vmatprep.subr.bf16.mxu1 %v3986_v17 }
 0xbe2   : > { %v6013_v3 = vsel %vm3515_vm10, %v3768_v52, %v3770_v28  ;;  %4069 = vmatpush1.bf16.msra.mxu1 %v3985_v23 }
 0xbe3   : > { %4070 = vmatprep.subr.bf16.mxu1 %v3988_v25 }
 0xbe4   : > { %v3778_v30 = vpop.permute.xlu0 %3777 }
 0xbe5   : > { %v6017_v34 = vsel %vm3515_vm10, %v3778_v30, %v3780_v54  ;;  %v3776_v1 = vpop.permute.xlu1 %3775 }
 0xbe6   : > { %4071 = vmatpush1.bf16.msra.mxu1 %v3987_v33 }
 0xbe7   : > { %4072 = vmatprep.subr.bf16.mxu1 %v3990_v41 }
 0xbe8   : > { %v3549_v22 = vpop.permute.xlu0 %3548 }
 0xbe9   : > { %v3560_v46 = vsel %vm3556_vm11, %v3547_v16, %v3549_v22  ;;  %v3772_v44 = vpop.permute.xlu1 %3771 }
 0xbea   : > { %4073 = vmatpush1.bf16.msra.mxu1 %v3989_v56  ;;  %v3992_v62 = vpack.c.bf16 %v3560_v46, %v3558_v8  ;;  %v4591_v46 = vld [vmem:[%s6106_s15] ss:$8 sps:$4 sm:$0xff]  }
 0xbec   : > { %v3828_v38 = vpop.permute.xlu0 %3827  ;;  %4074 = vmatprep.subr.bf16.mxu1 %v3992_v62  ;;  %v4594_v62 = vld [vmem:[%s6106_s15 + $0x10] ss:$8 sps:$4 sm:$0xff]  }
 0xbed   : > { %v3782_v36 = vpop.permute.xlu1 %3781 }
 0xbee   : > { %v3788_v11 = vsel %vm3515_vm10, %v3780_v54, %v3782_v36  ;;  %4075 = vmatpush1.bf16.msra.mxu1 %v3991_v59 }
 0xbef   : > { %4076 = vmatprep.subr.bf16.mxu1 %v3994_v0 }
 0xbf0   : > { %v3622_v2 = vpop.permute.xlu0 %3621 }
 0xbf1   : > { %v3632_v47 = vsel %vm2154_vm8, %v3620_v7, %v3622_v2  ;;  %v4539_v42 = vpop.permute.xlu1 %4538 }
 0xbf2   : > { %v4541_v8 = vunpack.i.h.bf16 %v4539_v42  ;;  %v4540_v58 = vunpack.i.l.bf16 %v4539_v42  ;;  %4077 = vmatpush1.bf16.msra.mxu1 %v3993_v24  ;;  %v3996_v6 = vpack.c.bf16 %v5801_v49, %v3632_v47  ;;  %v3997_v49 = vpack.c.bf16 %v5832_v60, %v5823_v63 }
 0xbf4   : > { %v3841_v39 = vsel %vm3837_vm13, %v3828_v38, %v4541_v8  ;;  %v3839_v31 = vsel %vm3837_vm13, %v3822_v27, %v4540_v58  ;;  %v3836_v50 = vpop.permute.xlu0 %3835  ;;  %4078 = vmatprep.subr.bf16.mxu1 %v3996_v6 }
 0xbf5   : > { %v3820_v52 = vpop.permute.xlu1 %3819 }
 0xbf6   : > { %v3838_v19 = vsel %vm3837_vm13, %v3820_v52, %v3822_v27  ;;  %4079 = vmatpush1.bf16.msra.mxu1 %v3995_v57 }
 0xbf7   : > { %4080 = vmatprep.subr.bf16.mxu1 %v3998_v21  ;;  %v4005_v54 = vpack.c.bf16 %v3838_v19, %v6017_v34 }
 0xbf8   : > { %v3832_v20 = vpop.permute.xlu0 %3831 }
 0xbf9   : > { %v3834_v9 = vpop.permute.xlu1 %3833 }
 0xbfa   : > { %v3842_v37 = vsel %vm3837_vm13, %v3832_v20, %v3834_v9  ;;  %v3843_v53 = vsel %vm3837_vm13, %v3834_v9, %v3836_v50  ;;  %4081 = vmatpush1.bf16.msra.mxu1 %v3997_v49 }
 0xbfb   : > { %4082 = vmatprep.subr.bf16.mxu1 %v4000_v10  ;;  %v4008_v55 = vpack.c.bf16 %v3843_v53, %v3841_v39 }
 0xbfc   : > { %v3703_v32 = vpop.permute.xlu0 %3702 }
 0xbfd   : > { %v3714_v26 = vsel %vm3588_vm15, %v6001_v14, %v3703_v32  ;;  %v3715_v63 = vsel %vm3588_vm15, %v3703_v32, %v5803_v51  ;;  %v3826_v60 = vpop.permute.xlu1 %3825 }
 0xbfe   : > { %3726 = vst [vmem:[#allocation2 + $0x100] sm:$0xff] %v3714_v26  ;;  %v3840_v29 = vsel %vm3837_vm13, %v3826_v60, %v3828_v38  ;;  %4083 = vmatpush1.bf16.msra.mxu1 %v3999_v43  ;;  %v4002_v18 = vpack.c.bf16 %v5812_v5, %v3715_v63  ;;  %v4001_v4 = vpack.c.bf16 %v5815_v45, %v3714_v26 }
 0xbff   : > { %v4006_v5 = vpack.c.bf16 %v3839_v31, %v3788_v11  ;;  %v4007_v27 = vpack.c.bf16 %v3842_v37, %v3840_v29 }
 0xc00   : > { %v3774_v21 = vpop.permute.xlu0 %3773  ;;  %4084 = vmatprep.subr.bf16.mxu1 %v4002_v18 }
 0xc01   : > { %v3785_v16 = vsel %vm3515_vm10, %v3772_v44, %v3774_v21  ;;  %v3786_v15 = vsel %vm3515_vm10, %v3774_v21, %v3776_v1  ;;  %v3894_v12 = vpop.permute.xlu1 %3893  ;;  %v4592_v44 = vld [vmem:[%s6106_s15 + $0x14] ss:$8 sps:$4 sm:$0xff]  }
 0xc02   : > { %4085 = vmatpush1.bf16.msra.mxu1 %v4001_v4  ;;  %v4004_v14 = vpack.c.bf16 %v3786_v15, %v6013_v3  ;;  %v4003_v35 = vpack.c.bf16 %v3785_v16, %v6006_v13 }
 0xc04   : > { %v3896_v51 = vpop.permute.xlu0 %3895  ;;  %4086 = vmatprep.subr.bf16.mxu1 %v4004_v14 }
 0xc05   : > { %v3910_v48 = vsel %vm3374_vm14, %v3894_v12, %v3896_v51  ;;  %v3892_v7 = vpop.permute.xlu1 %3891 }
 0xc06   : > { %v3909_v61 = vsel %vm3374_vm14, %v3892_v7, %v3894_v12  ;;  %4087 = vmatpush1.bf16.msra.mxu1 %v4003_v35 }
 0xc07   : > { %4088 = vmatprep.subr.bf16.mxu1 %v4006_v5 }
 0xc08   : > { %v3902_v45 = vpop.permute.xlu0 %3901 }
 0xc09   : > { %v3904_v40 = vpop.permute.xlu1 %3903 }
 0xc0a   : > { %4089 = vmatpush1.bf16.msra.mxu1 %v4005_v54 }
 0xc0b   : > { %4090 = vmatprep.subr.bf16.mxu1 %v4008_v55 }
 0xc0c   : > { %v3898_v17 = vpop.permute.xlu0 %3897 }
 0xc0d   : > { %v3900_v23 = vpop.permute.xlu1 %3899 }
 0xc0e   : > { %v3911_v13 = vsel %vm3374_vm14, %v3898_v17, %v3900_v23  ;;  %v3912_v28 = vsel %vm3374_vm14, %v3900_v23, %v3902_v45  ;;  %4091 = vmatpush1.bf16.msra.mxu1 %v4007_v27 }
 0xc0f   : > { %v4010_v25 = vpack.c.bf16 %v3912_v28, %v3910_v48  ;;  %v4009_v3 = vpack.c.bf16 %v3911_v13, %v3909_v61 }
 0xc10   : > { %v3906_v30 = vpop.permute.xlu0 %3905 }
 0xc11   : > { %v3913_v33 = vsel %vm3374_vm14, %v3904_v40, %v3906_v30  ;;  %v3908_v1 = vpop.permute.xlu1 %3907  ;;  %4092 = vmatprep.subr.bf16.mxu1 %v4010_v25 }
 0xc12   : > { %v3914_v34 = vsel %vm3374_vm14, %v3906_v30, %v3908_v1  ;;  %4093 = vmatpush1.bf16.msra.mxu1 %v4009_v3  ;;  %v4011_v41 = vpack.c.bf16 %v3913_v33, %v3913_v33 }
 0xc13   : > { %v4012_v22 = vpack.c.bf16 %v3914_v34, %v3914_v34 }
 0xc14   : > { %v4063_v56 = vsel %vm1130_vm4, %v4011_v41, 0 }
 0xc15   : > { %4290 = vmatprep.subr.msk.bf16.mxu1 %vm1130_vm4, %v4012_v22 }
 0xc16   : > { %4095 = vmatpush1.bf16.msra.mxu1 %v4063_v56 }
 0xc19   : > { %4101 = vmatmul.mubr.bf16.vlgmr.msra.gmra.mrb[16].mxu1 %v4591_v46 }
 0xc1a   : > { %4292 = vmatprep.mubr.msk.bf16.mxu1 %vm4055_vm1, %v4592_v44 }
 0xc21   : > { %4111 = vmatmul.mubr.bf16.gmra.mrb[20].mxu1 %v4594_v62  ;;  %v4020_v38 = vpop.permute.xlu0 %4019 }
 0xc22   : > { %v4025_v11 = vpop.permute.xlu1 %4024 }
 0xc25   : > { %v4030_v50 = vpop.permute.xlu0 %4029 }
 0xc26   : > { %v4035_v20 = vpop.permute.xlu1 %4034 }
 0xcec   : > { %v4102_v59 = vpop.f32.mrb[16].mxu1 }
 0xced   : > { %v4103_v36 = vadd.f32 %v4102_v59, %v4020_v38  ;;  %v4104_v0 = vpop.f32.mrb[17].mxu1 }
 0xcee   : > { %v4105_v2 = vadd.f32 %v4104_v0, %v4020_v38  ;;  %v4106_v24 = vpop.f32.mrb[18].mxu1 }
 0xcef   : > { %v4121_v47 = vmax.f32 %v4103_v36, 0.0  ;;  %v4107_v42 = vadd.f32 %v4106_v24, %v4025_v11  ;;  %v4108_v8 = vpop.f32.mrb[19].mxu1 }
 0xcf0   : > { %v4122_v58 = vmax.f32 %v4105_v2, 0.0  ;;  %v4109_v6 = vadd.f32 %v4108_v8, %v4025_v11 }
 0xcf1   : > { %4129 = vst [vmem:[%s6078_s5] sm:$0xff] %v4121_v47  ;;  %v4123_v39 = vmax.f32 %v4107_v42, 0.0 }
 0xcf2   : > { %4130 = vst [vmem:[%s6078_s5 + $0x8] sm:$0xff] %v4122_v58  ;;  %v4124_v31 = vmax.f32 %v4109_v6, 0.0 }
 0xcf3   : > { %4131 = vst [vmem:[%s6078_s5 + $0x10] sm:$0xff] %v4123_v39 }
 0xcf4   : > { %4132 = vst [vmem:[%s6078_s5 + $0x18] sm:$0xff] %v4124_v31  ;;  %v4112_v57 = vpop.f32.mrb[20].mxu1 }
 0xcf5   : > { %v4113_v52 = vadd.f32 %v4112_v57, %v4030_v50  ;;  %v4114_v19 = vpop.f32.mrb[21].mxu1 }
 0xcf6   : > { %v4115_v49 = vadd.f32 %v4114_v19, %v4030_v50  ;;  %v4116_v9 = vpop.f32.mrb[22].mxu1 }
 0xcf7   : > { %v4125_v10 = vmax.f32 %v4113_v52, 0.0  ;;  %v4117_v37 = vadd.f32 %v4116_v9, %v4035_v20  ;;  %v4118_v53 = vpop.f32.mrb[23].mxu1 }
 0xcf8   : > { %v4126_v32 = vmax.f32 %v4115_v49, 0.0  ;;  %v4119_v43 = vadd.f32 %v4118_v53, %v4035_v20 }
 0xcf9   : > { %4133 = vst [vmem:[%s6078_s5 + $0x20] sm:$0xff] %v4125_v10  ;;  %v4127_v26 = vmax.f32 %v4117_v37, 0.0 }
 0xcfa   : > { %4134 = vst [vmem:[%s6078_s5 + $0x28] sm:$0xff] %v4126_v32  ;;  %v4128_v63 = vmax.f32 %v4119_v43, 0.0 }
 0xcfb   : > { %4135 = vst [vmem:[%s6078_s5 + $0x30] sm:$0xff] %v4127_v26 }
 0xcfc   : > { %4136 = vst [vmem:[%s6078_s5 + $0x38] sm:$0xff] %v4128_v63 }
 0xcfd PF: > { %s33_s4 = sadd.s32 1, %s4603_s4  }
 0xcfe   : > { %p30_p4 = scmp.ge.s32.totalorder %s33_s4, 4  }
 0xd00   :  { %32 = sbr.rel (!%p30_p4) target bundleno = 14 (0xe), region = 142 }

</bundles_post_ra>
